<compile_context>
chip_gen: v6e
topology: v6e:2x2x1
jax: 0.10.0
libtpu: 0.0.40
codegen_flags: <defaults>
</compile_context>

<pallas_src>
import functools

import jax
import jax.numpy as jnp
from jax import lax
from jax.experimental import pallas as pl
from jax.experimental.pallas import tpu as pltpu


# ---------------------------------------------------------------------------
# Pallas kernel: fused im2col conv GEMM + combined-bias epilogue
# ---------------------------------------------------------------------------
def _normconv_kernel(x_ref, w_ref, b_ref, o_ref, *, kh, kw, stride, Ho, Wo):
    """One batch element per grid step.

    x_ref: (1, Hp, Wp, Cin)   bf16  padded NHWC input slab
    w_ref: (kh*kw, Cin, Cout) bf16  gamma-folded, weight-normalized weights
    b_ref: (1, Cout)          f32   combined bias (gamma*bias + beta)
    o_ref: (1, Cout, Ho*Wo)   f32   NCHW(-flattened) output block
    """
    cout = o_ref.shape[1]
    acc = jnp.zeros((Ho * Wo, cout), jnp.float32)
    for i in range(kh):
        for j in range(kw):
            hi = i + (Ho - 1) * stride + 1
            wj = j + (Wo - 1) * stride + 1
            win = x_ref[0, i:hi, j:wj, :]                  # contiguous window
            patch = win[::stride, ::stride, :] if stride > 1 else win
            p2 = patch.reshape(Ho * Wo, patch.shape[-1])   # (Ho*Wo, Cin) bf16
            acc = acc + jnp.dot(p2, w_ref[i * kw + j],
                                preferred_element_type=jnp.float32)
    out = acc + b_ref[...]                       # single fused epilogue add (f32)
    o_ref[0] = out.T.astype(o_ref.dtype)         # lane-dense (Cout, Ho*Wo) store


# ---------------------------------------------------------------------------
# NormConv2d forward
# ---------------------------------------------------------------------------
def norm_conv2d(x, params, *, stride=1, padding=0):
    """x: (N, Cin, H, W) f32. Returns (N, Cout, Ho, Wo) f32."""
    v = params["v"]          # (Cout, Cin, kh, kw)  weight_norm "v"
    g = params["g"]          # (Cout, 1, 1, 1)      weight_norm "g"
    bias = params["bias"]    # (Cout,)
    gamma = params["gamma"]  # (1, Cout, 1, 1)
    beta = params["beta"]    # (1, Cout, 1, 1)

    Cout, Cin, kh, kw = v.shape
    N, _, H, W = x.shape
    Ho = (H + 2 * padding - kh) // stride + 1
    Wo = (W + 2 * padding - kw) // stride + 1
    Hp, Wp = H + 2 * padding, W + 2 * padding

    # weight_norm: w = g * v / ||v||_2 over dims (1,2,3), per output channel.
    v_norm = jnp.sqrt(jnp.sum(v * v, axis=(1, 2, 3), keepdims=True))
    w = g * v / v_norm                                     # (Cout, Cin, kh, kw)

    # Fold the learned affine into the GEMM: W' = gamma*W, b' = gamma*bias+beta.
    gamma_c = gamma.reshape(Cout).astype(jnp.float32)
    beta_c = beta.reshape(Cout).astype(jnp.float32)
    w_eff = w * gamma_c[:, None, None, None]
    b_eff = (gamma_c * bias.astype(jnp.float32) + beta_c).reshape(1, Cout)

    # (kh*kw, Cin, Cout) bf16: wt[i*kw+j, c, o] = W'[o, c, i, j]
    wt = jnp.transpose(w_eff, (2, 3, 1, 0)).reshape(kh * kw, Cin, Cout)
    wt = wt.astype(jnp.bfloat16)

    # Pad + NHWC + bf16 cast as one XLA pass over x (no im2col in HBM).
    xp = jnp.pad(x, ((0, 0), (0, 0), (padding, padding), (padding, padding)))
    xp = jnp.transpose(xp, (0, 2, 3, 1)).astype(jnp.bfloat16)   # (N, Hp, Wp, Cin)

    # Explicit scoped-VMEM budget: double-buffered input slab + resident
    # weights/bias + output block, with headroom for in-kernel temporaries.
    x_blk = Hp * Wp * Cin * 2
    o_blk = Cout * Ho * Wo * 4
    w_bytes = kh * kw * Cin * Cout * 2 + Cout * 4
    scratch = Ho * Wo * (Cin * 2 + Cout * 4) * 4
    vmem_limit = int(min(max(4 * (2 * x_blk + 2 * o_blk + 2 * w_bytes + scratch),
                             16 * 2**20), 48 * 2**20))

    kernel = functools.partial(_normconv_kernel, kh=kh, kw=kw, stride=stride,
                               Ho=Ho, Wo=Wo)

    out = pl.pallas_call(
        kernel,
        out_shape=jax.ShapeDtypeStruct((N, Cout, Ho * Wo), jnp.float32),
        grid_spec=pltpu.PrefetchScalarGridSpec(
            num_scalar_prefetch=0,
            grid=(N,),
            in_specs=[
                pl.BlockSpec((1, Hp, Wp, Cin), lambda n: (n, 0, 0, 0)),
                pl.BlockSpec((kh * kw, Cin, Cout), lambda n: (0, 0, 0)),
                pl.BlockSpec((1, Cout), lambda n: (0, 0)),
            ],
            out_specs=pl.BlockSpec((1, Cout, Ho * Wo), lambda n: (n, 0, 0)),
        ),
        compiler_params=pltpu.CompilerParams(
            dimension_semantics=("parallel",),
            vmem_limit_bytes=vmem_limit,
        ),
    )(xp, wt, b_eff)

    # (N, Cout, Ho*Wo) -> (N, Cout, Ho, Wo): contiguous split, no data movement.
    return out.reshape(N, Cout, Ho, Wo)


# ---------------------------------------------------------------------------
# Parameter init (matches PyTorch Conv2d default init + weight_norm storage)
# ---------------------------------------------------------------------------
def init_params(key, in_channels, out_channels, kernel_size):
    kv, kb = jax.random.split(key)
    fan_in = in_channels * kernel_size * kernel_size
    bound = 1.0 / jnp.sqrt(fan_in)
    v = jax.random.uniform(
        kv, (out_channels, in_channels, kernel_size, kernel_size),
        minval=-bound, maxval=bound, dtype=jnp.float32)
    g = jnp.sqrt(jnp.sum(v * v, axis=(1, 2, 3), keepdims=True))
    bias = jax.random.uniform(kb, (out_channels,), minval=-bound, maxval=bound,
                              dtype=jnp.float32)
    gamma = jnp.ones((1, out_channels, 1, 1), jnp.float32)
    beta = jnp.zeros((1, out_channels, 1, 1), jnp.float32)
    return {"v": v, "g": g, "bias": bias, "gamma": gamma, "beta": beta}


# ---------------------------------------------------------------------------
# References for validation
# ---------------------------------------------------------------------------
def _reference_f32(x, params, *, stride, padding):
    """Pure f32 module semantics (lax conv)."""
    v, g = params["v"], params["g"]
    v_norm = jnp.sqrt(jnp.sum(v * v, axis=(1, 2, 3), keepdims=True))
    w = g * v / v_norm
    out = lax.conv_general_dilated(
        x, w, window_strides=(stride, stride),
        padding=[(padding, padding), (padding, padding)],
        dimension_numbers=("NCHW", "OIHW", "NCHW"),
        precision=lax.Precision.HIGHEST)
    out = out + params["bias"].reshape(1, -1, 1, 1)
    return params["gamma"] * out + params["beta"]


def _reference_matched(x, params, *, stride, padding):
    """Matched precision: bf16-rounded operands, gamma folded, f32 accumulate."""
    v, g = params["v"], params["g"]
    v_norm = jnp.sqrt(jnp.sum(v * v, axis=(1, 2, 3), keepdims=True))
    w = g * v / v_norm
    gamma_c = params["gamma"].reshape(-1)
    beta_c = params["beta"].reshape(-1)
    w_eff = (w * gamma_c[:, None, None, None]).astype(jnp.bfloat16)
    w_eff = w_eff.astype(jnp.float32)
    x_bf = x.astype(jnp.bfloat16).astype(jnp.float32)
    out = lax.conv_general_dilated(
        x_bf, w_eff, window_strides=(stride, stride),
        padding=[(padding, padding), (padding, padding)],
        dimension_numbers=("NCHW", "OIHW", "NCHW"),
        precision=lax.Precision.HIGHEST)
    return out + (gamma_c * params["bias"] + beta_c).reshape(1, -1, 1, 1)


if __name__ == "__main__":
    key = jax.random.PRNGKey(0)
    k_x, k_p = jax.random.split(key)

    N, Cin, H, W = 2, 4, 16, 16
    Cout, ksize, stride, padding = 8, 3, 1, 1

    x = jax.random.normal(k_x, (N, Cin, H, W), dtype=jnp.float32)
    params = init_params(k_p, Cin, Cout, ksize)

    out = norm_conv2d(x, params, stride=stride, padding=padding)
    out = jax.block_until_ready(out)

    ref_strict = _reference_matched(x, params, stride=stride, padding=padding)
    ref_f32 = _reference_f32(x, params, stride=stride, padding=padding)

    assert out.shape == ref_f32.shape == (N, Cout, H, W)
    # Strict check vs a reference using identical (bf16 operand, f32 accum) math.
    assert jnp.allclose(out, ref_strict, atol=1e-4, rtol=1e-4), \
        "mismatch vs matched-precision reference"
    # Loose check vs the pure-f32 module semantics (bf16 rounding tolerance).
    assert jnp.allclose(out, ref_f32, atol=5e-2, rtol=5e-2), \
        "mismatch vs f32 module reference"

    print("KERNEL_OK")
</pallas_src>

<mosaic_0001>
module attributes {stable_mosaic.version = 11 : i64} {
  func.func @_normconv_kernel(%arg0: i32, %arg1: memref<1x18x18x4xbf16, #tpu.memory_space<vmem>>, %arg2: memref<9x4x8xbf16, #tpu.memory_space<vmem>>, %arg3: memref<1x8xf32, #tpu.memory_space<vmem>>, %arg4: memref<1x8x256xf32, #tpu.memory_space<vmem>>) attributes {dimension_semantics = [#tpu.dimension_semantics<parallel>], iteration_bounds = array<i64: 2>, scalar_prefetch = 0 : i64, scratch_operands = 0 : i64, tpu.core_type = #tpu.core_type<tc>, window_params = [{transform_indices = @transform_0, window_bounds = array<i64: 1, 18, 18, 4>}, {pipeline_mode = #tpu.pipeline_mode<synchronous>, transform_indices = @transform_1, window_bounds = array<i64: 9, 4, 8>}, {pipeline_mode = #tpu.pipeline_mode<synchronous>, transform_indices = @transform_2, window_bounds = array<i64: 1, 8>}, {transform_indices = @transform_3, window_bounds = array<i64: 1, 8, 256>}]} {
    %cst = arith.constant 0.000000e+00 : f32
    %0 = vector.broadcast %cst : f32 to vector<256x8xf32>
    %c0 = arith.constant 0 : index
    %c0_0 = arith.constant 0 : index
    %c0_1 = arith.constant 0 : index
    %c0_2 = arith.constant 0 : index
    %1 = vector.load %arg1[%c0, %c0_0, %c0_1, %c0_2] : memref<1x18x18x4xbf16, #tpu.memory_space<vmem>>, vector<1x16x16x4xbf16>
    %2 = vector.shape_cast %1 : vector<1x16x16x4xbf16> to vector<16x16x4xbf16>
    %3 = vector.shape_cast %2 : vector<16x16x4xbf16> to vector<256x4xbf16>
    %c0_3 = arith.constant 0 : index
    %c0_4 = arith.constant 0 : index
    %c0_5 = arith.constant 0 : index
    %4 = vector.load %arg2[%c0_3, %c0_4, %c0_5] : memref<9x4x8xbf16, #tpu.memory_space<vmem>>, vector<1x4x8xbf16>
    %5 = vector.shape_cast %4 : vector<1x4x8xbf16> to vector<4x8xbf16>
    %cst_6 = arith.constant dense<0.000000e+00> : vector<256x8xf32>
    %6 = tpu.matmul %3, %5, %cst_6 {dimension_numbers = #tpu.dot_dimension_numbers<[1], [0], [0], [1], [0, 0, 1, 1], [], []>} : vector<256x4xbf16>, vector<4x8xbf16>, vector<256x8xf32> -> vector<256x8xf32>
    %7 = arith.addf %0, %6 : vector<256x8xf32>
    %c0_7 = arith.constant 0 : index
    %c0_8 = arith.constant 0 : index
    %c1 = arith.constant 1 : index
    %c0_9 = arith.constant 0 : index
    %8 = vector.load %arg1[%c0_7, %c0_8, %c1, %c0_9] : memref<1x18x18x4xbf16, #tpu.memory_space<vmem>>, vector<1x16x16x4xbf16>
    %9 = vector.shape_cast %8 : vector<1x16x16x4xbf16> to vector<16x16x4xbf16>
    %10 = vector.shape_cast %9 : vector<16x16x4xbf16> to vector<256x4xbf16>
    %c1_10 = arith.constant 1 : index
    %c0_11 = arith.constant 0 : index
    %c0_12 = arith.constant 0 : index
    %11 = vector.load %arg2[%c1_10, %c0_11, %c0_12] : memref<9x4x8xbf16, #tpu.memory_space<vmem>>, vector<1x4x8xbf16>
    %12 = vector.shape_cast %11 : vector<1x4x8xbf16> to vector<4x8xbf16>
    %cst_13 = arith.constant dense<0.000000e+00> : vector<256x8xf32>
    %13 = tpu.matmul %10, %12, %cst_13 {dimension_numbers = #tpu.dot_dimension_numbers<[1], [0], [0], [1], [0, 0, 1, 1], [], []>} : vector<256x4xbf16>, vector<4x8xbf16>, vector<256x8xf32> -> vector<256x8xf32>
    %14 = arith.addf %7, %13 : vector<256x8xf32>
    %c0_14 = arith.constant 0 : index
    %c0_15 = arith.constant 0 : index
    %c2 = arith.constant 2 : index
    %c0_16 = arith.constant 0 : index
    %15 = vector.load %arg1[%c0_14, %c0_15, %c2, %c0_16] : memref<1x18x18x4xbf16, #tpu.memory_space<vmem>>, vector<1x16x16x4xbf16>
    %16 = vector.shape_cast %15 : vector<1x16x16x4xbf16> to vector<16x16x4xbf16>
    %17 = vector.shape_cast %16 : vector<16x16x4xbf16> to vector<256x4xbf16>
    %c2_17 = arith.constant 2 : index
    %c0_18 = arith.constant 0 : index
    %c0_19 = arith.constant 0 : index
    %18 = vector.load %arg2[%c2_17, %c0_18, %c0_19] : memref<9x4x8xbf16, #tpu.memory_space<vmem>>, vector<1x4x8xbf16>
    %19 = vector.shape_cast %18 : vector<1x4x8xbf16> to vector<4x8xbf16>
    %cst_20 = arith.constant dense<0.000000e+00> : vector<256x8xf32>
    %20 = tpu.matmul %17, %19, %cst_20 {dimension_numbers = #tpu.dot_dimension_numbers<[1], [0], [0], [1], [0, 0, 1, 1], [], []>} : vector<256x4xbf16>, vector<4x8xbf16>, vector<256x8xf32> -> vector<256x8xf32>
    %21 = arith.addf %14, %20 : vector<256x8xf32>
    %c0_21 = arith.constant 0 : index
    %c1_22 = arith.constant 1 : index
    %c0_23 = arith.constant 0 : index
    %c0_24 = arith.constant 0 : index
    %22 = vector.load %arg1[%c0_21, %c1_22, %c0_23, %c0_24] : memref<1x18x18x4xbf16, #tpu.memory_space<vmem>>, vector<1x16x16x4xbf16>
    %23 = vector.shape_cast %22 : vector<1x16x16x4xbf16> to vector<16x16x4xbf16>
    %24 = vector.shape_cast %23 : vector<16x16x4xbf16> to vector<256x4xbf16>
    %c3 = arith.constant 3 : index
    %c0_25 = arith.constant 0 : index
    %c0_26 = arith.constant 0 : index
    %25 = vector.load %arg2[%c3, %c0_25, %c0_26] : memref<9x4x8xbf16, #tpu.memory_space<vmem>>, vector<1x4x8xbf16>
    %26 = vector.shape_cast %25 : vector<1x4x8xbf16> to vector<4x8xbf16>
    %cst_27 = arith.constant dense<0.000000e+00> : vector<256x8xf32>
    %27 = tpu.matmul %24, %26, %cst_27 {dimension_numbers = #tpu.dot_dimension_numbers<[1], [0], [0], [1], [0, 0, 1, 1], [], []>} : vector<256x4xbf16>, vector<4x8xbf16>, vector<256x8xf32> -> vector<256x8xf32>
    %28 = arith.addf %21, %27 : vector<256x8xf32>
    %c0_28 = arith.constant 0 : index
    %c1_29 = arith.constant 1 : index
    %c1_30 = arith.constant 1 : index
    %c0_31 = arith.constant 0 : index
    %29 = vector.load %arg1[%c0_28, %c1_29, %c1_30, %c0_31] : memref<1x18x18x4xbf16, #tpu.memory_space<vmem>>, vector<1x16x16x4xbf16>
    %30 = vector.shape_cast %29 : vector<1x16x16x4xbf16> to vector<16x16x4xbf16>
    %31 = vector.shape_cast %30 : vector<16x16x4xbf16> to vector<256x4xbf16>
    %c4 = arith.constant 4 : index
    %c0_32 = arith.constant 0 : index
    %c0_33 = arith.constant 0 : index
    %32 = vector.load %arg2[%c4, %c0_32, %c0_33] : memref<9x4x8xbf16, #tpu.memory_space<vmem>>, vector<1x4x8xbf16>
    %33 = vector.shape_cast %32 : vector<1x4x8xbf16> to vector<4x8xbf16>
    %cst_34 = arith.constant dense<0.000000e+00> : vector<256x8xf32>
    %34 = tpu.matmul %31, %33, %cst_34 {dimension_numbers = #tpu.dot_dimension_numbers<[1], [0], [0], [1], [0, 0, 1, 1], [], []>} : vector<256x4xbf16>, vector<4x8xbf16>, vector<256x8xf32> -> vector<256x8xf32>
    %35 = arith.addf %28, %34 : vector<256x8xf32>
    %c0_35 = arith.constant 0 : index
    %c1_36 = arith.constant 1 : index
    %c2_37 = arith.constant 2 : index
    %c0_38 = arith.constant 0 : index
    %36 = vector.load %arg1[%c0_35, %c1_36, %c2_37, %c0_38] : memref<1x18x18x4xbf16, #tpu.memory_space<vmem>>, vector<1x16x16x4xbf16>
    %37 = vector.shape_cast %36 : vector<1x16x16x4xbf16> to vector<16x16x4xbf16>
    %38 = vector.shape_cast %37 : vector<16x16x4xbf16> to vector<256x4xbf16>
    %c5 = arith.constant 5 : index
    %c0_39 = arith.constant 0 : index
    %c0_40 = arith.constant 0 : index
    %39 = vector.load %arg2[%c5, %c0_39, %c0_40] : memref<9x4x8xbf16, #tpu.memory_space<vmem>>, vector<1x4x8xbf16>
    %40 = vector.shape_cast %39 : vector<1x4x8xbf16> to vector<4x8xbf16>
    %cst_41 = arith.constant dense<0.000000e+00> : vector<256x8xf32>
    %41 = tpu.matmul %38, %40, %cst_41 {dimension_numbers = #tpu.dot_dimension_numbers<[1], [0], [0], [1], [0, 0, 1, 1], [], []>} : vector<256x4xbf16>, vector<4x8xbf16>, vector<256x8xf32> -> vector<256x8xf32>
    %42 = arith.addf %35, %41 : vector<256x8xf32>
    %c0_42 = arith.constant 0 : index
    %c2_43 = arith.constant 2 : index
    %c0_44 = arith.constant 0 : index
    %c0_45 = arith.constant 0 : index
    %43 = vector.load %arg1[%c0_42, %c2_43, %c0_44, %c0_45] : memref<1x18x18x4xbf16, #tpu.memory_space<vmem>>, vector<1x16x16x4xbf16>
    %44 = vector.shape_cast %43 : vector<1x16x16x4xbf16> to vector<16x16x4xbf16>
    %45 = vector.shape_cast %44 : vector<16x16x4xbf16> to vector<256x4xbf16>
    %c6 = arith.constant 6 : index
    %c0_46 = arith.constant 0 : index
    %c0_47 = arith.constant 0 : index
    %46 = vector.load %arg2[%c6, %c0_46, %c0_47] : memref<9x4x8xbf16, #tpu.memory_space<vmem>>, vector<1x4x8xbf16>
    %47 = vector.shape_cast %46 : vector<1x4x8xbf16> to vector<4x8xbf16>
    %cst_48 = arith.constant dense<0.000000e+00> : vector<256x8xf32>
    %48 = tpu.matmul %45, %47, %cst_48 {dimension_numbers = #tpu.dot_dimension_numbers<[1], [0], [0], [1], [0, 0, 1, 1], [], []>} : vector<256x4xbf16>, vector<4x8xbf16>, vector<256x8xf32> -> vector<256x8xf32>
    %49 = arith.addf %42, %48 : vector<256x8xf32>
    %c0_49 = arith.constant 0 : index
    %c2_50 = arith.constant 2 : index
    %c1_51 = arith.constant 1 : index
    %c0_52 = arith.constant 0 : index
    %50 = vector.load %arg1[%c0_49, %c2_50, %c1_51, %c0_52] : memref<1x18x18x4xbf16, #tpu.memory_space<vmem>>, vector<1x16x16x4xbf16>
    %51 = vector.shape_cast %50 : vector<1x16x16x4xbf16> to vector<16x16x4xbf16>
    %52 = vector.shape_cast %51 : vector<16x16x4xbf16> to vector<256x4xbf16>
    %c7 = arith.constant 7 : index
    %c0_53 = arith.constant 0 : index
    %c0_54 = arith.constant 0 : index
    %53 = vector.load %arg2[%c7, %c0_53, %c0_54] : memref<9x4x8xbf16, #tpu.memory_space<vmem>>, vector<1x4x8xbf16>
    %54 = vector.shape_cast %53 : vector<1x4x8xbf16> to vector<4x8xbf16>
    %cst_55 = arith.constant dense<0.000000e+00> : vector<256x8xf32>
    %55 = tpu.matmul %52, %54, %cst_55 {dimension_numbers = #tpu.dot_dimension_numbers<[1], [0], [0], [1], [0, 0, 1, 1], [], []>} : vector<256x4xbf16>, vector<4x8xbf16>, vector<256x8xf32> -> vector<256x8xf32>
    %56 = arith.addf %49, %55 : vector<256x8xf32>
    %c0_56 = arith.constant 0 : index
    %c2_57 = arith.constant 2 : index
    %c2_58 = arith.constant 2 : index
    %c0_59 = arith.constant 0 : index
    %57 = vector.load %arg1[%c0_56, %c2_57, %c2_58, %c0_59] : memref<1x18x18x4xbf16, #tpu.memory_space<vmem>>, vector<1x16x16x4xbf16>
    %58 = vector.shape_cast %57 : vector<1x16x16x4xbf16> to vector<16x16x4xbf16>
    %59 = vector.shape_cast %58 : vector<16x16x4xbf16> to vector<256x4xbf16>
    %c8 = arith.constant 8 : index
    %c0_60 = arith.constant 0 : index
    %c0_61 = arith.constant 0 : index
    %60 = vector.load %arg2[%c8, %c0_60, %c0_61] : memref<9x4x8xbf16, #tpu.memory_space<vmem>>, vector<1x4x8xbf16>
    %61 = vector.shape_cast %60 : vector<1x4x8xbf16> to vector<4x8xbf16>
    %cst_62 = arith.constant dense<0.000000e+00> : vector<256x8xf32>
    %62 = tpu.matmul %59, %61, %cst_62 {dimension_numbers = #tpu.dot_dimension_numbers<[1], [0], [0], [1], [0, 0, 1, 1], [], []>} : vector<256x4xbf16>, vector<4x8xbf16>, vector<256x8xf32> -> vector<256x8xf32>
    %63 = arith.addf %56, %62 : vector<256x8xf32>
    %c0_63 = arith.constant 0 : index
    %c0_64 = arith.constant 0 : index
    %64 = vector.load %arg3[%c0_63, %c0_64] : memref<1x8xf32, #tpu.memory_space<vmem>>, vector<1x8xf32>
    %65 = vector.broadcast %64 : vector<1x8xf32> to vector<256x8xf32>
    %66 = arith.addf %63, %65 : vector<256x8xf32>
    %67 = tpu.transpose %66, [1, 0] : vector<256x8xf32> -> vector<8x256xf32>
    %c0_65 = arith.constant 0 : index
    %c0_66 = arith.constant 0 : index
    %c0_67 = arith.constant 0 : index
    %68 = vector.load %arg4[%c0_65, %c0_66, %c0_67] : memref<1x8x256xf32, #tpu.memory_space<vmem>>, vector<1x8x256xf32>
    %69 = vector.shape_cast %68 : vector<1x8x256xf32> to vector<8x256xf32>
    %70 = vector.shape_cast %67 : vector<8x256xf32> to vector<1x8x256xf32>
    tpu.vector_store %arg4[%c0_65, %c0_66, %c0_67], %70 {strides = array<i32>} : memref<1x8x256xf32, #tpu.memory_space<vmem>>, vector<1x8x256xf32>,
    return
  }
  func.func @transform_0(%arg0: i32) -> (i32, i32, i32, i32) {
    %c0_i32 = arith.constant 0 : i32
    %c0_i32_0 = arith.constant 0 : i32
    %c0_i32_1 = arith.constant 0 : i32
    %c0_i32_2 = arith.constant 0 : i32
    return %arg0, %c0_i32, %c0_i32_0, %c0_i32_1 : i32, i32, i32, i32
  }
  func.func @transform_1(%arg0: i32) -> (i32, i32, i32) {
    %c0_i32 = arith.constant 0 : i32
    %c0_i32_0 = arith.constant 0 : i32
    %c0_i32_1 = arith.constant 0 : i32
    %c0_i32_2 = arith.constant 0 : i32
    return %c0_i32, %c0_i32_0, %c0_i32_1 : i32, i32, i32
  }
  func.func @transform_2(%arg0: i32) -> (i32, i32) {
    %c0_i32 = arith.constant 0 : i32
    %c0_i32_0 = arith.constant 0 : i32
    %c0_i32_1 = arith.constant 0 : i32
    return %c0_i32, %c0_i32_0 : i32, i32
  }
  func.func @transform_3(%arg0: i32) -> (i32, i32, i32) {
    %c0_i32 = arith.constant 0 : i32
    %c0_i32_0 = arith.constant 0 : i32
    %c0_i32_1 = arith.constant 0 : i32
    return %arg0, %c0_i32, %c0_i32_0 : i32, i32, i32
  }
}

</mosaic_0001>

<bundles_post_ra>
// kernel: tpu_custom_call.1
= control target key start
LH: loop header
LB: loop body
LE: loop exit
PB: predicated region body
PF: predicated region fallthrough
CT: control target
= control target key end

     0   :  { %8 = vsyncpa [#allocation3], 0  ;;  %s8732_s0 = inlined_call_operand.vmem [shape: bf16[2,18,18,4], index: 0, kind: input, shape index: {}]   ;;  %s8733_s1 = inlined_call_operand.vmem [shape: bf16[9,4,8], index: 1, kind: input, shape index: {}]   ;;  %s8734_s2 = inlined_call_operand.vmem [shape: f32[1,8], index: 2, kind: input, shape index: {}]   ;;  %s8735_s3 = inlined_call_operand.hbm [shape: f32[2,8,256], index: 3, kind: output, shape index: {}]  }
   0x1   :  { %10 = vsyncpa [#allocation3 + $0x1], 0  ;;  %s6101_s12 = smov 0   ;;  %s6103_s13 = smov 0  }
   0x2   :  { %s6105_s14 = smov 0   ;;  %s6107_s15 = smov 0  }
   0x3 LB: > { %s6122_s16 = sadd.s32 4294967295, %s6078_s15   ;;  %s4908_s17 = sadd.s32 4294967294, %s6078_s15   ;;  %s6078_s15 = sphi %s6107_s15, %s8922_s15   ;;  %s6074_s14 = sphi %s6105_s14, %s8921_s14   ;;  %s6070_s13 = sphi %s6103_s13, %s8920_s13   ;;  %s6066_s12 = sphi %s6101_s12, %s8919_s12  }
   0x4   : > { %s6126_s18 = sadd.s32 1, %s6078_s15   ;;  %s91_s19 = sadd.s32 1, %s6074_s14 }
   0x5   : > { %s88_s20 = ssub.s32 %s6078_s15, %s6126_s18  ;;  %p101_p0 = scmp.ne.s32.totalorder %s6074_s14, %s6070_s13 }
   0x6   : > { %p89_p1 = scmp.eq.s32.totalorder %s88_s20, 0  ;;  %p102_p2 = scmp.eq.s32.totalorder %s6122_s16, 1 }
   0x7   : > { %p107_p3 = scmp.ne.s32.totalorder %s6070_s13, %s6066_s12  ;;  %p108_p4 = scmp.eq.s32.totalorder %s4908_s17, 1 }
   0x8   : > { %s6137_s21 = scalar_select %p89_p1, %s6074_s14, %s91_s19  }
   0x9   : > { %p6139_p5 = por %p102_p2, %p101_p0  ;;  %p6143_p6 = por %p108_p4, %p107_p3 }
   0xa   : > { %p4911_p7 = scmp.ge.s32.totalorder %s6078_s15, 1  ;;  %p140_p8 = scmp.lt.s32.totalorder %s6078_s15, 3 }
   0xc   : > { %p141_p9 = pnand %p4911_p7, %p140_p8 }
   0xe   : > { %144 = sbr.rel (%p141_p9) target bundleno = 672 (0x2a0), region = 32 }
  0x13   : > { %v4914_v0 = vld [vmem:[%s8733_s1 + $0x2] sm:$0x3]  ;;  %vm705_vm0 = vcmask 1041408   ;;  %p164_p10 = scmp.lt.s32.totalorder %s6122_s16, 1  ;;  %v202_v2 = vld [vmem:[%s8733_s1] sm:$0x3] }
  0x14   : > { %5919 = vmatprep.subr.msk.bf16.mxu1 %vm705_vm0, %v4914_v0  ;;  %5918 = vmatprep.subr.msk.bf16.mxu0 %vm705_vm0, %v4914_v0  ;;  %v707_v1 = vsel %vm705_vm0, %v4914_v0, 0  ;;  %v4995_v3 = vld [vmem:[%s8733_s1 + $0x4] sm:$0x3]  ;;  %vm219_vm1 = vsmask.f32 3328  ;;  %v6171_v4 = vsel %vm705_vm0, %v202_v2, 0 }
  0x15   : > { %5917 = vmatpush3.bf16.msra.mxu1 %v707_v1  ;;  %5611 = vmatpush3.bf16.msra.mxu0 %v707_v1  ;;  %s165_s28 = scalar_select %p164_p10, %s6122_s16, 1  ;;  %vm220_vm2 = vsmask.f32 7440  ;;  %vm656_vm3 = vcmask 31744   ;;  %v6197_v16 = vsel %vm705_vm0, %v4995_v3, 0  ;;  %vm1210_vm5 = vcmask 1042432  }
  0x16   : > { %5920 = vmatprep.subr.msk.bf16.mxu1 %vm705_vm0, %v202_v2  ;;  %5921 = vmatprep.subr.msk.bf16.mxu0 %vm705_vm0, %v4995_v3  ;;  %vm6212_vm4 = vmor %vm219_vm1, %vm220_vm2  ;;  %vm1211_vm6 = vcmask 1046532   ;;  %s5456_s8 = sshll.u32 %s6122_s16, 8  ;;  %s6080_s20 = smov [#allocation2]  }
  0x17   : > { %s5928_s4 = smul.u32 216, %s165_s28  ;;  %vm6498_vm7 = vmor %vm1210_vm5, %vm1211_vm6  ;;  %s4847_s11 = scalar_lea.hbm %s8735_s3, %s5456_s8 }
  0x18   : > { %s6022_s24 = sshll.u32 %s6080_s20, 4  ;;  %s6023_s24 = int_to_ptr.vmem [resolvable:$false] %s6022_s24 }
  0x19   : > { %s6168_s7 = scalar_lea.vmem %s8732_s0, %s5928_s4  ;;  %s161_s4 = sand.u32 1, %s6070_s13  }
  0x1a   : > { %v6174_v5 = vld [vmem:[%s6168_s7] sm:$0xf]  ;;  %v6177_v6 = vld [vmem:[%s6168_s7 + $0x4] sm:$0xf]  ;;  %v6180_v7 = vld [vmem:[%s6168_s7 + $0x8] sm:$0x1] }
  0x1b   : > { %v223_v8 = vshrl.u32 %v6174_v5, 16  ;;  %v226_v9 = vshll.u32 %v6174_v5, 16  ;;  %v232_v10 = vshll.u32 %v6177_v6, 16  ;;  %v236_v11 = vshrl.u32 %v6177_v6, 16  ;;  %v6187_v12 = vld [vmem:[%s6168_s7 + $0x60] sm:$0xf] }
  0x1c   : > { %v242_v13 = vshll.u32 %v6180_v7, 16  ;;  %v6191_v14 = vld [vmem:[%s6168_s7 + $0x64] sm:$0xf]  ;;  %v6194_v15 = vld [vmem:[%s6168_s7 + $0x68] sm:$0x1]  ;;  %v415_v22 = vshrl.u32 %v6187_v12, 16 }
  0x1d   : > { %v225_v17 = vrot.slane %v223_v8, 4  ;;  %v228_v18 = vrot.slane %v226_v9, 5  ;;  %v234_v19 = vrot.slane %v232_v10, 5  ;;  %v238_v20 = vrot.slane %v236_v11, 4  ;;  %v6205_v29 = vld [vmem:[%s6168_s7 + $0xc] sm:$0xf] }
  0x1e   : > { %v244_v21 = vrot.slane %v242_v13, 5  ;;  %v418_v23 = vshll.u32 %v6187_v12, 16  ;;  %v424_v24 = vshll.u32 %v6191_v14, 16  ;;  %v428_v27 = vshrl.u32 %v6191_v14, 16  ;;  %v6208_v30 = vld [vmem:[%s6168_s7 + $0x10] sm:$0xf] }
  0x1f   : > { %v229_v25 = vor.u32 %v228_v18, %v225_v17  ;;  %v239_v26 = vor.u32 %v238_v20, %v234_v19  ;;  %v434_v28 = vshll.u32 %v6194_v15, 16  ;;  %v417_v33 = vrot.slane %v415_v22, 4  ;;  %v6218_v41 = vld [vmem:[%s6168_s7 + $0x14] sm:$0x1]  ;;  %v6229_v53 = vld [vmem:[%s6168_s7 + $0x6c] sm:$0xf] }
  0x20   : > { %v420_v34 = vrot.slane %v418_v23, 5  ;;  %v426_v35 = vrot.slane %v424_v24, 5  ;;  %v430_v38 = vrot.slane %v428_v27, 4  ;;  %v247_v42 = vshrl.u32 %v6205_v29, 16  ;;  %v6233_v58 = vld [vmem:[%s6168_s7 + $0x70] sm:$0xf] }
  0x21   : > { %v230_v36 = vrot.slane %v229_v25, 4  ;;  %v240_v37 = vrot.slane %v239_v26, 4  ;;  %v436_v39 = vrot.slane %v434_v28, 5  ;;  %v250_v43 = vshll.u32 %v6205_v29, 16  ;;  %v6241_v63 = vld [vmem:[%s6168_s7 + $0x74] sm:$0x1] }
  0x22   : > { %v421_v40 = vor.u32 %v420_v34, %v417_v33  ;;  %v256_v44 = vshll.u32 %v6208_v30, 16  ;;  %v431_v47 = vor.u32 %v430_v38, %v426_v35  ;;  %v260_v48 = vshrl.u32 %v6208_v30, 16  ;;  %v6247_v8 = vld [vmem:[%s6168_s7 + $0x18] sm:$0xf]  ;;  %v6260_v25 = vld [vmem:[%s6168_s7 + $0x20] sm:$0x1] }
  0x23   : > { %v235_v45 = vsel %vm6212_vm4, %v230_v36, %v234_v19  ;;  %v245_v46 = vsel %vm6212_vm4, %v240_v37, %v244_v21  ;;  %v249_v51 = vrot.slane %v247_v42, 4  ;;  %v252_v52 = vrot.slane %v250_v43, 5  ;;  %v6254_v21 = vld [vmem:[%s6168_s7 + $0x1c] sm:$0xf]  ;;  %s4912_s5 = sshll.u32 %s161_s4, 4  ;;  %s4835_s17 = scalar_lea.sflag [#allocation3], %s161_s4 }
  0x24   : > { %v4915_v49 = vcombine.low %v235_v45, %v245_v46  ;;  %v422_v50 = vrot.slane %v421_v40, 4  ;;  %v432_v54 = vrot.slane %v431_v47, 4  ;;  %v258_v55 = vrot.slane %v256_v44, 5  ;;  %v6273_v40 = vld [vmem:[%s8733_s1 + $0x8] sm:$0x3]  ;;  %s163_s6 = scalar_lea.vmem [#allocation2], %s4912_s5 }
  0x25   : > { %v262_v56 = vrot.slane %v260_v48, 4  ;;  %v266_v57 = vshll.u32 %v6218_v41, 16  ;;  %v253_v60 = vor.u32 %v252_v52, %v249_v51  ;;  %v439_v3 = vshrl.u32 %v6229_v53, 16  ;;  %v6278_v46 = vld [vmem:[%s6168_s7 + $0x7c] sm:$0xf]  ;;  %s6024_s16 = scalar_lea.vmem %s6023_s24, 512 }
  0x26   : > { %5612 = vmatprep.mubr.msk.bf16.mxu0 %vm656_vm3, %v4915_v49  ;;  %v427_v59 = vsel %vm6212_vm4, %v422_v50, %v426_v35  ;;  %v437_v0 = vsel %vm6212_vm4, %v432_v54, %v436_v39  ;;  %v442_v11 = vshll.u32 %v6229_v53, 16  ;;  %v448_v13 = vshll.u32 %v6233_v58, 16  ;;  %v6267_v35 = vld [vmem:[%s6168_s7 + $0x78] sm:$0xf] }
  0x27   : > { %v263_v1 = vor.u32 %v262_v56, %v258_v55  ;;  %v268_v2 = vrot.slane %v266_v57, 5  ;;  %v4923_v9 = vcombine.low %v427_v59, %v437_v0  ;;  %v254_v10 = vrot.slane %v253_v60, 4  ;;  %v6285_v56 = vld [vmem:[%s6168_s7 + $0x80] sm:$0x1] }
  0x28   : > { %v441_v18 = vrot.slane %v439_v3, 4  ;;  %v452_v19 = vshrl.u32 %v6233_v58, 16  ;;  %v458_v20 = vshll.u32 %v6241_v63, 16  ;;  %v444_v23 = vrot.slane %v442_v11, 5  ;;  %8773 = vst [vmem:[#allocation5_spill] sm:$0xff] %v6285_v56 }
  0x29   : > { %v264_v17 = vrot.slane %v263_v1, 4  ;;  %5628 = vmatprep.mubr.msk.bf16.mxu1 %vm656_vm3, %v4923_v9  ;;  %v259_v22 = vsel %vm6212_vm4, %v254_v10, %v258_v55  ;;  %v450_v24 = vrot.slane %v448_v13, 5  ;;  %v271_v26 = vshrl.u32 %v6247_v8, 16  ;;  %v6291_v1 = vld [vmem:[%s6168_s7 + $0x24] sm:$0xf] }
  0x2a   : > { %v454_v28 = vrot.slane %v452_v19, 4  ;;  %v460_v33 = vrot.slane %v458_v20, 5  ;;  %v274_v34 = vshll.u32 %v6247_v8, 16  ;;  %v445_v37 = vor.u32 %v444_v23, %v441_v18  ;;  %v6299_v10 = vld [vmem:[%s6168_s7 + $0x28] sm:$0xf] }
  0x2b   : > { %v269_v27 = vsel %vm6212_vm4, %v264_v17, %v268_v2  ;;  %v273_v38 = vrot.slane %v271_v26, 4  ;;  %v280_v39 = vshll.u32 %v6254_v21, 16  ;;  %v284_v44 = vshrl.u32 %v6254_v21, 16  ;;  %v6305_v19 = vld [vmem:[%s8733_s1 + $0x6] sm:$0x3] }
  0x2c   : > { %v4916_v36 = vcombine.low %v259_v22, %v269_v27  ;;  %v455_v42 = vor.u32 %v454_v28, %v450_v24  ;;  %v276_v43 = vrot.slane %v274_v34, 5  ;;  %v290_v45 = vshll.u32 %v6260_v25, 16 }
  0x2d   : > { %v446_v47 = vrot.slane %v445_v37, 4  ;;  %v282_v48 = vrot.slane %v280_v39, 5  ;;  %v463_v49 = vshrl.u32 %v6267_v35, 16  ;;  %v466_v50 = vshll.u32 %v6267_v35, 16 }
  0x2e   : > { %5613 = vmatmul.mubr.msk.bf16.vlgmr.msra.gmra.mxu0 %vm656_vm3, %v4916_v36  ;;  %v456_v51 = vrot.slane %v455_v42, 4  ;;  %v277_v52 = vor.u32 %v276_v43, %v273_v38  ;;  %v286_v54 = vrot.slane %v284_v44, 4  ;;  %v292_v55 = vrot.slane %v290_v45, 5  ;;  %v6317_v36 = vld [vmem:[%s6168_s7 + $0x84] sm:$0xf] }
  0x2f   : > { %5679 = vmatpush3.bf16.msra.mxu0 %v6197_v16  ;;  %v451_v57 = vsel %vm6212_vm4, %v446_v47, %v450_v24  ;;  %v465_v59 = vrot.slane %v463_v49, 4  ;;  %v468_v60 = vrot.slane %v466_v50, 5  ;;  %v472_v0 = vshll.u32 %v6278_v46, 16  ;;  %v6310_v24 = vld [vmem:[%s6168_s7 + $0x2c] sm:$0x1] }
  0x30   : > { %5923 = vmatprep.subr.msk.bf16.mxu0 %vm705_vm0, %v6273_v40  ;;  %v461_v16 = vsel %vm6212_vm4, %v456_v51, %v460_v33  ;;  %v278_v2 = vrot.slane %v277_v52, 4  ;;  %v287_v3 = vor.u32 %v286_v54, %v282_v48  ;;  %v476_v9 = vshrl.u32 %v6278_v46, 16  ;;  %v6324_v43 = vld [vmem:[%s6168_s7 + $0x88] sm:$0xf]  ;;  %v6332_v51 = vld [vmem:[%s6168_s7 + $0x8c] sm:$0x1] }
  0x31   : > { %v4924_v11 = vcombine.low %v451_v57, %v461_v16  ;;  %v469_v13 = vor.u32 %v468_v60, %v465_v59  ;;  %v474_v17 = vrot.slane %v472_v0, 5  ;;  %v482_v18 = vshll.u32 %v6285_v56, 16  ;;  %8774 = vst [vmem:[#allocation6_spill] sm:$0xff] %v6332_v51  ;;  %v6340_v60 = vld [vmem:[%s6168_s7 + $0x30] sm:$0xf] }
  0x32   : > { %v283_v20 = vsel %vm6212_vm4, %v278_v2, %v282_v48  ;;  %v288_v22 = vrot.slane %v287_v3, 4  ;;  %v478_v23 = vrot.slane %v476_v9, 4  ;;  %v295_v26 = vshrl.u32 %v6291_v1, 16  ;;  %v6345_v9 = vld [vmem:[%s6168_s7 + $0x34] sm:$0xf] }
  0x33   : > { %5629 = vmatmul.mubr.msk.bf16.vlgmr.msra.gmra.mxu1 %vm656_vm3, %v4924_v11  ;;  %v470_v27 = vrot.slane %v469_v13, 4  ;;  %v484_v28 = vrot.slane %v482_v18, 5  ;;  %v298_v33 = vshll.u32 %v6291_v1, 16  ;;  %v304_v34 = vshll.u32 %v6299_v10, 16 }
  0x34   : > { %5645 = vmatpush3.bf16.msra.mxu1 %v6171_v4  ;;  %v293_v37 = vsel %vm6212_vm4, %v288_v22, %v292_v55  ;;  %v479_v38 = vor.u32 %v478_v23, %v474_v17  ;;  %v297_v39 = vrot.slane %v295_v26, 4  ;;  %v308_v42 = vshrl.u32 %v6299_v10, 16 }
  0x35   : > { %v4917_v44 = vcombine.low %v283_v20, %v293_v37  ;;  %v475_v45 = vsel %vm6212_vm4, %v470_v27, %v474_v17  ;;  %v300_v47 = vrot.slane %v298_v33, 5  ;;  %v306_v48 = vrot.slane %v304_v34, 5  ;;  %5922 = vmatprep.subr.msk.bf16.mxu1 %vm705_vm0, %v6305_v19  ;;  %v6353_v33 = vld [vmem:[%s6168_s7 + $0x38] sm:$0x1] }
  0x36   : > { %v480_v4 = vrot.slane %v479_v38, 4  ;;  %v310_v49 = vrot.slane %v308_v42, 4  ;;  %v314_v50 = vshll.u32 %v6310_v24, 16  ;;  %v487_v52 = vshrl.u32 %v6317_v36, 16  ;;  %v6358_v38 = vld [vmem:[%s6168_s7 + $0x90] sm:$0xf] }
  0x37   : > { %5616 = vmatprep.mubr.msk.bf16.mxu0 %vm656_vm3, %v4917_v44  ;;  %v301_v54 = vor.u32 %v300_v47, %v297_v39  ;;  %v490_v55 = vshll.u32 %v6317_v36, 16  ;;  %v496_v57 = vshll.u32 %v6324_v43, 16  ;;  %v500_v59 = vshrl.u32 %v6324_v43, 16  ;;  %8775 = vst [vmem:[#allocation7_spill] sm:$0xff] %v6358_v38  ;;  %v6363_v47 = vld [vmem:[%s6168_s7 + $0x94] sm:$0xf] }
  0x38   : > { %v485_v0 = vsel %vm6212_vm4, %v480_v4, %v484_v28  ;;  %v311_v16 = vor.u32 %v310_v49, %v306_v48  ;;  %v316_v2 = vrot.slane %v314_v50, 5  ;;  %v489_v3 = vrot.slane %v487_v52, 4  ;;  %8776 = vst [vmem:[#allocation8_spill] sm:$0xff] %v6363_v47 }
  0x39   : > { %v4925_v11 = vcombine.low %v475_v45, %v485_v0  ;;  %v302_v13 = vrot.slane %v301_v54, 4  ;;  %v492_v17 = vrot.slane %v490_v55, 5  ;;  %v498_v18 = vrot.slane %v496_v57, 5 }
  0x3a   : > { %v312_v20 = vrot.slane %v311_v16, 4  ;;  %v502_v22 = vrot.slane %v500_v59, 4  ;;  %v506_v23 = vshll.u32 %v6332_v51, 16  ;;  %v319_v26 = vshrl.u32 %v6340_v60, 16  ;;  %v6372_v16 = vld [vmem:[%s6168_s7 + $0x98] sm:$0x1] }
  0x3b   : > { %5632 = vmatprep.mubr.msk.bf16.mxu1 %vm656_vm3, %v4925_v11  ;;  %v307_v27 = vsel %vm6212_vm4, %v302_v13, %v306_v48  ;;  %v493_v28 = vor.u32 %v492_v17, %v489_v3  ;;  %v322_v34 = vshll.u32 %v6340_v60, 16  ;;  %v328_v37 = vshll.u32 %v6345_v9, 16  ;;  %8777 = vst [vmem:[#allocation9_spill] sm:$0xff] %v6372_v16  ;;  %v6377_v11 = vld [vmem:[%s6168_s7 + $0x3c] sm:$0xf] }
  0x3c   : > { %v317_v39 = vsel %vm6212_vm4, %v312_v20, %v316_v2  ;;  %v503_v42 = vor.u32 %v502_v22, %v498_v18  ;;  %v508_v44 = vrot.slane %v506_v23, 5  ;;  %v321_v45 = vrot.slane %v319_v26, 4  ;;  %v6382_v23 = vld [vmem:[%s6168_s7 + $0x40] sm:$0xf]  ;;  %v1163_v51 = vld [vmem:[%s6168_s7 + $0xc] sm:$0xe] }
  0x3d   : > { %v4918_v48 = vcombine.low %v307_v27, %v317_v39  ;;  %v494_v4 = vrot.slane %v493_v28, 4  ;;  %v324_v49 = vrot.slane %v322_v34, 5  ;;  %v330_v50 = vrot.slane %v328_v37, 5 }
  0x3e   : > { %v504_v52 = vrot.slane %v503_v42, 4  ;;  %v332_v54 = vshrl.u32 %v6345_v9, 16  ;;  %v338_v55 = vshll.u32 %v6353_v33, 16  ;;  %v511_v57 = vshrl.u32 %v6358_v38, 16 }
  0x3f   : > { %5617 = vmatmul.mubr.msk.bf16.gmra.mxu0 %vm656_vm3, %v4918_v48  ;;  %v499_v59 = vsel %vm6212_vm4, %v494_v4, %v498_v18  ;;  %v325_v0 = vor.u32 %v324_v49, %v321_v45  ;;  %v514_v2 = vshll.u32 %v6358_v38, 16  ;;  %v520_v3 = vshll.u32 %v6363_v47, 16  ;;  %v6391_v48 = vld [vmem:[%s6168_s7 + $0x44] sm:$0x1] }
  0x40   : > { %v509_v13 = vsel %vm6212_vm4, %v504_v52, %v508_v44  ;;  %v334_v17 = vrot.slane %v332_v54, 4  ;;  %v340_v20 = vrot.slane %v338_v55, 5  ;;  %v513_v22 = vrot.slane %v511_v57, 4  ;;  %v6396_v52 = vld [vmem:[%s6168_s7 + $0x9c] sm:$0xf] }
  0x41   : > { %v4926_v18 = vcombine.low %v499_v59, %v509_v13  ;;  %v326_v26 = vrot.slane %v325_v0, 4  ;;  %v516_v27 = vrot.slane %v514_v2, 5  ;;  %v522_v28 = vrot.slane %v520_v3, 5  ;;  %8778 = vst [vmem:[#allocation10_spill] sm:$0xff] %v6396_v52  ;;  %v6400_v13 = vld [vmem:[%s6168_s7 + $0xa0] sm:$0xf] }
  0x42   : > { %v335_v34 = vor.u32 %v334_v17, %v330_v50  ;;  %v524_v37 = vshrl.u32 %v6363_v47, 16  ;;  %v530_v39 = vshll.u32 %v6372_v16, 16  ;;  %v343_v42 = vshrl.u32 %v6377_v11, 16  ;;  %8779 = vst [vmem:[#allocation11_spill] sm:$0xff] %v6400_v13 }
  0x43   : > { %5633 = vmatmul.mubr.msk.bf16.gmra.mxu1 %vm656_vm3, %v4926_v18  ;;  %v331_v44 = vsel %vm6212_vm4, %v326_v26, %v330_v50  ;;  %v517_v45 = vor.u32 %v516_v27, %v513_v22  ;;  %v346_v4 = vshll.u32 %v6377_v11, 16  ;;  %v352_v49 = vshll.u32 %v6382_v23, 16  ;;  %v6406_v26 = vld [vmem:[%s6168_s7 + $0xa4] sm:$0x1] }
  0x44   : > { %v336_v54 = vrot.slane %v335_v34, 4  ;;  %v526_v55 = vrot.slane %v524_v37, 4  ;;  %v532_v57 = vrot.slane %v530_v39, 5  ;;  %v345_v59 = vrot.slane %v343_v42, 4  ;;  %8780 = vst [vmem:[#allocation12_spill] sm:$0xff] %v6406_v26 }
  0x45   : > { %v518_v0 = vrot.slane %v517_v45, 4  ;;  %v348_v2 = vrot.slane %v346_v4, 5  ;;  %v354_v3 = vrot.slane %v352_v49, 5  ;;  %v356_v50 = vshrl.u32 %v6382_v23, 16  ;;  %v6410_v34 = vld [vmem:[%s6168_s7 + $0x48] sm:$0xf] }
  0x46   : > { %v341_v17 = vsel %vm6212_vm4, %v336_v54, %v340_v20  ;;  %v527_v22 = vor.u32 %v526_v55, %v522_v28  ;;  %v362_v18 = vshll.u32 %v6391_v48, 16  ;;  %v535_v27 = vshrl.u32 %v6396_v52, 16 }
  0x47   : > { %v4919_v37 = vcombine.low %v331_v44, %v341_v17  ;;  %v523_v39 = vsel %vm6212_vm4, %v518_v0, %v522_v28  ;;  %v349_v42 = vor.u32 %v348_v2, %v345_v59  ;;  %v358_v45 = vrot.slane %v356_v50, 4  ;;  %v6419_v17 = vld [vmem:[%s6168_s7 + $0x4c] sm:$0xf]  ;;  %v6425_v2 = vld [vmem:[%s6168_s7 + $0x50] sm:$0x1] }
  0x48   : > { %v528_v4 = vrot.slane %v527_v22, 4  ;;  %v364_v49 = vrot.slane %v362_v18, 5  ;;  %v537_v20 = vrot.slane %v535_v27, 4  ;;  %v538_v54 = vshll.u32 %v6396_v52, 16 }
  0x49   : > { %5620 = vmatprep.mubr.msk.bf16.mxu0 %vm656_vm3, %v4919_v37  ;;  %v350_v55 = vrot.slane %v349_v42, 4  ;;  %v359_v62 = vor.u32 %v358_v45, %v354_v3  ;;  %v544_v32 = vshll.u32 %v6400_v13, 16  ;;  %v548_v44 = vshrl.u32 %v6400_v13, 16  ;;  %v6431_v42 = vld [vmem:[%s6168_s7 + $0xa8] sm:$0xf] }
  0x4a   : > { %v533_v28 = vsel %vm6212_vm4, %v528_v4, %v532_v57  ;;  %v540_v59 = vrot.slane %v538_v54, 5  ;;  %v554_v0 = vshll.u32 %v6406_v26, 16  ;;  %v367_v50 = vshrl.u32 %v6410_v34, 16  ;;  %8781 = vst [vmem:[#allocation13_spill] sm:$0xff] %v6431_v42 }
  0x4b   : > { %v4927_v22 = vcombine.low %v523_v39, %v533_v28  ;;  %v355_v18 = vsel %vm6212_vm4, %v350_v55, %v354_v3  ;;  %v360_v27 = vrot.slane %v359_v62, 4  ;;  %v546_v37 = vrot.slane %v544_v32, 5 }
  0x4c   : > { %v541_v45 = vor.u32 %v540_v59, %v537_v20  ;;  %v550_v61 = vrot.slane %v548_v44, 4  ;;  %v556_v57 = vrot.slane %v554_v0, 5  ;;  %v369_v4 = vrot.slane %v367_v50, 4  ;;  %v6441_v44 = vld [vmem:[%s6168_s7 + $0xac] sm:$0xf] }
  0x4d   : > { %5636 = vmatprep.mubr.msk.bf16.mxu1 %vm656_vm3, %v4927_v22  ;;  %v365_v54 = vsel %vm6212_vm4, %v360_v27, %v364_v49  ;;  %v370_v39 = vshll.u32 %v6410_v34, 16  ;;  %v376_v28 = vshll.u32 %v6419_v17, 16  ;;  %v380_v62 = vshrl.u32 %v6419_v17, 16  ;;  %8782 = vst [vmem:[#allocation14_spill] sm:$0xff] %v6441_v44  ;;  %v6444_v22 = vld [vmem:[%s6168_s7 + $0xb0] sm:$0x1] }
  0x4e   : > { %v4920_v3 = vcombine.low %v355_v18, %v365_v54  ;;  %v542_v32 = vrot.slane %v541_v45, 4  ;;  %v551_v55 = vor.u32 %v550_v61, %v546_v37  ;;  %v386_v20 = vshll.u32 %v6425_v2, 16  ;;  %8783 = vst [vmem:[#allocation15_spill] sm:$0xff] %v6444_v22 }
  0x4f   : > { %v372_v59 = vrot.slane %v370_v39, 5  ;;  %v378_v0 = vrot.slane %v376_v28, 5  ;;  %v382_v50 = vrot.slane %v380_v62, 4  ;;  %v559_v49 = vshrl.u32 %v6431_v42, 16  ;;  %v6453_v62 = vld [vmem:[%s6168_s7 + $0x54] sm:$0xf] }
  0x50   : > { %5621 = vmatmul.mubr.msk.bf16.gmra.mxu0 %vm656_vm3, %v4920_v3  ;;  %v547_v18 = vsel %vm6212_vm4, %v542_v32, %v546_v37  ;;  %v552_v27 = vrot.slane %v551_v55, 4  ;;  %v388_v61 = vrot.slane %v386_v20, 5  ;;  %v562_v45 = vshll.u32 %v6431_v42, 16  ;;  %v6460_v55 = vld [vmem:[%s6168_s7 + $0x58] sm:$0xf] }
  0x51   : > { %v373_v54 = vor.u32 %v372_v59, %v369_v4  ;;  %v383_v56 = vor.u32 %v382_v50, %v378_v0  ;;  %v561_v39 = vrot.slane %v559_v49, 4  ;;  %v568_v28 = vshll.u32 %v6441_v44, 16  ;;  %v6463_v49 = vld [vmem:[%s6168_s7 + $0x5c] sm:$0x1] }
  0x52   : > { %v557_v3 = vsel %vm6212_vm4, %v552_v27, %v556_v57  ;;  %v564_v26 = vrot.slane %v562_v45, 5  ;;  %v572_v37 = vshrl.u32 %v6441_v44, 16  ;;  %v578_v32 = vshll.u32 %v6444_v22, 16  ;;  %v1162_v22 = vld [vmem:[%s6168_s7] sm:$0xe] }
  0x53   : > { %v4928_v4 = vcombine.low %v547_v18, %v557_v3  ;;  %v374_v20 = vrot.slane %v373_v54, 4  ;;  %v384_v59 = vrot.slane %v383_v56, 4  ;;  %v570_v50 = vrot.slane %v568_v28, 5  ;;  %v6474_v54 = vld [vmem:[%s6168_s7 + $0xb4] sm:$0xf] }
  0x54   : > { %v565_v42 = vor.u32 %v564_v26, %v561_v39  ;;  %v574_v52 = vrot.slane %v572_v37, 4  ;;  %v580_v13 = vrot.slane %v578_v32, 5  ;;  %v391_v57 = vshrl.u32 %v6453_v62, 16  ;;  %8784 = vst [vmem:[#allocation16_spill] sm:$0xff] %v6474_v54  ;;  %v6477_v37 = vld [vmem:[%s6168_s7 + $0xb8] sm:$0xf] }
  0x55   : > { %5637 = vmatmul.mubr.msk.bf16.gmra.mxu1 %vm656_vm3, %v4928_v4  ;;  %v379_v27 = vsel %vm6212_vm4, %v374_v20, %v378_v0  ;;  %v389_v18 = vsel %vm6212_vm4, %v384_v59, %v388_v61  ;;  %v394_v56 = vshll.u32 %v6453_v62, 16  ;;  %v400_v45 = vshll.u32 %v6460_v55, 16  ;;  %v6482_v61 = vld [vmem:[%s6168_s7 + $0xbc] sm:$0x1] }
  0x56   : > { %v4921_v26 = vcombine.low %v379_v27, %v389_v18  ;;  %v566_v39 = vrot.slane %v565_v42, 4  ;;  %v575_v28 = vor.u32 %v574_v52, %v570_v50  ;;  %v393_v3 = vrot.slane %v391_v57, 4 }
  0x57   : > { %v396_v32 = vrot.slane %v394_v56, 5  ;;  %v402_v4 = vrot.slane %v400_v45, 5  ;;  %v404_v0 = vshrl.u32 %v6460_v55, 16  ;;  %v410_v20 = vshll.u32 %v6463_v49, 16 }
  0x58   : > { %5624 = vmatprep.mubr.msk.bf16.mxu0 %vm656_vm3, %v4921_v26  ;;  %v571_v59 = vsel %vm6212_vm4, %v566_v39, %v570_v50  ;;  %v576_v27 = vrot.slane %v575_v28, 4  ;;  %v583_v52 = vshrl.u32 %v6474_v54, 16  ;;  %v586_v42 = vshll.u32 %v6474_v54, 16 }
  0x59   : > { %v397_v57 = vor.u32 %v396_v32, %v393_v3  ;;  %v406_v18 = vrot.slane %v404_v0, 4  ;;  %v412_v56 = vrot.slane %v410_v20, 5  ;;  %v592_v45 = vshll.u32 %v6477_v37, 16 }
  0x5a   : > { %v581_v44 = vsel %vm6212_vm4, %v576_v27, %v580_v13  ;;  %v585_v16 = vrot.slane %v583_v52, 4  ;;  %v588_v26 = vrot.slane %v586_v42, 5  ;;  %v596_v38 = vshrl.u32 %v6477_v37, 16 }
  0x5b   : > { %v4929_v50 = vcombine.low %v571_v59, %v581_v44  ;;  %v398_v39 = vrot.slane %v397_v57, 4  ;;  %v407_v28 = vor.u32 %v406_v18, %v402_v4  ;;  %v594_v47 = vrot.slane %v592_v45, 5  ;;  %v1164_v57 = vld [vmem:[%s6168_s7 + $0x18] sm:$0xe] }
  0x5c   : > { %v589_v54 = vor.u32 %v588_v26, %v585_v16  ;;  %v598_v3 = vrot.slane %v596_v38, 4  ;;  %v602_v32 = vshll.u32 %v6482_v61, 16  ;;  %v4979_v13 = vrot.slane %v1162_v22, 9 }
  0x5d   : > { %5640 = vmatprep.mubr.msk.bf16.mxu1 %vm656_vm3, %v4929_v50  ;;  %v403_v44 = vsel %vm6212_vm4, %v398_v39, %v402_v4  ;;  %v408_v20 = vrot.slane %v407_v28, 4  ;;  %v1215_v59 = vrot.slane %v6177_v6, 5  ;;  %v4948_v38 = vcombine.low %v6205_v29, %v6208_v30 }
  0x5e   : > { %v590_v16 = vrot.slane %v589_v54, 4  ;;  %v599_v27 = vor.u32 %v598_v3, %v594_v47  ;;  %v604_v52 = vrot.slane %v602_v32, 5  ;;  %v4980_v42 = vrot.slane %v1163_v51, 9 }
  0x5f   : > { %v413_v18 = vsel %vm6212_vm4, %v408_v20, %v412_v56  ;;  %v1216_v22 = vsel %vm6498_vm7, %v4979_v13, %v1215_v59  ;;  %v1217_v45 = vrot.slane %v1215_v59, 4  ;;  %v8787_v4 = vrot.slane %v6208_v30, 5 }
  0x60   : > { %v4922_v50 = vcombine.low %v403_v44, %v413_v18  ;;  %v595_v54 = vsel %vm6212_vm4, %v590_v16, %v594_v47  ;;  %v600_v39 = vrot.slane %v599_v27, 4  ;;  %v4947_v51 = vcombine.low %v6174_v5, %v6177_v6  ;;  %v1165_v27 = vld [vmem:[%s6168_s7 + $0x24] sm:$0xe] }
  0x61   : > { %v1224_v26 = vrot.slane %v8787_v4, 4  ;;  %v8788_v28 = vrot.slane %v6180_v7, 5  ;;  %v8789_v3 = vmov %v8787_v4  ;;  %v4949_v13 = vcombine.low %v6247_v8, %v6254_v21  ;;  %v1167_v4 = vld [vmem:[%s6168_s7 + $0x3c] sm:$0xe] }
  0x62   : > { %v1223_v32 = vsel %vm6498_vm7, %v4980_v42, %v8789_v3  ;;  %v4981_v44 = vrot.slane %v1164_v57, 9  ;;  %5625 = vmatmul.mubr.msk.bf16.gmra.mxu0 %vm656_vm3, %v4922_v50  ;;  %v605_v47 = vsel %vm6212_vm4, %v600_v39, %v604_v52  ;;  %v8790_v6 = vrot.slane %v6218_v41, 5  ;;  %v1166_v42 = vld [vmem:[%s6168_s7 + $0x30] sm:$0xe]  ;;  %v1168_v39 = vld [vmem:[%s6168_s7 + $0x48] sm:$0xe] }
  0x63   : > { %v1219_v56 = vsel %vm6498_vm7, %v1217_v45, %v8788_v28  ;;  %v1229_v20 = vrot.slane %v6254_v21, 5  ;;  %v4930_v59 = vcombine.low %v595_v54, %v605_v47  ;;  %v1232_v16 = vrot.slane %v6260_v25, 5  ;;  %v1169_v47 = vld [vmem:[%s6168_s7 + $0x54] sm:$0xe]  ;;  %v6793_v21 = vld [vmem:[%s6168_s7 + $0x2c] sm:$0x1] }
  0x64   : > { %v4996_v5 = vcombine.low %v1216_v22, %v1219_v56  ;;  %v1226_v7 = vsel %vm6498_vm7, %v1224_v26, %v8790_v6  ;;  %v1783_v52 = vsel %vm705_vm0, %v6305_v19, 0  ;;  %v1236_v18 = vrot.slane %v6299_v10, 5 }
  0x65   : > { %v1230_v41 = vsel %vm6498_vm7, %v4981_v44, %v1229_v20  ;;  %v1231_v57 = vrot.slane %v1229_v20, 4  ;;  %5641 = vmatmul.mubr.msk.bf16.gmra.mxu1 %vm656_vm3, %v4930_v59  ;;  %v4997_v22 = vcombine.low %v1223_v32, %v1226_v7  ;;  %v2509_v25 = vsel %vm705_vm0, %v6273_v40, 0 }
  0x66   : > { %5680 = vmatprep.mubr.msk.bf16.mxu0 %vm656_vm3, %v4996_v5  ;;  %v1243_v45 = vrot.slane %v6345_v9, 5  ;;  %5646 = vmatprep.mubr.msk.bf16.mxu1 %vm656_vm3, %v4947_v51  ;;  %v4982_v26 = vrot.slane %v1165_v27, 9  ;;  %v1239_v50 = vrot.slane %v6310_v24, 5  ;;  %v4983_v54 = vrot.slane %v1166_v42, 9  ;;  %v6565_v24 = vld [vmem:[%s8733_s1 + $0xc] sm:$0x3] }
  0x67   : > { %v1233_v19 = vsel %vm6498_vm7, %v1231_v57, %v1232_v16  ;;  %v1238_v56 = vrot.slane %v1236_v18, 4  ;;  %v1246_v32 = vrot.slane %v6353_v33, 5  ;;  %v4984_v44 = vrot.slane %v1167_v4, 9 }
  0x68   : > { %v4998_v28 = vcombine.low %v1230_v41, %v1233_v19  ;;  %v1245_v3 = vrot.slane %v1243_v45, 4  ;;  %v1250_v40 = vrot.slane %v6382_v23, 5  ;;  %v1274_v5 = vrot.slane %v6194_v15, 5 }
  0x69   : > { %v1253_v51 = vrot.slane %v6391_v48, 5  ;;  %v4985_v6 = vrot.slane %v1168_v39, 9  ;;  %v1257_v7 = vrot.slane %v6419_v17, 5  ;;  %v4950_v33 = vcombine.low %v6291_v1, %v6299_v10  ;;  %v1170_v1 = vld [vmem:[%s6168_s7 + $0x60] sm:$0xe] }
  0x6a   : > { %5681 = vmatmul.mubr.msk.bf16.vlgmr.msra.gmra.mxu0 %vm656_vm3, %v4997_v22  ;;  %v1237_v20 = vsel %vm6498_vm7, %v4982_v26, %v1236_v18  ;;  %v1252_v59 = vrot.slane %v1250_v40, 4  ;;  %v1260_v16 = vrot.slane %v6425_v2, 5  ;;  %v1240_v48 = vsel %vm6498_vm7, %v1238_v56, %v1239_v50  ;;  %v6593_v22 = vld [vmem:[%s8733_s1 + $0xa] sm:$0x3]  ;;  %v6618_v50 = vld [vmem:[%s6168_s7 + $0x6c] sm:$0xe] }
  0x6b   : > { %5747 = vmatpush3.bf16.msra.mxu0 %v2509_v25  ;;  %5684 = vmatprep.mubr.msk.bf16.mxu0 %vm656_vm3, %v4998_v28  ;;  %v1244_v27 = vsel %vm6498_vm7, %v4983_v54, %v1243_v45  ;;  %v1247_v42 = vsel %vm6498_vm7, %v1245_v3, %v1246_v32  ;;  %v1259_v41 = vrot.slane %v1257_v7, 4  ;;  %v6583_v10 = vsel %vm6498_vm7, %v4984_v44, %v1250_v40  ;;  %v1173_v39 = vld [vmem:[%s6168_s7 + $0x84] sm:$0xe]  ;;  %v6647_v44 = vld [vmem:[%s6168_s7 + $0x78] sm:$0xe] }
  0x6c   : > { %v6587_v2 = vsel %vm6498_vm7, %v4985_v6, %v1257_v7  ;;  %v4986_v57 = vrot.slane %v1169_v47, 9  ;;  %v1264_v18 = vrot.slane %v6460_v55, 5  ;;  %5925 = vmatprep.subr.msk.bf16.mxu0 %vm705_vm0, %v6565_v24  ;;  %v6603_v25 = vsel %vm6498_vm7, %v1252_v59, %v1253_v51  ;;  %v1174_v40 = vld [vmem:[%s6168_s7 + $0x90] sm:$0xe] }
  0x6d   : > { %5647 = vmatmul.mubr.msk.bf16.vlgmr.msra.gmra.mxu1 %vm656_vm3, %v4948_v38  ;;  %v6607_v45 = vsel %vm6498_vm7, %v1259_v41, %v1260_v16  ;;  %v1267_v4 = vrot.slane %v6463_v49, 5  ;;  %v1271_v19 = vrot.slane %v6191_v14, 5  ;;  %v4999_v29 = vcombine.low %v1237_v20, %v1240_v48  ;;  %v8791_v48 = vld [vmem:[#allocation6_spill] sm:$0xff] }
  0x6e   : > { %5713 = vmatpush3.bf16.msra.mxu1 %v1783_v52  ;;  %5650 = vmatprep.mubr.msk.bf16.mxu1 %vm656_vm3, %v4949_v13  ;;  %v4951_v30 = vcombine.low %v6340_v60, %v6345_v9  ;;  %v1266_v38 = vrot.slane %v1264_v18, 4  ;;  %v4987_v26 = vrot.slane %v1170_v1, 9  ;;  %v5000_v49 = vcombine.low %v1244_v27, %v1247_v42  ;;  %v1175_v42 = vld [vmem:[%s6168_s7 + $0x9c] sm:$0xe] }
  0x6f   : > { %v4952_v52 = vcombine.low %v6377_v11, %v6382_v23  ;;  %v4953_v8 = vcombine.low %v6410_v34, %v6419_v17  ;;  %5924 = vmatprep.subr.msk.bf16.mxu1 %vm705_vm0, %v6593_v22  ;;  %v5001_v60 = vcombine.low %v6583_v10, %v6603_v25  ;;  %v5002_v9 = vcombine.low %v6587_v2, %v6607_v45  ;;  %v8792_v10 = vld [vmem:[#allocation8_spill] sm:$0xff]  ;;  %v8793_v2 = vld [vmem:[#allocation7_spill] sm:$0xff] }
  0x70   : > { %v1273_v54 = vrot.slane %v1271_v19, 4  ;;  %v6637_v28 = vsel %vm6498_vm7, %v4986_v57, %v1264_v18  ;;  %v6641_v56 = vsel %vm6498_vm7, %v1266_v38, %v1267_v4  ;;  %v4988_v32 = vrot.slane %v6618_v50, 9  ;;  %v1176_v18 = vld [vmem:[%s6168_s7 + $0xa8] sm:$0xe]  ;;  %v8795_v38 = vld [vmem:[#allocation11_spill] sm:$0xff] }
  0x71   : > { %v6653_v47 = vsel %vm6498_vm7, %v4987_v26, %v1271_v19  ;;  %v1278_v51 = vrot.slane %v6233_v58, 5  ;;  %v1281_v6 = vrot.slane %v6241_v63, 5  ;;  %v4990_v59 = vrot.slane %v1173_v39, 9  ;;  %v8794_v19 = vld [vmem:[#allocation9_spill] sm:$0xff]  ;;  %v8796_v26 = vld [vmem:[#allocation10_spill] sm:$0xff] }
  0x72   : > { %5685 = vmatmul.mubr.msk.bf16.gmra.mxu0 %vm656_vm3, %v4999_v29  ;;  %v1292_v16 = vrot.slane %v6324_v43, 5  ;;  %v1295_v27 = vrot.slane %v8791_v48, 5  ;;  %v5003_v41 = vcombine.low %v6637_v28, %v6641_v56  ;;  %v6671_v63 = vsel %vm6498_vm7, %v1273_v54, %v1274_v5  ;;  %v8798_v48 = vld [vmem:[#allocation14_spill] sm:$0xff] }
  0x73   : > { %5688 = vmatprep.mubr.msk.bf16.mxu0 %vm656_vm3, %v5000_v49  ;;  %v4989_v1 = vrot.slane %v6647_v44, 9  ;;  %v4991_v4 = vrot.slane %v1174_v40, 9  ;;  %v1299_v15 = vrot.slane %v8792_v10, 5  ;;  %v1280_v5 = vrot.slane %v1278_v51, 4  ;;  %v5093_v57 = vld [vmem:[%s6168_s7 + $0xc] sm:$0xf] }
  0x74   : > { %v6680_v25 = vsel %vm6498_vm7, %v4990_v59, %v1292_v16  ;;  %v1294_v45 = vrot.slane %v1292_v16, 4  ;;  %v1302_v29 = vrot.slane %v8794_v19, 5  ;;  %v4992_v49 = vrot.slane %v1175_v42, 9  ;;  %v8797_v59 = vld [vmem:[#allocation12_spill] sm:$0xff]  ;;  %v8799_v42 = vld [vmem:[#allocation13_spill] sm:$0xff] }
  0x75   : > { %5651 = vmatmul.mubr.msk.bf16.gmra.mxu1 %vm656_vm3, %v4950_v33  ;;  %v1285_v33 = vrot.slane %v6278_v46, 5  ;;  %v6694_v39 = vsel %vm6498_vm7, %v4991_v4, %v1299_v15  ;;  %v1301_v44 = vrot.slane %v1299_v15, 4  ;;  %v1306_v40 = vrot.slane %v8795_v38, 5  ;;  %v8800_v15 = vld [vmem:[#allocation15_spill] sm:$0xff] }
  0x76   : > { %5654 = vmatprep.mubr.msk.bf16.mxu1 %vm656_vm3, %v4951_v30  ;;  %v6690_v54 = vsel %vm6498_vm7, %v1294_v45, %v1295_v27  ;;  %v1309_v16 = vrot.slane %v8797_v59, 5  ;;  %v4993_v45 = vrot.slane %v1176_v18, 9  ;;  %v1313_v4 = vrot.slane %v8798_v48, 5 }
  0x77   : > { %v6704_v27 = vsel %vm6498_vm7, %v1301_v44, %v1302_v29  ;;  %v1316_v50 = vrot.slane %v8800_v15, 5  ;;  %v6714_v19 = vsel %vm6498_vm7, %v4992_v49, %v1306_v40  ;;  %v1308_v7 = vrot.slane %v1306_v40, 4  ;;  %v8801_v29 = vld [vmem:[#allocation16_spill] sm:$0xff]  ;;  %v8802_v15 = vld [vmem:[#allocation5_spill] sm:$0xff]  ;;  %v6729_v49 = vld [vmem:[%s6168_s7 + $0x10] sm:$0xf] }
  0x78   : > { %v6721_v18 = vsel %vm6498_vm7, %v4988_v32, %v1278_v51  ;;  %v6726_v59 = vsel %vm6498_vm7, %v4993_v45, %v1313_v4  ;;  %v1315_v30 = vrot.slane %v1313_v4, 4  ;;  %v5096_v40 = vld [vmem:[%s6168_s7 + $0x18] sm:$0xf]  ;;  %v1287_v20 = vrot.slane %v1285_v33, 4 }
  0x79   : > { %v2027_v44 = vshrl.u32 %v5093_v57, 16  ;;  %v2030_v32 = vshll.u32 %v5093_v57, 16  ;;  %v5004_v51 = vcombine.low %v6653_v47, %v6671_v63  ;;  %v6744_v45 = vsel %vm6498_vm7, %v1280_v5, %v1281_v6  ;;  %v1177_v57 = vld [vmem:[%s6168_s7 + $0xb4] sm:$0xe]  ;;  %v6765_v47 = vld [vmem:[%s6168_s7 + $0x14] sm:$0x1] }
  0x7a   : > { %5689 = vmatmul.mubr.msk.bf16.gmra.mxu0 %vm656_vm3, %v5001_v60  ;;  %v1288_v60 = vrot.slane %v8802_v15, 5  ;;  %v6759_v11 = vsel %vm6498_vm7, %v4989_v1, %v1285_v33  ;;  %v2036_v6 = vshll.u32 %v6729_v49, 16  ;;  %v5097_v63 = vld [vmem:[%s6168_s7 + $0x1c] sm:$0xf]  ;;  %v2040_v17 = vshrl.u32 %v6729_v49, 16 }
  0x7b   : > { %5692 = vmatprep.mubr.msk.bf16.mxu0 %vm656_vm3, %v5002_v9  ;;  %v6734_v9 = vsel %vm6498_vm7, %v1308_v7, %v1309_v16  ;;  %v6750_v7 = vsel %vm6498_vm7, %v1315_v30, %v1316_v50  ;;  %v2029_v5 = vrot.slane %v2027_v44, 4  ;;  %v2032_v34 = vrot.slane %v2030_v32, 5  ;;  %v5099_v15 = vld [vmem:[%s6168_s7 + $0x24] sm:$0xf]  ;;  %v6778_v44 = vld [vmem:[%s6168_s7 + $0x28] sm:$0xf] }
  0x7c   : > { %v2051_v50 = vshrl.u32 %v5096_v40, 16  ;;  %v1289_v1 = vsel %vm6498_vm7, %v1287_v20, %v1288_v60  ;;  %v4994_v33 = vrot.slane %v1177_v57, 9  ;;  %v6773_v30 = vrot.slane %v2036_v6, 5 }
  0x7d   : > { %5655 = vmatmul.mubr.msk.bf16.gmra.mxu1 %vm656_vm3, %v4952_v52  ;;  %v1320_v52 = vrot.slane %v6477_v37, 5  ;;  %v2054_v16 = vshll.u32 %v5096_v40, 16  ;;  %v1323_v23 = vrot.slane %v6482_v61, 5  ;;  %v2042_v4 = vrot.slane %v2040_v17, 4 }
  0x7e   : > { %5658 = vmatprep.mubr.msk.bf16.mxu1 %vm656_vm3, %v4953_v8  ;;  %v5098_v8 = vld [vmem:[%s6168_s7 + $0x20] sm:$0x1]  ;;  %v2053_v3 = vrot.slane %v2051_v50, 4  ;;  %v2060_v13 = vshll.u32 %v5097_v63, 16  ;;  %v2046_v20 = vshll.u32 %v6765_v47, 16  ;;  %v2064_v57 = vshrl.u32 %v5097_v63, 16 }
  0x7f   : > { %v1322_v32 = vrot.slane %v1320_v52, 4  ;;  %v2056_v60 = vrot.slane %v2054_v16, 5  ;;  %v5005_v61 = vcombine.low %v6721_v18, %v6744_v45  ;;  %v5006_v40 = vcombine.low %v6759_v11, %v1289_v1 }
  0x80   : > { %v2033_v6 = vor.u32 %v2032_v34, %v2029_v5  ;;  %v6789_v17 = vrot.slane %v2060_v13, 5  ;;  %v2043_v28 = vor.u32 %v2042_v4, %v6773_v30  ;;  %v2070_v50 = vshll.u32 %v5098_v8, 16  ;;  %v6816_v5 = vld [vmem:[%s6168_s7 + $0x34] sm:$0xf] }
  0x81   : > { %v2057_v56 = vor.u32 %v2056_v60, %v2053_v3  ;;  %v6801_v18 = vsel %vm6498_vm7, %v4994_v33, %v1320_v52  ;;  %v2075_v13 = vshrl.u32 %v5099_v15, 16  ;;  %v2078_v45 = vshll.u32 %v5099_v15, 16  ;;  %v5102_v52 = vld [vmem:[%s6168_s7 + $0x30] sm:$0xf] }
  0x82   : > { %5693 = vmatmul.mubr.msk.bf16.gmra.mxu0 %vm656_vm3, %v5003_v41  ;;  %v2066_v41 = vrot.slane %v2064_v57, 4  ;;  %v2084_v11 = vshll.u32 %v6778_v44, 16  ;;  %v8804_v3 = vcombine.low %v6187_v12, %v6191_v14  ;;  %v6810_v4 = vsel %vm6498_vm7, %v1322_v32, %v1323_v23 }
  0x83   : > { %5696 = vmatprep.mubr.msk.bf16.mxu0 %vm656_vm3, %v5004_v51  ;;  %v8803_v51 = vcombine.low %v6453_v62, %v6460_v55  ;;  %v2048_v62 = vrot.slane %v2046_v20, 5  ;;  %v2088_v63 = vshrl.u32 %v6778_v44, 16  ;;  %v2034_v34 = vrot.slane %v2033_v6, 4 }
  0x84   : > { %v2067_v55 = vor.u32 %v2066_v41, %v6789_v17  ;;  %v2077_v8 = vrot.slane %v2075_v13, 4  ;;  %v2080_v1 = vrot.slane %v2078_v45, 5  ;;  %v6818_v33 = vrot.slane %v2084_v11, 5  ;;  %v6824_v41 = vld [vmem:[%s6168_s7 + $0x38] sm:$0x1] }
  0x85   : > { %5659 = vmatmul.mubr.msk.bf16.gmra.mxu1 %vm656_vm3, %v8803_v51  ;;  %v2044_v12 = vrot.slane %v2043_v28, 4  ;;  %v2058_v14 = vrot.slane %v2057_v56, 4  ;;  %v2072_v16 = vrot.slane %v2070_v50, 5  ;;  %v2090_v23 = vrot.slane %v2088_v63, 4  ;;  %v5105_v13 = vld [vmem:[%s6168_s7 + $0x3c] sm:$0xf] }
  0x86   : > { %5662 = vmatprep.mubr.msk.bf16.mxu1 %vm656_vm3, %v8804_v3  ;;  %v2068_v15 = vrot.slane %v2067_v55, 4  ;;  %v2094_v32 = vshll.u32 %v6793_v21, 16  ;;  %v2099_v20 = vshrl.u32 %v5102_v52, 16  ;;  %v2102_v60 = vshll.u32 %v5102_v52, 16 }
  0x87   : > { %v2081_v57 = vor.u32 %v2080_v1, %v2077_v8  ;;  %v2091_v6 = vor.u32 %v2090_v23, %v6818_v33  ;;  %v2108_v28 = vshll.u32 %v6816_v5, 16  ;;  %v2112_v56 = vshrl.u32 %v6816_v5, 16  ;;  %v5108_v8 = vld [vmem:[%s6168_s7 + $0x48] sm:$0xf]  ;;  %v6851_v1 = vld [vmem:[%s6168_s7 + $0x4c] sm:$0xf] }
  0x88   : > { %v2101_v50 = vrot.slane %v2099_v20, 4  ;;  %v2104_v51 = vrot.slane %v2102_v60, 5  ;;  %v8805_v3 = vcombine.low %v6229_v53, %v6233_v58  ;;  %v5011_v55 = vcombine.low %v6801_v18, %v6810_v4 }
  0x89   : > { %v6830_v45 = vrot.slane %v2108_v28, 5  ;;  %v2114_v11 = vrot.slane %v2112_v56, 4  ;;  %v2049_v63 = vsel %vm6212_vm4, %v2044_v12, %v2048_v62  ;;  %v2063_v52 = vsel %vm6212_vm4, %v2058_v14, %v6789_v17 }
  0x8a   : > { %5697 = vmatmul.mubr.msk.bf16.gmra.mxu0 %vm656_vm3, %v5005_v61  ;;  %v6833_v61 = vld [vmem:[%s6168_s7 + $0x40] sm:$0xf]  ;;  %v8806_v53 = vcombine.low %v6267_v35, %v6278_v46  ;;  %v2073_v58 = vsel %vm6212_vm4, %v2068_v15, %v2072_v16  ;;  %v2082_v23 = vrot.slane %v2081_v57, 4  ;;  %v2105_v20 = vor.u32 %v2104_v51, %v2101_v50  ;;  %v6885_v50 = vld [vmem:[%s6168_s7 + $0x44] sm:$0x1] }
  0x8b   : > { %5700 = vmatprep.mubr.msk.bf16.mxu0 %vm656_vm3, %v5006_v40  ;;  %v2039_v40 = vsel %vm6212_vm4, %v2034_v34, %v6773_v30  ;;  %v2092_v30 = vrot.slane %v2091_v6, 4  ;;  %v2096_v34 = vrot.slane %v2094_v32, 5  ;;  %v2118_v62 = vshll.u32 %v6824_v41, 16  ;;  %v5111_v51 = vld [vmem:[%s6168_s7 + $0x54] sm:$0xf] }
  0x8c   : > { %v2123_v12 = vshrl.u32 %v5105_v13, 16  ;;  %v2126_v17 = vshll.u32 %v5105_v13, 16  ;;  %v6862_v14 = vsel %vm705_vm0, %v6593_v22, 0  ;;  %v2115_v35 = vor.u32 %v2114_v11, %v6830_v45 }
  0x8d   : > { %5663 = vmatmul.mubr.msk.bf16.gmra.mxu1 %vm656_vm3, %v8805_v3  ;;  %v2132_v46 = vshll.u32 %v6833_v61, 16  ;;  %v2136_v16 = vshrl.u32 %v6833_v61, 16  ;;  %v6867_v15 = vcombine.low %v2039_v40, %v2049_v63  ;;  %v6871_v32 = vsel %vm705_vm0, %v6565_v24, 0  ;;  %v6894_v40 = vld [vmem:[%s6168_s7 + $0x58] sm:$0xf] }
  0x8e   : > { %5666 = vmatprep.mubr.msk.bf16.mxu1 %vm656_vm3, %v8806_v53  ;;  %v2147_v60 = vshrl.u32 %v5108_v8, 16  ;;  %v2150_v57 = vshll.u32 %v5108_v8, 16  ;;  %v8807_v6 = vcombine.low %v6680_v25, %v6690_v54  ;;  %v6877_v22 = vcombine.low %v2063_v52, %v2073_v58  ;;  %v6899_v8 = vld [vmem:[%s6168_s7 + $0x50] sm:$0x1] }
  0x8f   : > { %v2087_v28 = vsel %vm6212_vm4, %v2082_v23, %v6818_v33  ;;  %v2097_v56 = vsel %vm6212_vm4, %v2092_v30, %v2096_v34  ;;  %v2156_v24 = vshll.u32 %v6851_v1, 16  ;;  %v8808_v25 = vcombine.low %v6694_v39, %v6704_v27  ;;  %v5114_v34 = vld [vmem:[%s6168_s7 + $0x60] sm:$0xf] }
  0x90   : > { %v2106_v54 = vrot.slane %v2105_v20, 4  ;;  %v2120_v13 = vrot.slane %v2118_v62, 5  ;;  %v2125_v11 = vrot.slane %v2123_v12, 4  ;;  %v2128_v3 = vrot.slane %v2126_v17, 5 }
  0x91   : > { %v2116_v33 = vrot.slane %v2115_v35, 4  ;;  %v6896_v63 = vrot.slane %v2132_v46, 5  ;;  %v2138_v52 = vrot.slane %v2136_v16, 4  ;;  %v2160_v53 = vshrl.u32 %v6851_v1, 16  ;;  %v6916_v35 = vld [vmem:[%s6168_s7 + $0x5c] sm:$0x1] }
  0x92   : > { %5701 = vmatmul.mubr.msk.bf16.gmra.mxu0 %vm656_vm3, %v8807_v6  ;;  %v8809_v39 = vcombine.low %v6317_v36, %v6324_v43  ;;  %v2149_v27 = vrot.slane %v2147_v60, 4  ;;  %v2152_v58 = vrot.slane %v2150_v57, 5  ;;  %v2171_v23 = vshrl.u32 %v5111_v51, 16 }
  0x93   : > { %5704 = vmatprep.mubr.msk.bf16.mxu0 %vm656_vm3, %v8808_v25  ;;  %v2174_v30 = vshll.u32 %v5111_v51, 16  ;;  %v8810_v20 = vcombine.low %v8793_v2, %v8792_v10  ;;  %v6911_v62 = vcombine.low %v2087_v28, %v2097_v56  ;;  %v6913_v12 = vrot.slane %v2156_v24, 5  ;;  %v6929_v28 = vld [vmem:[%s6168_s7 + $0x64] sm:$0xf] }
  0x94   : > { %v2162_v17 = vrot.slane %v2160_v53, 4  ;;  %v2180_v36 = vshll.u32 %v6894_v40, 16  ;;  %v2142_v43 = vshll.u32 %v6885_v50, 16  ;;  %v2173_v46 = vrot.slane %v2171_v23, 4 }
  0x95   : > { %5667 = vmatmul.mubr.msk.bf16.gmra.mxu1 %vm656_vm3, %v8809_v39  ;;  %v2176_v16 = vrot.slane %v2174_v30, 5  ;;  %v2184_v60 = vshrl.u32 %v6894_v40, 16  ;;  %v2111_v10 = vsel %vm6212_vm4, %v2106_v54, %v6830_v45  ;;  %v2121_v2 = vsel %vm6212_vm4, %v2116_v33, %v2120_v13  ;;  %v6951_v30 = vld [vmem:[%s6168_s7 + $0x68] sm:$0x1] }
  0x96   : > { %5670 = vmatprep.mubr.msk.bf16.mxu1 %vm656_vm3, %v8810_v20  ;;  %v2129_v57 = vor.u32 %v2128_v3, %v2125_v11  ;;  %v6926_v6 = vrot.slane %v2180_v36, 5  ;;  %v2139_v56 = vor.u32 %v2138_v52, %v6896_v63  ;;  %v2153_v24 = vor.u32 %v2152_v58, %v2149_v27  ;;  %v5117_v3 = vld [vmem:[%s6168_s7 + $0x6c] sm:$0xf]  ;;  %v6948_v27 = vld [vmem:[%s6168_s7 + $0x70] sm:$0xf] }
  0x97   : > { %v2166_v51 = vshll.u32 %v6899_v8, 16  ;;  %v2186_v25 = vrot.slane %v2184_v60, 4  ;;  %v8811_v53 = vcombine.low %v6714_v19, %v6734_v9  ;;  %v2163_v45 = vor.u32 %v2162_v17, %v6913_v12 }
  0x98   : > { %v2177_v54 = vor.u32 %v2176_v16, %v2173_v46  ;;  %v2195_v13 = vshrl.u32 %v5114_v34, 16  ;;  %v2198_v11 = vshll.u32 %v5114_v34, 16  ;;  %v8812_v33 = vcombine.low %v6726_v59, %v6750_v7  ;;  %v5120_v16 = vld [vmem:[%s6168_s7 + $0x78] sm:$0xf] }
  0x99   : > { %v2187_v52 = vor.u32 %v2186_v25, %v6926_v6  ;;  %v2190_v39 = vshll.u32 %v6916_v35, 16  ;;  %v2204_v19 = vshll.u32 %v6929_v28, 16  ;;  %v2208_v9 = vshrl.u32 %v6929_v28, 16 }
  0x9a   : > { %5705 = vmatmul.mubr.msk.bf16.gmra.mxu0 %vm656_vm3, %v8811_v53  ;;  %v2130_v58 = vrot.slane %v2129_v57, 4  ;;  %v2144_v23 = vrot.slane %v2142_v43, 5  ;;  %v2197_v34 = vrot.slane %v2195_v13, 4  ;;  %v2200_v20 = vrot.slane %v2198_v11, 5 }
  0x9b   : > { %5708 = vmatprep.mubr.msk.bf16.mxu0 %vm656_vm3, %v8812_v33  ;;  %v8813_v59 = vcombine.low %v8796_v26, %v8795_v38  ;;  %v6957_v7 = vcombine.low %v2111_v10, %v2121_v2  ;;  %v2140_v17 = vrot.slane %v2139_v56, 4  ;;  %v2154_v36 = vrot.slane %v2153_v24, 4  ;;  %v6967_v2 = vld [vmem:[%s6168_s7 + $0x7c] sm:$0xf] }
  0x9c   : > { %v6959_v46 = vrot.slane %v2204_v19, 5  ;;  %v8814_v43 = vcombine.low %v8799_v42, %v8798_v48  ;;  %v2164_v60 = vrot.slane %v2163_v45, 4  ;;  %v2168_v57 = vrot.slane %v2166_v51, 5  ;;  %8815 = vst [vmem:[#allocation6_spill] sm:$0xff] %v6967_v2  ;;  %v5123_v19 = vld [vmem:[%s6168_s7 + $0x84] sm:$0xf] }
  0x9d   : > { %5671 = vmatmul.mubr.msk.bf16.gmra.mxu1 %vm656_vm3, %v8813_v59  ;;  %v2178_v25 = vrot.slane %v2177_v54, 4  ;;  %v2210_v38 = vrot.slane %v2208_v9, 4  ;;  %v2188_v26 = vrot.slane %v2187_v52, 4  ;;  %v2192_v53 = vrot.slane %v2190_v39, 5 }
  0x9e   : > { %5674 = vmatprep.mubr.msk.bf16.mxu1 %vm656_vm3, %v8814_v43  ;;  %v2201_v13 = vor.u32 %v2200_v20, %v2197_v34  ;;  %v2219_v10 = vshrl.u32 %v5117_v3, 16  ;;  %v2135_v56 = vsel %vm6212_vm4, %v2130_v58, %v6896_v63  ;;  %v2222_v24 = vshll.u32 %v5117_v3, 16  ;;  %v5984_v63 = vld [vmem:[%s6168_s7 + $0xc] sm:$0xff]   ;;  %v7001_v34 = vld [vmem:[%s6168_s7 + $0x88] sm:$0xf] }
  0x9f   : > { %v2228_v48 = vshll.u32 %v6948_v27, 16  ;;  %v2232_v42 = vshrl.u32 %v6948_v27, 16  ;;  %v2145_v51 = vsel %vm6212_vm4, %v2140_v17, %v2144_v23  ;;  %v2159_v45 = vsel %vm6212_vm4, %v2154_v36, %v6913_v12  ;;  %8816 = vst [vmem:[#allocation8_spill] sm:$0xff] %v7001_v34  ;;  %v7010_v36 = vld [vmem:[%s6168_s7 + $0x74] sm:$0x1] }
  0xa0   : > { %v2211_v54 = vor.u32 %v2210_v38, %v6959_v46  ;;  %v2214_v11 = vshll.u32 %v6951_v30, 16  ;;  %v2169_v3 = vsel %vm6212_vm4, %v2164_v60, %v2168_v57  ;;  %v2183_v33 = vsel %vm6212_vm4, %v2178_v25, %v6926_v6  ;;  %8818 = vst [vmem:[#allocation7_spill] sm:$0xff] %v7010_v36  ;;  %v7020_v38 = vld [vmem:[%s6168_s7 + $0x80] sm:$0x1] }
  0xa1   : > { %v2243_v52 = vshrl.u32 %v5120_v16, 16  ;;  %v2246_v12 = vshll.u32 %v5120_v16, 16  ;;  %v2193_v18 = vsel %vm6212_vm4, %v2188_v26, %v2192_v53  ;;  %v2202_v4 = vrot.slane %v2201_v13, 4  ;;  %8819 = vst [vmem:[#allocation9_spill] sm:$0xff] %v7020_v38  ;;  %v7023_v26 = vld [vmem:[%s6168_s7 + $0x8c] sm:$0x1] }
  0xa2   : > { %5709 = vmatmul.mubr.msk.bf16.gmra.mxu0 %vm656_vm3, %v5011_v55  ;;  %v2221_v55 = vrot.slane %v2219_v10, 4  ;;  %v2252_v39 = vshll.u32 %v6967_v2, 16  ;;  %v2224_v9 = vrot.slane %v2222_v24, 5  ;;  %v6997_v58 = vrot.slane %v2228_v48, 5  ;;  %8820 = vst [vmem:[#allocation11_spill] sm:$0xff] %v7023_v26  ;;  %v5985_v10 = vld [vmem:[%s6168_s7 + $0x18] sm:$0xff]  }
  0xa3   : > { %5748 = vmatprep.mubr.msk.bf16.mxu0 %vm656_vm3, %v6867_v15  ;;  %v2234_v23 = vrot.slane %v2232_v42, 4  ;;  %v2256_v6 = vshrl.u32 %v6967_v2, 16  ;;  %v8817_v15 = vcombine.low %v8801_v29, %v6477_v37  ;;  %v7007_v20 = vcombine.low %v2135_v56, %v2145_v51  ;;  %v5126_v51 = vld [vmem:[%s6168_s7 + $0x90] sm:$0xf] }
  0xa4   : > { %v2212_v59 = vrot.slane %v2211_v54, 4  ;;  %v2216_v17 = vrot.slane %v2214_v11, 5  ;;  %v2245_v16 = vrot.slane %v2243_v52, 4  ;;  %v2248_v43 = vrot.slane %v2246_v12, 5 }
  0xa5   : > { %5675 = vmatmul.mubr.msk.bf16.gmra.mxu1 %vm656_vm3, %v8817_v15  ;;  %v7013_v60 = vrot.slane %v2252_v39, 5  ;;  %v2258_v57 = vrot.slane %v2256_v6, 4  ;;  %v2267_v25 = vshrl.u32 %v5123_v19, 16  ;;  %v7015_v37 = vcombine.low %v2159_v45, %v2169_v3  ;;  %v7034_v45 = vld [vmem:[%s6168_s7 + $0x94] sm:$0xf] }
  0xa6   : > { %5714 = vmatprep.mubr.msk.bf16.mxu1 %vm656_vm3, %v5984_v63  ;;  %v7017_v29 = vcombine.low %v2183_v33, %v2193_v18  ;;  %v2270_v53 = vshll.u32 %v5123_v19, 16  ;;  %v2276_v13 = vshll.u32 %v7001_v34, 16  ;;  %v2207_v56 = vsel %vm6212_vm4, %v2202_v4, %v6959_v46  ;;  %8821 = vst [vmem:[#allocation10_spill] sm:$0xff] %v7034_v45  ;;  %v7042_v33 = vld [vmem:[%s8733_s1 + $0x10] sm:$0x3]  ;;  %v5986_v46 = vld [vmem:[%s6168_s7 + $0x24] sm:$0xff]  }
  0xa7   : > { %v2225_v24 = vor.u32 %v2224_v9, %v2221_v55  ;;  %v2235_v48 = vor.u32 %v2234_v23, %v6997_v58  ;;  %v2238_v42 = vshll.u32 %v7010_v36, 16  ;;  %v2269_v54 = vrot.slane %v2267_v25, 4  ;;  %8822 = vst [vmem:[#allocation12_spill] sm:$0xff] %v7042_v33 }
  0xa8   : > { %v2272_v11 = vrot.slane %v2270_v53, 5  ;;  %v7036_v63 = vrot.slane %v2276_v13, 5  ;;  %v2280_v3 = vshrl.u32 %v7001_v34, 16  ;;  %v2217_v52 = vsel %vm6212_vm4, %v2212_v59, %v2216_v17 }
  0xa9   : > { %v2249_v12 = vor.u32 %v2248_v43, %v2245_v16  ;;  %v2259_v18 = vor.u32 %v2258_v57, %v7013_v60  ;;  %v2262_v4 = vshll.u32 %v7020_v38, 16  ;;  %v2291_v19 = vshrl.u32 %v5126_v51, 16  ;;  %v7076_v57 = vld [vmem:[%s6168_s7 + $0xa0] sm:$0xf] }
  0xaa   : > { %5749 = vmatmul.mubr.msk.bf16.vlgmr.msra.gmra.mxu0 %vm656_vm3, %v6877_v22  ;;  %v2273_v55 = vor.u32 %v2272_v11, %v2269_v54  ;;  %v2282_v39 = vrot.slane %v2280_v3, 4  ;;  %v2294_v9 = vshll.u32 %v5126_v51, 16  ;;  %v5129_v22 = vld [vmem:[%s6168_s7 + $0x9c] sm:$0xf]  ;;  %v7055_v23 = vrot.slane %v2225_v24, 4  ;;  %8824 = vst [vmem:[#allocation13_spill] sm:$0xff] %v7076_v57 }
  0xab   : > { %5815 = vmatpush3.bf16.msra.mxu0 %v6871_v32  ;;  %5752 = vmatprep.mubr.msk.bf16.mxu0 %vm656_vm3, %v6911_v62  ;;  %v7057_v6 = vrot.slane %v2238_v42, 5  ;;  %v2286_v15 = vshll.u32 %v7023_v26, 16  ;;  %v2300_v59 = vshll.u32 %v7034_v45, 16  ;;  %v7064_v32 = vld [vmem:[%s8733_s1 + $0xe] sm:$0x3]  ;;  %v7069_v62 = vcombine.low %v2207_v56, %v2217_v52 }
  0xac   : > { %8823 = vst [vmem:[#allocation14_spill] sm:$0xff] %v7064_v32  ;;  %5927 = vmatprep.subr.msk.bf16.mxu0 %vm705_vm0, %v7042_v33  ;;  %v7071_v17 = vrot.slane %v2235_v48, 4  ;;  %v2283_v16 = vor.u32 %v2282_v39, %v7036_v63  ;;  %v2304_v43 = vshrl.u32 %v7034_v45, 16  ;;  %v7080_v25 = vrot.slane %v2249_v12, 4  ;;  %v7089_v56 = vld [vmem:[%s6168_s7 + $0x98] sm:$0x1] }
  0xad   : > { %5715 = vmatmul.mubr.msk.bf16.vlgmr.msra.gmra.mxu1 %vm656_vm3, %v5985_v10  ;;  %v7082_v53 = vrot.slane %v2259_v18, 4  ;;  %v7084_v13 = vrot.slane %v2262_v4, 5  ;;  %v7086_v10 = vrot.slane %v2273_v55, 4  ;;  %8825 = vst [vmem:[#allocation15_spill] sm:$0xff] %v7089_v56  ;;  %v2293_v24 = vrot.slane %v2291_v19, 4  ;;  %v5988_v19 = vld [vmem:[%s6168_s7 + $0x3c] sm:$0xff]  }
  0xae   : > { %5781 = vmatpush3.bf16.msra.mxu1 %v6862_v14  ;;  %5718 = vmatprep.mubr.msk.bf16.mxu1 %vm656_vm3, %v5986_v46  ;;  %v2296_v48 = vrot.slane %v2294_v9, 5  ;;  %v2315_v42 = vshrl.u32 %v5129_v22, 16  ;;  %v2318_v51 = vshll.u32 %v5129_v22, 16  ;;  %v5987_v14 = vld [vmem:[%s6168_s7 + $0x30] sm:$0xff]   ;;  %v7098_v11 = vrot.slane %v2286_v15, 5 }
  0xaf   : > { %5926 = vmatprep.subr.msk.bf16.mxu1 %vm705_vm0, %v7064_v32  ;;  %v7100_v3 = vrot.slane %v2300_v59, 5  ;;  %v2324_v46 = vshll.u32 %v7076_v57, 16  ;;  %v5132_v52 = vld [vmem:[%s6168_s7 + $0xa8] sm:$0xf]  ;;  %v7104_v12 = vrot.slane %v2283_v16, 4  ;;  %v2306_v18 = vrot.slane %v2304_v43, 4 }
  0xb0   : > { %v2310_v4 = vshll.u32 %v7089_v56, 16  ;;  %v2328_v55 = vshrl.u32 %v7076_v57, 16  ;;  %v7109_v39 = vld [vmem:[%s6168_s7 + $0xac] sm:$0xf]  ;;  %v2297_v59 = vor.u32 %v2296_v48, %v2293_v24  ;;  %v7133_v16 = vld [vmem:[%s6168_s7 + $0xa4] sm:$0x1] }
  0xb1   : > { %8826 = vst [vmem:[#allocation16_spill] sm:$0xff] %v7109_v39  ;;  %8827 = vst [vmem:[#allocation5_spill] sm:$0xff] %v7133_v16  ;;  %v2317_v43 = vrot.slane %v2315_v42, 4  ;;  %v2320_v22 = vrot.slane %v2318_v51, 5  ;;  %v2339_v54 = vshrl.u32 %v5132_v52, 16  ;;  %v7135_v9 = vrot.slane %v2324_v46, 5 }
  0xb2   : > { %5753 = vmatmul.mubr.msk.bf16.gmra.mxu0 %vm656_vm3, %v6957_v7  ;;  %v2330_v32 = vrot.slane %v2328_v55, 4  ;;  %v2342_v15 = vshll.u32 %v5132_v52, 16  ;;  %v2348_v33 = vshll.u32 %v7109_v39, 16  ;;  %v5135_v57 = vld [vmem:[%s6168_s7 + $0xb4] sm:$0xf]  ;;  %v2307_v24 = vor.u32 %v2306_v18, %v7100_v3 }
  0xb3   : > { %5756 = vmatprep.mubr.msk.bf16.mxu0 %vm656_vm3, %v7007_v20  ;;  %v2289_v20 = vsel %vm6212_vm4, %v7104_v12, %v7098_v11  ;;  %v7145_v48 = vrot.slane %v2310_v4, 5  ;;  %v7148_v42 = vld [vmem:[%s6168_s7 + $0xb0] sm:$0x1]  ;;  %v2341_v51 = vrot.slane %v2339_v54, 4  ;;  %v7151_v46 = vld [vmem:[%s6168_s7 + $0xb8] sm:$0xf]  ;;  %v2321_v18 = vor.u32 %v2320_v22, %v2317_v43 }
  0xb4   : > { %8828 = vst [vmem:[#allocation17_spill] sm:$0xff] %v7148_v42  ;;  %8829 = vst [vmem:[#allocation18_spill] sm:$0xff] %v7151_v46  ;;  %v2344_v52 = vrot.slane %v2342_v15, 5  ;;  %v7155_v55 = vrot.slane %v2348_v33, 5  ;;  %v2352_v11 = vshrl.u32 %v7109_v39, 16  ;;  %v7158_v12 = vrot.slane %v2297_v59, 4 }
  0xb5   : > { %5719 = vmatmul.mubr.msk.bf16.gmra.mxu1 %vm656_vm3, %v5987_v14  ;;  %v2334_v14 = vshll.u32 %v7133_v16, 16  ;;  %v7161_v4 = vld [vmem:[%s6168_s7 + $0xbc] sm:$0x1]  ;;  %v2363_v54 = vshrl.u32 %v5135_v57, 16  ;;  %v2366_v7 = vshll.u32 %v5135_v57, 16  ;;  %v2331_v56 = vor.u32 %v2330_v32, %v7135_v9  ;;  %v5989_v16 = vld [vmem:[%s6168_s7 + $0x48] sm:$0xff]  }
  0xb6   : > { %5722 = vmatprep.mubr.msk.bf16.mxu1 %vm656_vm3, %v5988_v19  ;;  %v2354_v45 = vrot.slane %v2352_v11, 4  ;;  %v2358_v19 = vshll.u32 %v7148_v42, 16  ;;  %v2372_v15 = vshll.u32 %v7151_v46, 16  ;;  %v5138_v33 = vld [vmem:[%s6168_s7 + $0xc0] sm:$0xf]  ;;  %v2345_v26 = vor.u32 %v2344_v52, %v2341_v51  ;;  %v5990_v57 = vld [vmem:[%s6168_s7 + $0x54] sm:$0xff]  }
  0xb7   : > { %v2365_v39 = vrot.slane %v2363_v54, 4  ;;  %v2368_v34 = vrot.slane %v2366_v7, 5  ;;  %v2376_v59 = vshrl.u32 %v7151_v46, 16  ;;  %v7170_v22 = vld [vmem:[%s6168_s7 + $0xc4] sm:$0xf]  ;;  %v2308_v43 = vrot.slane %v2307_v24, 4 }
  0xb8   : > { %v2336_v32 = vrot.slane %v2334_v14, 5  ;;  %v2355_v11 = vor.u32 %v2354_v45, %v7155_v55  ;;  %v2374_v42 = vrot.slane %v2372_v15, 5  ;;  %v2382_v7 = vshll.u32 %v7161_v4, 16  ;;  %v7182_v45 = vld [vmem:[%s6168_s7 + $0xc8] sm:$0x1] }
  0xb9   : > { %v2369_v51 = vor.u32 %v2368_v34, %v2365_v39  ;;  %v2378_v52 = vrot.slane %v2376_v59, 4  ;;  %v2387_v54 = vshrl.u32 %v5138_v33, 16  ;;  %v2322_v46 = vrot.slane %v2321_v18, 4 }
  0xba   : > { %5757 = vmatmul.mubr.msk.bf16.gmra.mxu0 %vm656_vm3, %v7015_v37  ;;  %v2332_v38 = vrot.slane %v2331_v56, 4  ;;  %v2390_v2 = vshll.u32 %v5138_v33, 16  ;;  %v2396_v37 = vshll.u32 %v7170_v22, 16  ;;  %v2346_v24 = vrot.slane %v2345_v26, 4 }
  0xbb   : > { %5760 = vmatprep.mubr.msk.bf16.mxu0 %vm656_vm3, %v7017_v29  ;;  %v2360_v14 = vrot.slane %v2358_v19, 5  ;;  %v2379_v36 = vor.u32 %v2378_v52, %v2374_v42  ;;  %v2389_v15 = vrot.slane %v2387_v54, 4  ;;  %v2356_v34 = vrot.slane %v2355_v11, 4 }
  0xbc   : > { %v2392_v29 = vrot.slane %v2390_v2, 5  ;;  %v7185_v39 = vrot.slane %v2396_v37, 5  ;;  %v2400_v56 = vshrl.u32 %v7170_v22, 16  ;;  %v8830_v26 = vsel %vm6212_vm4, %v7071_v17, %v7057_v6 }
  0xbd   : > { %5723 = vmatmul.mubr.msk.bf16.gmra.mxu1 %vm656_vm3, %v5989_v16  ;;  %v8831_v16 = vsel %vm6212_vm4, %v7055_v23, %v6997_v58  ;;  %v2370_v19 = vrot.slane %v2369_v51, 4  ;;  %v2380_v33 = vrot.slane %v2379_v36, 4  ;;  %v2384_v2 = vrot.slane %v2382_v7, 5  ;;  %v5991_v23 = vld [vmem:[%s6168_s7 + $0x60] sm:$0xff]  }
  0xbe   : > { %5726 = vmatprep.mubr.msk.bf16.mxu1 %vm656_vm3, %v5990_v57  ;;  %v5150_v18 = vcombine.low %v8831_v16, %v8830_v26  ;;  %v8832_v59 = vsel %vm6212_vm4, %v7082_v53, %v7084_v13  ;;  %v8833_v6 = vsel %vm6212_vm4, %v7080_v25, %v7013_v60  ;;  %v2393_v57 = vor.u32 %v2392_v29, %v2389_v15  ;;  %v5176_v13 = vld [vmem:[%s6168_s7 + $0x24] sm:$0xe]  ;;  %v5179_v26 = vld [vmem:[%s6168_s7 + $0x48] sm:$0xe] }
  0xbf   : > { %v5151_v17 = vcombine.low %v8833_v6, %v8832_v59  ;;  %v2402_v11 = vrot.slane %v2400_v56, 4  ;;  %v2406_v58 = vshll.u32 %v7182_v45, 16  ;;  %v8834_v36 = vsel %vm6212_vm4, %v7086_v10, %v7036_v63  ;;  %v5992_v63 = vld [vmem:[%s6168_s7 + $0x6c] sm:$0xff]   ;;  %v5180_v6 = vld [vmem:[%s6168_s7 + $0x54] sm:$0xe] }
  0xc0   : > { %v5152_v51 = vcombine.low %v8834_v36, %v2289_v20  ;;  %v2303_v53 = vsel %vm6212_vm4, %v7158_v12, %v7100_v3  ;;  %v2313_v60 = vsel %vm6212_vm4, %v2308_v43, %v7145_v48  ;;  %v2327_v25 = vsel %vm6212_vm4, %v2322_v46, %v7135_v9  ;;  %v7238_v12 = vld [vmem:[%s6168_s7 + $0xc] sm:$0xe] }
  0xc1   : > { %v2337_v10 = vsel %vm6212_vm4, %v2332_v38, %v2336_v32  ;;  %v2351_v3 = vsel %vm6212_vm4, %v2346_v24, %v7155_v55  ;;  %v2361_v20 = vsel %vm6212_vm4, %v2356_v34, %v2360_v14  ;;  %v2403_v48 = vor.u32 %v2402_v11, %v7185_v39  ;;  %v5177_v55 = vld [vmem:[%s6168_s7 + $0x30] sm:$0xe]  ;;  %v5178_v14 = vld [vmem:[%s6168_s7 + $0x3c] sm:$0xe] }
  0xc2   : > { %5761 = vmatmul.mubr.msk.bf16.gmra.mxu0 %vm656_vm3, %v7069_v62  ;;  %v2375_v62 = vsel %vm6212_vm4, %v2370_v19, %v2374_v42  ;;  %v2385_v38 = vsel %vm6212_vm4, %v2380_v33, %v2384_v2  ;;  %v7245_v9 = vrot.slane %v2393_v57, 4  ;;  %v2770_v46 = vrot.slane %v6729_v49, 5  ;;  %v5993_v57 = vld [vmem:[%s6168_s7 + $0x78] sm:$0xff]  }
  0xc3   : > { %5764 = vmatprep.mubr.msk.bf16.mxu0 %vm656_vm3, %v5150_v18  ;;  %v7249_v43 = vcombine.low %v2303_v53, %v2313_v60  ;;  %v7251_v32 = vrot.slane %v2403_v48, 4  ;;  %v7253_v52 = vrot.slane %v2406_v58, 5  ;;  %v5192_v7 = vrot.slane %v5176_v13, 9  ;;  %v5994_v53 = vld [vmem:[%s6168_s7 + $0x84] sm:$0xff]   ;;  %v5181_v13 = vld [vmem:[%s6168_s7 + $0x60] sm:$0xe] }
  0xc4   : > { %v7256_v54 = vcombine.low %v2327_v25, %v2337_v10  ;;  %v7258_v42 = vcombine.low %v2351_v3, %v2361_v20  ;;  %v5190_v37 = vrot.slane %v7238_v12, 9  ;;  %v2784_v24 = vrot.slane %v6778_v44, 5 }
  0xc5   : > { %5727 = vmatmul.mubr.msk.bf16.gmra.mxu1 %vm656_vm3, %v5991_v23  ;;  %v7264_v15 = vcombine.low %v2375_v62, %v2385_v38  ;;  %v2773_v34 = vrot.slane %v6765_v47, 5  ;;  %v2787_v29 = vrot.slane %v6793_v21, 5  ;;  %v5193_v56 = vrot.slane %v5177_v55, 9  ;;  %v5183_v55 = vld [vmem:[%s6168_s7 + $0x78] sm:$0xe] }
  0xc6   : > { %5730 = vmatprep.mubr.msk.bf16.mxu1 %vm656_vm3, %v5992_v63  ;;  %v2399_v16 = vsel %vm6212_vm4, %v7245_v9, %v7185_v39  ;;  %v7275_v44 = vrot.slane %v2770_v46, 4  ;;  %v7279_v18 = vsel %vm6498_vm7, %v5192_v7, %v2784_v24  ;;  %v2786_v19 = vrot.slane %v2784_v24, 4  ;;  %v6000_v39 = vld [vmem:[%s6168_s7 + $0x18] sm:$0xff]  }
  0xc7   : > { %v2409_v21 = vsel %vm6212_vm4, %v7251_v32, %v7253_v52  ;;  %v2791_v33 = vrot.slane %v6816_v5, 5  ;;  %v2794_v2 = vrot.slane %v6824_v41, 5  ;;  %v5194_v59 = vrot.slane %v5178_v14, 9 }
  0xc8   : > { %v7291_v11 = vsel %vm6498_vm7, %v2786_v19, %v2787_v29  ;;  %v2798_v58 = vrot.slane %v6833_v61, 5  ;;  %v2801_v23 = vrot.slane %v6885_v50, 5  ;;  %v5195_v36 = vrot.slane %v5179_v26, 9  ;;  %v5184_v19 = vld [vmem:[%s6168_s7 + $0x84] sm:$0xe] }
  0xc9   : > { %v5209_v5 = vcombine.low %v7279_v18, %v7291_v11  ;;  %v7301_v41 = vsel %vm6498_vm7, %v5193_v56, %v2791_v33  ;;  %v2793_v60 = vrot.slane %v2791_v33, 4  ;;  %v2805_v25 = vrot.slane %v6851_v1, 5  ;;  %v5310_v11 = vld [vmem:[%s6168_s7 + $0x30] sm:$0xf] }
  0xca   : > { %5765 = vmatmul.mubr.msk.bf16.gmra.mxu0 %vm656_vm3, %v5151_v17  ;;  %v7308_v61 = vsel %vm6498_vm7, %v5194_v59, %v2798_v58  ;;  %v2800_v50 = vrot.slane %v2798_v58, 4  ;;  %v2808_v17 = vrot.slane %v6899_v8, 5  ;;  %v5196_v63 = vrot.slane %v5180_v6, 9  ;;  %v8835_v59 = vld [vmem:[#allocation7_spill] sm:$0xff] }
  0xcb   : > { %5768 = vmatprep.mubr.msk.bf16.mxu0 %vm656_vm3, %v5152_v51  ;;  %v7313_v10 = vsel %vm6498_vm7, %v2793_v60, %v2794_v2  ;;  %v7317_v3 = vsel %vm6498_vm7, %v5195_v36, %v2805_v25  ;;  %v2807_v1 = vrot.slane %v2805_v25, 4  ;;  %v2812_v20 = vrot.slane %v6894_v40, 5  ;;  %v5182_v51 = vld [vmem:[%s6168_s7 + $0x6c] sm:$0xe]  ;;  %v5995_v58 = vld [vmem:[%s6168_s7 + $0x90] sm:$0xff]  }
  0xcc   : > { %v5210_v48 = vcombine.low %v7301_v41, %v7313_v10  ;;  %v7326_v8 = vsel %vm6498_vm7, %v2800_v50, %v2801_v23  ;;  %v2815_v62 = vrot.slane %v6916_v35, 5  ;;  %v5197_v38 = vrot.slane %v5181_v13, 9  ;;  %v8836_v36 = vld [vmem:[#allocation6_spill] sm:$0xff]  ;;  %v5185_v60 = vld [vmem:[%s6168_s7 + $0x90] sm:$0xe]  ;;  %v8837_v50 = vld [vmem:[#allocation9_spill] sm:$0xff] }
  0xcd   : > { %5731 = vmatmul.mubr.msk.bf16.gmra.mxu1 %vm656_vm3, %v5993_v57  ;;  %v5211_v40 = vcombine.low %v7308_v61, %v7326_v8  ;;  %v7335_v7 = vsel %vm6498_vm7, %v2807_v1, %v2808_v17  ;;  %v7339_v24 = vsel %vm6498_vm7, %v5196_v63, %v2812_v20  ;;  %v2814_v14 = vrot.slane %v2812_v20, 4  ;;  %v6006_v10 = vld [vmem:[%s6168_s7 + $0x60] sm:$0xff]  }
  0xce   : > { %5734 = vmatprep.mubr.msk.bf16.mxu1 %vm656_vm3, %v5994_v53  ;;  %v5212_v35 = vcombine.low %v7317_v3, %v7335_v7  ;;  %v2819_v29 = vrot.slane %v6929_v28, 5  ;;  %v2822_v56 = vrot.slane %v6951_v30, 5  ;;  %v5198_v26 = vrot.slane %v5182_v51, 9  ;;  %v8838_v51 = vld [vmem:[#allocation8_spill] sm:$0xff] }
  0xcf   : > { %v7348_v33 = vsel %vm6498_vm7, %v2814_v14, %v2815_v62  ;;  %v2826_v2 = vrot.slane %v6948_v27, 5  ;;  %v2829_v6 = vrot.slane %v8835_v59, 5  ;;  %v5199_v57 = vrot.slane %v5183_v55, 9  ;;  %v5996_v27 = vld [vmem:[%s6168_s7 + $0x9c] sm:$0xff]  }
  0xd0   : > { %v5213_v23 = vcombine.low %v7339_v24, %v7348_v33  ;;  %v7357_v28 = vsel %vm6498_vm7, %v5197_v38, %v2819_v29  ;;  %v2821_v30 = vrot.slane %v2819_v29, 4  ;;  %v2833_v53 = vrot.slane %v8836_v36, 5  ;;  %v5186_v38 = vld [vmem:[%s6168_s7 + $0x9c] sm:$0xe]  ;;  %v8841_v36 = vld [vmem:[#allocation15_spill] sm:$0xff] }
  0xd1   : > { %v7366_v25 = vsel %vm6498_vm7, %v5198_v26, %v2826_v2  ;;  %v2828_v13 = vrot.slane %v2826_v2, 4  ;;  %v2836_v17 = vrot.slane %v8837_v50, 5  ;;  %v5200_v63 = vrot.slane %v5184_v19, 9  ;;  %v5187_v26 = vld [vmem:[%s6168_s7 + $0xa8] sm:$0xe] }
  0xd2   : > { %5769 = vmatmul.mubr.msk.bf16.gmra.mxu0 %vm656_vm3, %v7249_v43  ;;  %v7373_v1 = vsel %vm6498_vm7, %v2821_v30, %v2822_v56  ;;  %v7377_v43 = vsel %vm6498_vm7, %v5199_v57, %v2833_v53  ;;  %v2835_v20 = vrot.slane %v2833_v53, 4  ;;  %v2840_v62 = vrot.slane %v8838_v51, 5  ;;  %v5189_v57 = vld [vmem:[%s6168_s7 + $0xc0] sm:$0xe]  ;;  %v5997_v19 = vld [vmem:[%s6168_s7 + $0xa8] sm:$0xff]  }
  0xd3   : > { %5772 = vmatprep.mubr.msk.bf16.mxu0 %vm656_vm3, %v7256_v54  ;;  %v7385_v14 = vsel %vm6498_vm7, %v2828_v13, %v2829_v6  ;;  %v8839_v54 = vld [vmem:[#allocation11_spill] sm:$0xff]  ;;  %v5201_v56 = vrot.slane %v5185_v60, 9  ;;  %v2850_v53 = vrot.slane %v8841_v36, 5  ;;  %v5202_v60 = vrot.slane %v5186_v38, 9  ;;  %v8844_v38 = vld [vmem:[#allocation16_spill] sm:$0xff] }
  0xd4   : > { %v2843_v29 = vrot.slane %v8839_v54, 5  ;;  %v7394_v2 = vsel %vm6498_vm7, %v2835_v20, %v2836_v17  ;;  %v7398_v59 = vsel %vm6498_vm7, %v5200_v63, %v2840_v62  ;;  %v2842_v6 = vrot.slane %v2840_v62, 4  ;;  %v5188_v13 = vld [vmem:[%s6168_s7 + $0xb4] sm:$0xe]  ;;  %v8842_v17 = vld [vmem:[#allocation13_spill] sm:$0xff] }
  0xd5   : > { %5735 = vmatmul.mubr.msk.bf16.gmra.mxu1 %vm656_vm3, %v5995_v58  ;;  %v8840_v58 = vld [vmem:[#allocation10_spill] sm:$0xff]  ;;  %v2854_v63 = vrot.slane %v8842_v17, 5  ;;  %v8843_v20 = vld [vmem:[#allocation5_spill] sm:$0xff]  ;;  %v5203_v62 = vrot.slane %v5187_v26, 9  ;;  %v2861_v36 = vrot.slane %v8844_v38, 5  ;;  %v5204_v26 = vrot.slane %v5188_v13, 9 }
  0xd6   : > { %5738 = vmatprep.mubr.msk.bf16.mxu1 %vm656_vm3, %v5996_v27  ;;  %v2847_v30 = vrot.slane %v8840_v58, 5  ;;  %v7408_v50 = vsel %vm6498_vm7, %v2842_v6, %v2843_v29  ;;  %v2857_v51 = vrot.slane %v8843_v20, 5  ;;  %v8845_v17 = vld [vmem:[#allocation17_spill] sm:$0xff]  ;;  %v5998_v27 = vld [vmem:[%s6168_s7 + $0xb4] sm:$0xff]   ;;  %v2774_v32 = vsel %vm6498_vm7, %v7275_v44, %v2773_v34 }
  0xd7   : > { %v7423_v29 = vsel %vm6498_vm7, %v5202_v60, %v2854_v63  ;;  %v2856_v6 = vrot.slane %v2854_v63, 4  ;;  %v2864_v20 = vrot.slane %v8845_v17, 5  ;;  %v2863_v38 = vrot.slane %v2861_v36, 4  ;;  %v8846_v60 = vld [vmem:[#allocation18_spill] sm:$0xff]  ;;  %v7676_v24 = vld [vmem:[%s6168_s7 + $0x58] sm:$0xf] }
  0xd8   : > { %v7416_v54 = vsel %vm6498_vm7, %v5201_v56, %v2847_v30  ;;  %v2849_v58 = vrot.slane %v2847_v30, 4  ;;  %v7435_v30 = vsel %vm6498_vm7, %v5203_v62, %v2861_v36  ;;  %v2868_v55 = vrot.slane %v8846_v60, 5  ;;  %v7516_v60 = vld [vmem:[%s6168_s7 + $0x1c] sm:$0xf] }
  0xd9   : > { %v5205_v63 = vrot.slane %v5189_v57, 9  ;;  %v2875_v57 = vrot.slane %v7170_v22, 5  ;;  %v2878_v17 = vrot.slane %v7182_v45, 5  ;;  %v2771_v22 = vsel %vm6498_vm7, %v5190_v37, %v2770_v46  ;;  %v5175_v45 = vld [vmem:[%s6168_s7 + $0x18] sm:$0xe]  ;;  %v5999_v46 = vld [vmem:[%s6168_s7 + $0xc0] sm:$0xff]  }
  0xda   : > { %5773 = vmatmul.mubr.msk.bf16.gmra.mxu0 %vm656_vm3, %v7258_v42  ;;  %v7431_v56 = vsel %vm6498_vm7, %v2849_v58, %v2850_v53  ;;  %v7444_v42 = vsel %vm6498_vm7, %v2856_v6, %v2857_v51  ;;  %v2871_v53 = vrot.slane %v7161_v4, 5  ;;  %v7451_v58 = vsel %vm6498_vm7, %v2863_v38, %v2864_v20  ;;  %v6016_v51 = vld [vmem:[%s6168_s7 + $0x1c] sm:$0xf]  ;;  %v6017_v37 = vld [vmem:[%s6168_s7 + $0x20] sm:$0x1] }
  0xdb   : > { %5776 = vmatprep.mubr.msk.bf16.mxu0 %vm656_vm3, %v7264_v15  ;;  %v7455_v15 = vsel %vm6498_vm7, %v5204_v26, %v2868_v55  ;;  %v2870_v36 = vrot.slane %v2868_v55, 4  ;;  %v2777_v6 = vrot.slane %v6016_v51, 5  ;;  %v5157_v55 = vcombine.low %v2399_v16, %v2409_v21  ;;  %v6001_v26 = vld [vmem:[%s6168_s7 + $0x24] sm:$0xff]   ;;  %v5304_v38 = vld [vmem:[%s6168_s7 + $0x18] sm:$0xf] }
  0xdc   : > { %v7495_v12 = vsel %vm6498_vm7, %v5205_v63, %v2875_v57  ;;  %v2877_v9 = vrot.slane %v2875_v57, 4  ;;  %v5191_v52 = vrot.slane %v5175_v45, 9  ;;  %v2780_v16 = vrot.slane %v6017_v37, 5  ;;  %v6003_v37 = vld [vmem:[%s6168_s7 + $0x3c] sm:$0xff]  }
  0xdd   : > { %5739 = vmatmul.mubr.msk.bf16.gmra.mxu1 %vm656_vm3, %v5997_v19  ;;  %v7483_v19 = vsel %vm6498_vm7, %v2870_v36, %v2871_v53  ;;  %v2779_v47 = vrot.slane %v2777_v6, 4  ;;  %v5207_v44 = vcombine.low %v2771_v22, %v2774_v32  ;;  %v6002_v53 = vld [vmem:[%s6168_s7 + $0x30] sm:$0xff]   ;;  %v8847_v36 = vld [vmem:[#allocation12_spill] sm:$0xff]  ;;  %v3582_v57 = vshrl.u32 %v5304_v38, 16  ;;  %v8848_v22 = vld [vmem:[#allocation14_spill] sm:$0xff] }
  0xde   : > { %5742 = vmatprep.mubr.msk.bf16.mxu1 %vm656_vm3, %v5998_v27  ;;  %v7501_v34 = vsel %vm6498_vm7, %v2877_v9, %v2878_v17  ;;  %v2778_v27 = vsel %vm6498_vm7, %v5191_v52, %v2777_v6  ;;  %v4534_v51 = vsel %vm705_vm0, %v8847_v36, 0  ;;  %v3585_v17 = vshll.u32 %v5304_v38, 16  ;;  %v5307_v32 = vld [vmem:[%s6168_s7 + $0x24] sm:$0xf] }
  0xdf   : > { %v2781_v20 = vsel %vm6498_vm7, %v2779_v47, %v2780_v16  ;;  %v3591_v6 = vshll.u32 %v7516_v60, 16  ;;  %v4064_v45 = vsel %vm705_vm0, %v8848_v22, 0  ;;  %v7532_v47 = vld [vmem:[%s6168_s7 + $0x28] sm:$0xf]  ;;  %v5306_v16 = vld [vmem:[%s6168_s7 + $0x20] sm:$0x1] }
  0xe0   : > { %v5208_v63 = vcombine.low %v2778_v27, %v2781_v20  ;;  %v3587_v9 = vrot.slane %v3585_v17, 5  ;;  %v3606_v27 = vshrl.u32 %v5307_v32, 16  ;;  %v3609_v20 = vshll.u32 %v5307_v32, 16  ;;  %v7552_v22 = vld [vmem:[%s6168_s7 + $0x34] sm:$0xf] }
  0xe1   : > { %v3615_v38 = vshll.u32 %v7532_v47, 16  ;;  %v4325_v18 = vrot.slane %v7516_v60, 5  ;;  %v4328_v17 = vrot.slane %v5306_v16, 5  ;;  %v3643_v41 = vshrl.u32 %v7552_v22, 16 }
  0xe2   : > { %5777 = vmatmul.mubr.msk.bf16.gmra.mxu0 %vm656_vm3, %v5157_v55  ;;  %v3595_v55 = vshrl.u32 %v7516_v60, 16  ;;  %v4332_v61 = vrot.slane %v7532_v47, 5 }
  0xe3   : > { %5816 = vmatprep.mubr.msk.bf16.mxu0 %vm656_vm3, %v6000_v39  ;;  %v3584_v39 = vrot.slane %v3582_v57, 4  ;;  %v7557_v32 = vrot.slane %v3615_v38, 5  ;;  %v3639_v38 = vshll.u32 %v7552_v22, 16 }
  0xe4   : > { %v3597_v52 = vrot.slane %v3595_v55, 4  ;;  %v3611_v55 = vrot.slane %v3609_v20, 5  ;;  %v6005_v20 = vld [vmem:[%s6168_s7 + $0x54] sm:$0xff]  }
  0xe5   : > { %5743 = vmatmul.mubr.msk.bf16.gmra.mxu1 %vm656_vm3, %v5999_v46  ;;  %v7529_v46 = vrot.slane %v3591_v6, 5  ;;  %v3608_v6 = vrot.slane %v3606_v27, 4  ;;  %v4327_v27 = vrot.slane %v4325_v18, 4 }
  0xe6   : > { %5782 = vmatprep.mubr.msk.bf16.mxu1 %vm656_vm3, %v5207_v44  ;;  %v6004_v44 = vld [vmem:[%s6168_s7 + $0x48] sm:$0xff]  }
  0xe7   : > { %v3598_v36 = vor.u32 %v3597_v52, %v7529_v46 }
  0xea   : > { %5817 = vmatmul.mubr.msk.bf16.vlgmr.msra.gmra.mxu0 %vm656_vm3, %v6001_v26  ;;  %v5385_v26 = vld [vmem:[%s6168_s7 + $0x18] sm:$0xe] }
  0xeb   : > { %5883 = vmatpush3.bf16.msra.mxu0 %v4534_v51  ;;  %5820 = vmatprep.mubr.msk.bf16.mxu0 %vm656_vm3, %v6002_v53  ;;  %v3619_v53 = vshrl.u32 %v7532_v47, 16  ;;  %v3601_v51 = vshll.u32 %v5306_v16, 16  ;;  %v5401_v57 = vrot.slane %v5385_v26, 9  ;;  %v3599_v16 = vrot.slane %v3598_v36, 4  ;;  %v7596_v47 = vld [vmem:[%s6168_s7 + $0x38] sm:$0x1] }
  0xec   : > { %v3649_v4 = vshll.u32 %v7596_v47, 16 }
  0xed   : > { %5783 = vmatmul.mubr.msk.bf16.vlgmr.msra.gmra.mxu1 %vm656_vm3, %v5208_v63  ;;  %v3588_v63 = vor.u32 %v3587_v9, %v3584_v39  ;;  %v3621_v60 = vrot.slane %v3619_v53, 4  ;;  %v3630_v39 = vshrl.u32 %v5310_v11, 16  ;;  %v3633_v9 = vshll.u32 %v5310_v11, 16 }
  0xee   : > { %5849 = vmatpush3.bf16.msra.mxu1 %v4064_v45  ;;  %5786 = vmatprep.mubr.msk.bf16.mxu1 %vm656_vm3, %v5209_v5  ;;  %v7548_v5 = vpop.f32.mrf.mxu0  ;;  %v7555_v45 = vld [vmem:[%s6168_s7 + $0x2c] sm:$0x1] }
  0xef   : > { %v3625_v53 = vshll.u32 %v7555_v45, 16  ;;  %v3622_v36 = vor.u32 %v3621_v60, %v7557_v32  ;;  %v3632_v8 = vrot.slane %v3630_v39, 4  ;;  %v7593_v60 = vsel %vm6498_vm7, %v4327_v27, %v4328_v17 }
  0xf0   : > { %v7570_v26 = vpop.f32.mrf.mxu0  ;;  %v4335_v27 = vrot.slane %v7555_v45, 5 }
  0xf1   : > { %v7613_v49 = vrot.slane %v3622_v36, 4 }
  0xf2   : > { %5821 = vmatmul.mubr.msk.bf16.gmra.mxu0 %vm656_vm3, %v6003_v37  ;;  %v3589_v37 = vrot.slane %v3588_v63, 4  ;;  %v5313_v63 = vld [vmem:[%s6168_s7 + $0x3c] sm:$0xf]  ;;  %v7599_v39 = vpop.f32.mrf.mxu0 }
  0xf3   : > { %5824 = vmatprep.mubr.msk.bf16.mxu0 %vm656_vm3, %v6004_v44  ;;  %v7563_v52 = vpop.f32.mrf.mxu1  ;;  %v3603_v44 = vrot.slane %v3601_v51, 5  ;;  %v5386_v51 = vld [vmem:[%s6168_s7 + $0x24] sm:$0xe] }
  0xf4   : > { %8849 = vst [vmem:[#allocation7_spill] sm:$0xff] %v7563_v52  ;;  %v3594_v21 = vsel %vm6212_vm4, %v3589_v37, %v7529_v46  ;;  %v3645_v46 = vrot.slane %v3643_v41, 4  ;;  %v7604_v37 = vld [vmem:[%s6168_s7 + $0x40] sm:$0xf]  ;;  %v5402_v17 = vrot.slane %v5386_v51, 9  ;;  %v7630_v36 = vpop.f32.mrf.mxu0 }
  0xf5   : > { %5787 = vmatmul.mubr.msk.bf16.gmra.mxu1 %vm656_vm3, %v5210_v48  ;;  %v3612_v48 = vor.u32 %v3611_v55, %v3608_v6  ;;  %v7580_v11 = vpop.f32.mrf.mxu1  ;;  %v3604_v6 = vsel %vm6212_vm4, %v3599_v16, %v3603_v44  ;;  %v7589_v55 = vsel %vm6498_vm7, %v5401_v57, %v4325_v18  ;;  %v3654_v16 = vshrl.u32 %v5313_v63, 16  ;;  %8852 = vst [vmem:[#allocation8_spill] sm:$0xff] %v7630_v36 }
  0xf6   : > { %5790 = vmatprep.mubr.msk.bf16.mxu1 %vm656_vm3, %v5211_v40  ;;  %v3635_v40 = vrot.slane %v3633_v9, 5  ;;  %8850 = vst [vmem:[#allocation6_spill] sm:$0xff] %v7580_v11  ;;  %v7601_v9 = vrot.slane %v3639_v38, 5  ;;  %v3657_v44 = vshll.u32 %v5313_v63, 16  ;;  %v7609_v57 = vrot.slane %v3625_v53, 5  ;;  %v6007_v63 = vld [vmem:[%s6168_s7 + $0x6c] sm:$0xff]  }
  0xf7   : > { %v7607_v18 = vrot.slane %v3612_v48, 4  ;;  %v4334_v38 = vrot.slane %v4332_v61, 4  ;;  %v4339_v48 = vrot.slane %v7552_v22, 5  ;;  %v3663_v45 = vshll.u32 %v7604_v37, 16  ;;  %v6008_v22 = vld [vmem:[%s6168_s7 + $0x78] sm:$0xff]  }
  0xf8   : > { %v3636_v41 = vor.u32 %v3635_v40, %v3632_v8  ;;  %v3667_v53 = vshrl.u32 %v7604_v37, 16  ;;  %v3646_v3 = vor.u32 %v3645_v46, %v7601_v9  ;;  %v3659_v51 = vrot.slane %v3657_v44, 5  ;;  %v5316_v44 = vld [vmem:[%s6168_s7 + $0x48] sm:$0xf] }
  0xf9   : > { %v7634_v8 = vcombine.low %v3594_v21, %v3604_v6  ;;  %v7644_v33 = vsel %vm6498_vm7, %v5402_v17, %v4332_v61  ;;  %v3628_v21 = vsel %vm6212_vm4, %v7613_v49, %v7609_v57  ;;  %v7655_v6 = vsel %vm6498_vm7, %v4334_v38, %v4335_v27  ;;  %v5319_v49 = vld [vmem:[%s6168_s7 + $0x54] sm:$0xf] }
  0xfa   : > { %5825 = vmatmul.mubr.msk.bf16.gmra.mxu0 %vm656_vm3, %v6005_v20  ;;  %v5387_v20 = vld [vmem:[%s6168_s7 + $0x30] sm:$0xe]  ;;  %v3637_v46 = vrot.slane %v3636_v41, 4  ;;  %v4341_v17 = vrot.slane %v4339_v48, 4  ;;  %v4342_v40 = vrot.slane %v7596_v47, 5  ;;  %v7664_v62 = vrot.slane %v3663_v45, 5 }
  0xfb   : > { %5828 = vmatprep.mubr.msk.bf16.mxu0 %vm656_vm3, %v6006_v10  ;;  %v7620_v10 = vpop.f32.mrf.mxu1  ;;  %v5403_v7 = vrot.slane %v5387_v20, 9  ;;  %v7659_v20 = vld [vmem:[%s6168_s7 + $0x4c] sm:$0xf]  ;;  %v3669_v13 = vrot.slane %v3667_v53, 4  ;;  %v3647_v27 = vrot.slane %v3646_v3, 4  ;;  %v3678_v45 = vshrl.u32 %v5316_v44, 16 }
  0xfc   : > { %8851 = vst [vmem:[#allocation9_spill] sm:$0xff] %v7620_v10  ;;  %v5388_v47 = vld [vmem:[%s6168_s7 + $0x3c] sm:$0xe]  ;;  %v3681_v53 = vshll.u32 %v5316_v44, 16  ;;  %v4346_v3 = vrot.slane %v7604_v37, 5  ;;  %v7694_v44 = vsel %vm6498_vm7, %v4341_v17, %v4342_v40  ;;  %v3715_v37 = vshrl.u32 %v7676_v24, 16 }
  0xfd   : > { %5791 = vmatmul.mubr.msk.bf16.gmra.mxu1 %vm656_vm3, %v5212_v35  ;;  %v3656_v35 = vrot.slane %v3654_v16, 4  ;;  %v3651_v16 = vrot.slane %v3649_v4, 5  ;;  %v7661_v61 = vpop.f32.mrf.mxu1  ;;  %v7672_v4 = vsel %vm6498_vm7, %v5403_v7, %v4339_v48  ;;  %v3642_v48 = vsel %vm6212_vm4, %v3637_v46, %v7601_v9  ;;  %v7713_v17 = vld [vmem:[%s6168_s7 + $0x50] sm:$0x1] }
  0xfe   : > { %5794 = vmatprep.mubr.msk.bf16.mxu1 %vm656_vm3, %v5213_v23  ;;  %v7647_v23 = vld [vmem:[%s6168_s7 + $0x44] sm:$0x1]  ;;  %8853 = vst [vmem:[#allocation11_spill] sm:$0xff] %v7661_v61  ;;  %v3691_v61 = vshrl.u32 %v7659_v20, 16  ;;  %v3702_v7 = vshrl.u32 %v5319_v49, 16  ;;  %v3670_v10 = vor.u32 %v3669_v13, %v7664_v62  ;;  %v3711_v9 = vshll.u32 %v7676_v24, 16 }
  0xff   : > { %v7668_v57 = vpop.f32.mrf.mxu0  ;;  %v3660_v38 = vor.u32 %v3659_v51, %v3656_v35  ;;  %v3673_v41 = vshll.u32 %v7647_v23, 16  ;;  %v3705_v35 = vshll.u32 %v5319_v49, 16  ;;  %v8855_v51 = vcombine.low %v7357_v28, %v7373_v1  ;;  %v6009_v28 = vld [vmem:[%s6168_s7 + $0x84] sm:$0xff]  }
 0x100   : > { %8854 = vst [vmem:[#allocation10_spill] sm:$0xff] %v7668_v57  ;;  %v8857_v46 = vcombine.low %v7366_v25, %v7385_v14  ;;  %v3652_v49 = vsel %vm6212_vm4, %v3647_v27, %v3651_v16  ;;  %v5404_v13 = vrot.slane %v5388_v47, 9  ;;  %v3680_v11 = vrot.slane %v3678_v45, 4  ;;  %v5389_v47 = vld [vmem:[%s6168_s7 + $0x48] sm:$0xe] }
 0x101   : > { %v7704_v1 = vpop.f32.mrf.mxu0  ;;  %v7710_v40 = vrot.slane %v3673_v41, 5  ;;  %v3683_v52 = vrot.slane %v3681_v53, 5  ;;  %v3693_v14 = vrot.slane %v3691_v61, 4  ;;  %v3704_v57 = vrot.slane %v3702_v7, 4 }
 0x102   : > { %5829 = vmatmul.mubr.msk.bf16.gmra.mxu0 %vm656_vm3, %v6007_v63  ;;  %v3687_v63 = vshll.u32 %v7659_v20, 16  ;;  %8858 = vst [vmem:[#allocation13_spill] sm:$0xff] %v7704_v1  ;;  %v4349_v1 = vrot.slane %v7647_v23, 5  ;;  %v3707_v16 = vrot.slane %v3705_v35, 5  ;;  %v3697_v41 = vshll.u32 %v7713_v17, 16 }
 0x103   : > { %5832 = vmatprep.mubr.msk.bf16.mxu0 %vm656_vm3, %v6008_v22  ;;  %v7690_v22 = vpop.f32.mrf.mxu1  ;;  %v7725_v36 = vrot.slane %v3711_v9, 5  ;;  %v3717_v45 = vrot.slane %v3715_v37, 4  ;;  %v7728_v61 = vpop.f32.mrf.mxu0  ;;  %v8861_v23 = vsel %vm6212_vm4, %v7607_v18, %v7557_v32  ;;  %v7744_v35 = vld [vmem:[%s6168_s7 + $0x5c] sm:$0x1]  ;;  %v7753_v18 = vsel %vm6498_vm7, %v5404_v13, %v4346_v3  ;;  %v5322_v9 = vld [vmem:[%s6168_s7 + $0x60] sm:$0xf] }
 0x104   : > { %8856 = vst [vmem:[#allocation15_spill] sm:$0xff] %v7690_v22  ;;  %v6010_v22 = vld [vmem:[%s6168_s7 + $0x90] sm:$0xff]   ;;  %v7716_v25 = vrot.slane %v3687_v63, 5  ;;  %8860 = vst [vmem:[#allocation16_spill] sm:$0xff] %v7728_v61  ;;  %v7735_v53 = vcombine.low %v8861_v23, %v3628_v21  ;;  %v7739_v63 = vcombine.low %v3642_v48, %v3652_v49  ;;  %v3684_v21 = vor.u32 %v3683_v52, %v3680_v11  ;;  %v7763_v23 = vld [vmem:[%s6168_s7 + $0x64] sm:$0xf] }
 0x105   : > { %5795 = vmatmul.mubr.msk.bf16.gmra.mxu1 %vm656_vm3, %v8855_v51  ;;  %v7708_v51 = vrot.slane %v3660_v38, 4  ;;  %v7719_v27 = vpop.f32.mrf.mxu1  ;;  %v7721_v38 = vrot.slane %v3670_v10, 4  ;;  %v3708_v49 = vor.u32 %v3707_v16, %v3704_v57  ;;  %v6011_v52 = vld [vmem:[%s6168_s7 + $0x9c] sm:$0xff]   ;;  %v7776_v13 = vrot.slane %v3697_v41, 5  ;;  %v5325_v41 = vld [vmem:[%s6168_s7 + $0x6c] sm:$0xf] }
 0x106   : > { %5798 = vmatprep.mubr.msk.bf16.mxu1 %vm656_vm3, %v8857_v46  ;;  %v4348_v46 = vrot.slane %v4346_v3, 4  ;;  %8859 = vst [vmem:[#allocation5_spill] sm:$0xff] %v7719_v27  ;;  %v3694_v48 = vor.u32 %v3693_v14, %v7716_v25  ;;  %v8862_v3 = vcombine.low %v7377_v43, %v7394_v2  ;;  %v3721_v57 = vshll.u32 %v7744_v35, 16  ;;  %v5390_v14 = vld [vmem:[%s6168_s7 + $0x54] sm:$0xe]  ;;  %v7785_v2 = vpop.f32.mrf.mxu0 }
 0x107   : > { %v7770_v11 = vpop.f32.mrf.mxu1  ;;  %v8864_v43 = vcombine.low %v7398_v59, %v7408_v50  ;;  %8865 = vst [vmem:[#allocation18_spill] sm:$0xff] %v7785_v2  ;;  %v4360_v16 = vrot.slane %v7676_v24, 5  ;;  %v3735_v7 = vshll.u32 %v7763_v23, 16  ;;  %v3739_v59 = vshrl.u32 %v7763_v23, 16  ;;  %v7798_v32 = vld [vmem:[%s6168_s7 + $0x70] sm:$0xf] }
 0x108   : > { %v7759_v37 = vsel %vm6498_vm7, %v4348_v46, %v4349_v1  ;;  %8863 = vst [vmem:[#allocation17_spill] sm:$0xff] %v7770_v11  ;;  %v3676_v1 = vsel %vm6212_vm4, %v7721_v38, %v7710_v40  ;;  %v4356_v46 = vrot.slane %v7713_v17, 5  ;;  %v3726_v40 = vshrl.u32 %v5322_v9, 16  ;;  %v7807_v61 = vld [vmem:[%s6168_s7 + $0x68] sm:$0x1] }
 0x109   : > { %v3729_v38 = vshll.u32 %v5322_v9, 16  ;;  %v3709_v10 = vrot.slane %v3708_v49, 4  ;;  %v5406_v17 = vrot.slane %v5390_v14, 9  ;;  %v7800_v24 = vpop.f32.mrf.mxu1  ;;  %v3753_v11 = vshll.u32 %v5325_v41, 16 }
 0x10a   : > { %5833 = vmatmul.mubr.msk.bf16.gmra.mxu0 %vm656_vm3, %v6009_v28  ;;  %v5405_v28 = vrot.slane %v5389_v47, 9  ;;  %v6012_v47 = vld [vmem:[%s6168_s7 + $0xa8] sm:$0xff]   ;;  %8866 = vst [vmem:[#allocation12_spill] sm:$0xff] %v7800_v24  ;;  %v4362_v2 = vrot.slane %v4360_v16, 4  ;;  %v7810_v14 = vrot.slane %v3735_v7, 5 }
 0x10b   : > { %5836 = vmatprep.mubr.msk.bf16.mxu0 %vm656_vm3, %v6010_v22  ;;  %v4353_v22 = vrot.slane %v7659_v20, 5  ;;  %v3718_v20 = vor.u32 %v3717_v45, %v7725_v36  ;;  %v3685_v45 = vrot.slane %v3684_v21, 4  ;;  %v3723_v21 = vrot.slane %v3721_v57, 5  ;;  %v5391_v57 = vld [vmem:[%s6168_s7 + $0x60] sm:$0xe] }
 0x10c   : > { %v3731_v49 = vrot.slane %v3729_v38, 5  ;;  %v8867_v38 = vcombine.low %v7416_v54, %v7431_v56  ;;  %v6013_v54 = vld [vmem:[%s6168_s7 + $0xb4] sm:$0xff]  }
 0x10d   : > { %5799 = vmatmul.mubr.msk.bf16.gmra.mxu1 %vm656_vm3, %v8862_v3  ;;  %v3695_v3 = vrot.slane %v3694_v48, 4  ;;  %v7795_v50 = vsel %vm6498_vm7, %v5405_v28, %v4353_v22  ;;  %v3719_v9 = vrot.slane %v3718_v20, 4  ;;  %v3750_v48 = vshrl.u32 %v5325_v41, 16 }
 0x10e   : > { %5802 = vmatprep.mubr.msk.bf16.mxu1 %vm656_vm3, %v8864_v43  ;;  %v4355_v43 = vrot.slane %v4353_v22, 4  ;;  %v4363_v28 = vrot.slane %v7744_v35, 5  ;;  %v3728_v22 = vrot.slane %v3726_v40, 4  ;;  %v3741_v20 = vrot.slane %v3739_v59, 4 }
 0x10f   : > { %v3759_v41 = vshll.u32 %v7798_v32, 16  ;;  %v3690_v24 = vsel %vm6212_vm4, %v3685_v45, %v7716_v25  ;;  %v3700_v35 = vsel %vm6212_vm4, %v3695_v3, %v7776_v13  ;;  %v7827_v40 = vsel %vm6498_vm7, %v5406_v17, %v4360_v16 }
 0x110   : > { %v7803_v27 = vpop.f32.mrf.mxu0  ;;  %v7823_v7 = vsel %vm6498_vm7, %v4355_v43, %v4356_v46  ;;  %v3714_v25 = vsel %vm6212_vm4, %v3709_v10, %v7725_v36  ;;  %v3724_v13 = vsel %vm6212_vm4, %v3719_v9, %v3723_v21  ;;  %v3752_v46 = vrot.slane %v3750_v48, 4  ;;  %v6014_v43 = vld [vmem:[%s6168_s7 + $0xc0] sm:$0xff]  }
 0x111   : > { %v3755_v45 = vrot.slane %v3753_v11, 5  ;;  %v8869_v16 = vcombine.low %v7423_v29, %v7444_v42  ;;  %v7849_v3 = vsel %vm6498_vm7, %v4362_v2, %v4363_v28  ;;  %v3732_v36 = vor.u32 %v3731_v49, %v3728_v22  ;;  %v5392_v22 = vld [vmem:[%s6168_s7 + $0x6c] sm:$0xe] }
 0x112   : > { %5837 = vmatmul.mubr.msk.bf16.gmra.mxu0 %vm656_vm3, %v6011_v52  ;;  %v3763_v52 = vshrl.u32 %v7798_v32, 16  ;;  %v7845_v56 = vpop.f32.mrf.mxu0  ;;  %v3745_v10 = vshll.u32 %v7807_v61, 16  ;;  %v5407_v59 = vrot.slane %v5391_v57, 9  ;;  %v3742_v11 = vor.u32 %v3741_v20, %v7810_v14  ;;  %v5328_v57 = vld [vmem:[%s6168_s7 + $0x78] sm:$0xf] }
 0x113   : > { %5840 = vmatprep.mubr.msk.bf16.mxu0 %vm656_vm3, %v6012_v47  ;;  %v4367_v29 = vrot.slane %v7763_v23, 5  ;;  %v7855_v42 = vrot.slane %v3759_v41, 5  ;;  %v8870_v2 = vsel %vm6212_vm4, %v7708_v51, %v7664_v62  ;;  %v7866_v48 = vcombine.low %v3690_v24, %v3700_v35  ;;  %v5327_v23 = vld [vmem:[%s6168_s7 + $0x74] sm:$0x1]  ;;  %v7881_v24 = vld [vmem:[%s6168_s7 + $0x7c] sm:$0xf] }
 0x114   : > { %v3765_v17 = vrot.slane %v3763_v52, 4  ;;  %v7862_v9 = vcombine.low %v8870_v2, %v3676_v1  ;;  %v7874_v20 = vcombine.low %v3714_v25, %v3724_v13  ;;  %v3756_v51 = vor.u32 %v3755_v45, %v3752_v46  ;;  %v7884_v41 = vpop.f32.mrf.mxu0  ;;  %v5331_v13 = vld [vmem:[%s6168_s7 + $0x84] sm:$0xf] }
 0x115   : > { %5803 = vmatmul.mubr.msk.bf16.gmra.mxu1 %vm656_vm3, %v8867_v38  ;;  %v7833_v47 = vpop.f32.mrf.mxu1  ;;  %v4374_v1 = vrot.slane %v7798_v32, 5  ;;  %v7886_v52 = vrot.slane %v3732_v36, 4  ;;  %v7888_v35 = vrot.slane %v3745_v10, 5  ;;  %v7892_v38 = vsel %vm6498_vm7, %v5407_v59, %v4367_v29 }
 0x116   : > { %8868 = vst [vmem:[#allocation14_spill] sm:$0xff] %v7833_v47  ;;  %5806 = vmatprep.mubr.msk.bf16.mxu1 %vm656_vm3, %v8869_v16  ;;  %v4370_v25 = vrot.slane %v7807_v61, 5  ;;  %v3743_v32 = vrot.slane %v3742_v11, 4  ;;  %v4369_v46 = vrot.slane %v4367_v29, 4  ;;  %v3766_v45 = vor.u32 %v3765_v17, %v7855_v42  ;;  %v7909_v28 = vpop.f32.mrf.mxu0 }
 0x117   : > { %v7872_v49 = vpop.f32.mrf.mxu1  ;;  %v3769_v16 = vshll.u32 %v5327_v23, 16  ;;  %v5408_v36 = vrot.slane %v5392_v22, 9  ;;  %v4377_v10 = vrot.slane %v5327_v23, 5  ;;  %v3774_v2 = vshrl.u32 %v5328_v57, 16  ;;  %8874 = vst [vmem:[#allocation21_spill] sm:$0xff] %v7909_v28 }
 0x118   : > { %8871 = vst [vmem:[#allocation19_spill] sm:$0xff] %v7872_v49  ;;  %v3777_v62 = vshll.u32 %v5328_v57, 16  ;;  %v8872_v59 = vcombine.low %v7435_v30, %v7451_v58  ;;  %v4376_v11 = vrot.slane %v4374_v1, 4  ;;  %v3783_v29 = vshll.u32 %v7881_v24, 16  ;;  %v6015_v30 = vld [vmem:[%s6168_s7 + $0xcc] sm:$0xff]  }
 0x119   : > { %v7905_v61 = vpop.f32.mrf.mxu1  ;;  %v3787_v17 = vshrl.u32 %v7881_v24, 16  ;;  %v8875_v23 = vcombine.low %v7455_v15, %v7483_v19  ;;  %v3798_v58 = vshrl.u32 %v5331_v13, 16  ;;  %v3801_v22 = vshll.u32 %v5331_v13, 16  ;;  %v5334_v28 = vld [vmem:[%s6168_s7 + $0x90] sm:$0xf] }
 0x11a   : > { %5841 = vmatmul.mubr.msk.bf16.gmra.mxu0 %vm656_vm3, %v6013_v54  ;;  %v7899_v54 = vld [vmem:[%s6168_s7 + $0x88] sm:$0xf]  ;;  %8873 = vst [vmem:[#allocation20_spill] sm:$0xff] %v7905_v61  ;;  %v7924_v21 = vsel %vm6498_vm7, %v4369_v46, %v4370_v25  ;;  %v3767_v15 = vrot.slane %v3766_v45, 4  ;;  %v3771_v19 = vrot.slane %v3769_v16, 5  ;;  %v3748_v13 = vsel %vm6212_vm4, %v3743_v32, %v7888_v35 }
 0x11b   : > { %5844 = vmatprep.mubr.msk.bf16.mxu0 %vm656_vm3, %v6014_v43  ;;  %v3757_v43 = vrot.slane %v3756_v51, 4  ;;  %v3807_v57 = vshll.u32 %v7899_v54, 16  ;;  %v3811_v51 = vshrl.u32 %v7899_v54, 16  ;;  %v7934_v61 = vld [vmem:[%s6168_s7 + $0x80] sm:$0x1]  ;;  %v3776_v49 = vrot.slane %v3774_v2, 4 }
 0x11c   : > { %v3779_v47 = vrot.slane %v3777_v62, 5  ;;  %v7944_v25 = vsel %vm6498_vm7, %v4376_v11, %v4377_v10  ;;  %v7946_v35 = vrot.slane %v3783_v29, 5  ;;  %v7949_v32 = vld [vmem:[%s6168_s7 + $0x94] sm:$0xf]  ;;  %v3800_v62 = vrot.slane %v3798_v58, 4 }
 0x11d   : > { %5807 = vmatmul.mubr.msk.bf16.gmra.mxu1 %vm656_vm3, %v8872_v59  ;;  %v3738_v59 = vsel %vm6212_vm4, %v7886_v52, %v7810_v14  ;;  %v7937_v14 = vpop.f32.mrf.mxu1  ;;  %v3762_v52 = vsel %vm6212_vm4, %v3757_v43, %v7855_v42  ;;  %v3803_v45 = vrot.slane %v3801_v22, 5  ;;  %v7954_v16 = vrot.slane %v3807_v57, 5  ;;  %v7964_v43 = vld [vmem:[%s6168_s7 + $0x8c] sm:$0x1] }
 0x11e   : > { %5810 = vmatprep.mubr.msk.bf16.mxu1 %vm656_vm3, %v8875_v23  ;;  %v7931_v23 = vsel %vm6498_vm7, %v5408_v36, %v4374_v1  ;;  %8876 = vst [vmem:[#allocation22_spill] sm:$0xff] %v7937_v14  ;;  %v3789_v1 = vrot.slane %v3787_v17, 4  ;;  %v3813_v36 = vrot.slane %v3811_v51, 4  ;;  %v8877_v42 = vcombine.low %v7589_v55, %v7593_v60 }
 0x11f   : > { %v3772_v10 = vsel %vm6212_vm4, %v3767_v15, %v3771_v19  ;;  %v3793_v2 = vshll.u32 %v7934_v61, 16  ;;  %v3822_v11 = vshrl.u32 %v5334_v28, 16  ;;  %v3825_v29 = vshll.u32 %v5334_v28, 16 }
 0x120   : > { %v3780_v58 = vor.u32 %v3779_v47, %v3776_v49  ;;  %v3831_v55 = vshll.u32 %v7949_v32, 16  ;;  %v3835_v60 = vshrl.u32 %v7949_v32, 16  ;;  %v8880_v57 = vcombine.low %v7495_v12, %v7501_v34  ;;  %v5393_v49 = vld [vmem:[%s6168_s7 + $0x78] sm:$0xe] }
 0x121   : > { %v7978_v51 = vcombine.low %v3738_v59, %v3748_v13  ;;  %v3790_v47 = vor.u32 %v3789_v1, %v7946_v35  ;;  %v4381_v15 = vrot.slane %v7881_v24, 5  ;;  %v7989_v12 = vcombine.low %v3762_v52, %v3772_v10 }
 0x122   : > { %v7951_v46 = vpop.f32.mrf.mxu0  ;;  %5845 = vmatmul.mubr.msk.bf16.gmra.mxu0 %vm656_vm3, %v6015_v30  ;;  %v3804_v34 = vor.u32 %v3803_v45, %v3800_v62  ;;  %v3814_v59 = vor.u32 %v3813_v36, %v7954_v16  ;;  %v3817_v13 = vshll.u32 %v7964_v43, 16  ;;  %v7996_v1 = vrot.slane %v3793_v2, 5  ;;  %v8003_v62 = vld [vmem:[%s6168_s7 + $0x98] sm:$0x1] }
 0x123   : > { %5884 = vmatprep.mubr.msk.bf16.mxu0 %vm656_vm3, %v8877_v42  ;;  %v5394_v42 = vld [vmem:[%s6168_s7 + $0x84] sm:$0xe]  ;;  %v4388_v24 = vrot.slane %v7899_v54, 5  ;;  %v3824_v28 = vrot.slane %v3822_v11, 4  ;;  %v3827_v30 = vrot.slane %v3825_v29, 5  ;;  %v5409_v52 = vrot.slane %v5393_v49, 9 }
 0x124   : > { %v7966_v17 = vpop.f32.mrf.mxu0  ;;  %v8005_v45 = vrot.slane %v3831_v55, 5  ;;  %v3837_v36 = vrot.slane %v3835_v60, 4  ;;  %v4383_v2 = vrot.slane %v4381_v15, 4  ;;  %v5410_v54 = vrot.slane %v5394_v42, 9 }
 0x125   : > { %8878 = vst [vmem:[#allocation23_spill] sm:$0xff] %v7966_v17  ;;  %v7972_v22 = vpop.f32.mrf.mxu1  ;;  %5811 = vmatmul.mubr.msk.bf16.gmra.mxu1 %vm656_vm3, %v8880_v57  ;;  %v8884_v29 = vcombine.low %v7644_v33, %v7655_v6  ;;  %v3815_v49 = vrot.slane %v3814_v59, 4  ;;  %v4391_v55 = vrot.slane %v7964_v43, 5  ;;  %v8016_v17 = vld [vmem:[%s6168_s7 + $0xa0] sm:$0xf]  ;;  %v3828_v42 = vor.u32 %v3827_v30, %v3824_v28  ;;  %v8915_v31 = vld [vmem:[#allocation22_spill] sm:$0xff] }
 0x126   : > { %8879 = vst [vmem:[#allocation24_spill] sm:$0xff] %v7972_v22  ;;  %v7985_v19 = vpop.f32.mrf.mxu0  ;;  %5850 = vmatprep.mubr.msk.bf16.mxu1 %vm656_vm3, %v7634_v8  ;;  %v5337_v22 = vld [vmem:[%s6168_s7 + $0x9c] sm:$0xf]  ;;  %v3781_v8 = vrot.slane %v3780_v58, 4  ;;  %v3805_v58 = vrot.slane %v3804_v34, 4  ;;  %v3841_v33 = vshll.u32 %v8003_v62, 16  ;;  %v8030_v43 = vsel %vm6498_vm7, %v5409_v52, %v4381_v15 }
 0x127   : > { %8881 = vst [vmem:[#allocation25_spill] sm:$0xff] %v7985_v19  ;;  %v7994_v57 = vpop.f32.mrf.mxu1  ;;  %v4384_v19 = vrot.slane %v7934_v61, 5  ;;  %v4390_v61 = vrot.slane %v4388_v24, 4  ;;  %v3846_v6 = vshrl.u32 %v5337_v22, 16  ;;  %v3838_v59 = vor.u32 %v3837_v36, %v8005_v45 }
 0x128   : > { %8882 = vst [vmem:[#allocation26_spill] sm:$0xff] %v7994_v57  ;;  %v8000_v14 = vpop.f32.mrf.mxu0  ;;  %v3791_v57 = vrot.slane %v3790_v47, 4  ;;  %v8885_v47 = vcombine.low %v7672_v4, %v7694_v44  ;;  %v3786_v34 = vsel %vm6212_vm4, %v3781_v8, %v7946_v35  ;;  %v3849_v4 = vshll.u32 %v5337_v22, 16 }
 0x129   : > { %8883 = vst [vmem:[#allocation27_spill] sm:$0xff] %v8000_v14  ;;  %v8007_v10 = vpop.f32.mrf.mxu1  ;;  %v3819_v14 = vrot.slane %v3817_v13, 5  ;;  %v8040_v28 = vsel %vm6498_vm7, %v4383_v2, %v4384_v19  ;;  %v3855_v35 = vshll.u32 %v8016_v17, 16  ;;  %v3859_v15 = vshrl.u32 %v8016_v17, 16 }
 0x12a   : > { %v5682_v11 = vpop.f32.mrf.mxu0  ;;  %5885 = vmatmul.mubr.msk.bf16.vlgmr.msra.gmra.mxu0 %vm656_vm3, %v8884_v29  ;;  %v3796_v30 = vsel %vm6212_vm4, %v3791_v57, %v7996_v1  ;;  %v8054_v19 = vsel %vm6498_vm7, %v5410_v54, %v4388_v24  ;;  %v8057_v57 = vld [vmem:[%s6168_s7 + $0xa4] sm:$0x1]  ;;  %v3829_v52 = vrot.slane %v3828_v42, 4  ;;  %v3848_v36 = vrot.slane %v3846_v6, 4  ;;  %v5395_v24 = vld [vmem:[%s6168_s7 + $0x90] sm:$0xe] }
 0x12b   : > { %v8018_v60 = vpop.f32.mrf.mxu1  ;;  %5888 = vmatprep.mubr.msk.bf16.mxu0 %vm656_vm3, %v8885_v47  ;;  %v3820_v22 = vsel %vm6212_vm4, %v3815_v49, %v3819_v14  ;;  %v3851_v49 = vrot.slane %v3849_v4, 5  ;;  %v8079_v6 = vcombine.low %v3786_v34, %v3796_v30  ;;  %v5340_v4 = vld [vmem:[%s6168_s7 + $0xa8] sm:$0xf]  ;;  %v8888_v30 = vld [vmem:[#allocation8_spill] sm:$0xff] }
 0x12c   : > { %v1460_v29 = vpop.f32.mrf.mxu0 }
 0x12d   : > { %v5648_v44 = vpop.f32.mrf.mxu1  ;;  %5851 = vmatmul.mubr.msk.bf16.vlgmr.msra.gmra.mxu1 %vm656_vm3, %v7735_v53  ;;  %v3810_v53 = vsel %vm6212_vm4, %v3805_v58, %v7954_v16  ;;  %v3839_v58 = vrot.slane %v3838_v59, 4 }
 0x12e   : > { %v1044_v13 = vadd.f32 %v5648_v44, %v7548_v5  ;;  %v5683_v8 = vpop.f32.mrf.mxu0  ;;  %5854 = vmatprep.mubr.msk.bf16.mxu1 %vm656_vm3, %v7739_v63  ;;  %v8061_v5 = vsel %vm6498_vm7, %v4390_v61, %v4391_v55  ;;  %v3843_v63 = vrot.slane %v3841_v33, 5  ;;  %v8069_v44 = vrot.slane %v3855_v35, 5 }
 0x12f   : > { %v1035_v1 = vpop.f32.mrf.mxu1  ;;  %v3861_v55 = vrot.slane %v3859_v15, 4  ;;  %v3865_v61 = vshll.u32 %v8057_v57, 16  ;;  %v8081_v59 = vcombine.low %v3810_v53, %v3820_v22  ;;  %v8887_v15 = vcombine.low %v7795_v50, %v7823_v7  ;;  %v8100_v22 = vld [vmem:[%s6168_s7 + $0xac] sm:$0xf] }
 0x130   : > { %v8063_v2 = vadd.f32 %v5682_v11, %v1044_v13  ;;  %v1036_v16 = vadd.f32 %v1035_v1, %v7570_v26  ;;  %v1463_v14 = vpop.f32.mrf.mxu0  ;;  %v8886_v26 = vcombine.low %v7753_v18, %v7759_v37  ;;  %v3834_v18 = vsel %vm6212_vm4, %v3829_v52, %v8005_v45 }
 0x131   : > { %v5649_v54 = vpop.f32.mrf.mxu1  ;;  %v5411_v37 = vrot.slane %v5395_v24, 9  ;;  %v3844_v50 = vsel %vm6212_vm4, %v3839_v58, %v3843_v63  ;;  %v3852_v7 = vor.u32 %v3851_v49, %v3848_v36  ;;  %v3862_v45 = vor.u32 %v3861_v55, %v8069_v44  ;;  %v8889_v24 = vld [vmem:[#allocation10_spill] sm:$0xff]  ;;  %v5396_v36 = vld [vmem:[%s6168_s7 + $0x9c] sm:$0xe] }
 0x132   : > { %v8072_v42 = vadd.f32 %v1460_v29, %v1036_v16  ;;  %v1047_v11 = vadd.f32 %v5649_v54, %v7599_v39  ;;  %v5686_v33 = vpop.f32.mrf.mxu0  ;;  %5889 = vmatmul.mubr.msk.bf16.gmra.mxu0 %vm656_vm3, %v8886_v26  ;;  %v4395_v29 = vrot.slane %v7949_v32, 5  ;;  %v8105_v52 = vrot.slane %v3865_v61, 5 }
 0x133   : > { %v1038_v35 = vpop.f32.mrf.mxu1  ;;  %5892 = vmatprep.mubr.msk.bf16.mxu0 %vm656_vm3, %v8887_v15  ;;  %v3870_v32 = vshrl.u32 %v5340_v4, 16  ;;  %v4398_v63 = vrot.slane %v8003_v62, 5  ;;  %v8115_v49 = vcombine.low %v3834_v18, %v3844_v50  ;;  %v3883_v61 = vshrl.u32 %v8100_v22, 16 }
 0x134   : > { %v8094_v34 = vadd.f32 %v5683_v8, %v1047_v11  ;;  %v1039_v13 = vadd.f32 %v1038_v35, %v8888_v30  ;;  %v1476_v53 = vpop.f32.mrf.mxu0  ;;  %v3873_v8 = vshll.u32 %v5340_v4, 16  ;;  %v8119_v55 = vsel %vm6498_vm7, %v5411_v37, %v4395_v29  ;;  %v8890_v4 = vld [vmem:[#allocation13_spill] sm:$0xff] }
 0x135   : > { %v5652_v1 = vpop.f32.mrf.mxu1  ;;  %5855 = vmatmul.mubr.msk.bf16.gmra.mxu1 %vm656_vm3, %v7862_v9  ;;  %v4402_v9 = vrot.slane %v8016_v17, 5  ;;  %v3853_v35 = vrot.slane %v3852_v7, 4  ;;  %v4397_v15 = vrot.slane %v4395_v29, 4  ;;  %v5343_v17 = vld [vmem:[%s6168_s7 + $0xb4] sm:$0xf]  ;;  %v3863_v18 = vrot.slane %v3862_v45, 4 }
 0x136   : > { %v8107_v16 = vadd.f32 %v1463_v14, %v1039_v13  ;;  %v1060_v54 = vadd.f32 %v5652_v1, %v8889_v24  ;;  %v5687_v11 = vpop.f32.mrf.mxu0  ;;  %5858 = vmatprep.mubr.msk.bf16.mxu1 %vm656_vm3, %v7866_v48  ;;  %v3879_v14 = vshll.u32 %v8100_v22, 16  ;;  %v5412_v13 = vrot.slane %v5396_v36, 9  ;;  %v8891_v24 = vld [vmem:[#allocation16_spill] sm:$0xff]  ;;  %v8136_v7 = vld [vmem:[%s6168_s7 + $0xb0] sm:$0x1] }
 0x137   : > { %v1051_v58 = vpop.f32.mrf.mxu1  ;;  %v3872_v50 = vrot.slane %v3870_v32, 4  ;;  %v3875_v37 = vrot.slane %v3873_v8, 5  ;;  %v4405_v29 = vrot.slane %v8057_v57, 5  ;;  %v8893_v45 = vcombine.low %v7892_v38, %v7924_v21  ;;  %v8145_v8 = vld [vmem:[%s6168_s7 + $0xb8] sm:$0xf] }
 0x138   : > { %v8123_v26 = vadd.f32 %v5686_v33, %v1060_v54  ;;  %v1052_v48 = vadd.f32 %v1051_v58, %v8890_v4  ;;  %v1479_v62 = vpop.f32.mrf.mxu0  ;;  %v8892_v33 = vcombine.low %v7827_v40, %v7849_v3  ;;  %v4404_v54 = vrot.slane %v4402_v9, 4  ;;  %v8894_v4 = vld [vmem:[#allocation18_spill] sm:$0xff] }
 0x139   : > { %v5653_v30 = vpop.f32.mrf.mxu1  ;;  %v3885_v32 = vrot.slane %v3883_v61, 4  ;;  %v3894_v36 = vshrl.u32 %v5343_v17, 16  ;;  %v3897_v40 = vshll.u32 %v5343_v17, 16  ;;  %v8155_v21 = vsel %vm6498_vm7, %v4397_v15, %v4398_v63  ;;  %v8179_v17 = vld [vmem:[%s6168_s7 + $0xbc] sm:$0x1] }
 0x13a   : > { %v8127_v1 = vadd.f32 %v1476_v53, %v1052_v48  ;;  %v1063_v39 = vadd.f32 %v5653_v30, %v8891_v24  ;;  %v5690_v47 = vpop.f32.mrf.mxu0  ;;  %5893 = vmatmul.mubr.msk.bf16.gmra.mxu0 %vm656_vm3, %v8892_v33  ;;  %v8142_v53 = vrot.slane %v3879_v14, 5  ;;  %v3858_v30 = vsel %vm6212_vm4, %v3853_v35, %v8069_v44  ;;  %v5397_v24 = vld [vmem:[%s6168_s7 + $0xa8] sm:$0xe] }
 0x13b   : > { %v1054_v58 = vpop.f32.mrf.mxu1  ;;  %5896 = vmatprep.mubr.msk.bf16.mxu0 %vm656_vm3, %v8893_v45  ;;  %v3876_v14 = vor.u32 %v3875_v37, %v3872_v50  ;;  %v3889_v44 = vshll.u32 %v8136_v7, 16  ;;  %v5428_v37 = vcombine.low %v8119_v55, %v8155_v21  ;;  %v4409_v33 = vrot.slane %v8100_v22, 5  ;;  %v5399_v55 = vld [vmem:[%s6168_s7 + $0xc0] sm:$0xe] }
 0x13c   : > { %v8147_v3 = vadd.f32 %v5687_v11, %v1063_v39  ;;  %v1055_v48 = vadd.f32 %v1054_v58, %v8894_v4  ;;  %v1492_v57 = vpop.f32.mrf.mxu0  ;;  %v3868_v39 = vsel %vm6212_vm4, %v3863_v18, %v8105_v52  ;;  %v8164_v11 = vsel %vm6498_vm7, %v5412_v13, %v4402_v9 }
 0x13d   : > { %v5656_v38 = vpop.f32.mrf.mxu1  ;;  %5859 = vmatmul.mubr.msk.bf16.gmra.mxu1 %vm656_vm3, %v7874_v20  ;;  %v8174_v20 = vsel %vm6498_vm7, %v4404_v54, %v4405_v29  ;;  %v3903_v52 = vshll.u32 %v8145_v8, 16  ;;  %v3886_v15 = vor.u32 %v3885_v32, %v8142_v53  ;;  %v3899_v18 = vrot.slane %v3897_v40, 5 }
 0x13e   : > { %v8167_v61 = vadd.f32 %v1479_v62, %v1055_v48  ;;  %v1076_v63 = vadd.f32 %v5656_v38, %v7803_v27  ;;  %v5691_v35 = vpop.f32.mrf.mxu0  ;;  %5862 = vmatprep.mubr.msk.bf16.mxu1 %vm656_vm3, %v7978_v51  ;;  %v3896_v62 = vrot.slane %v3894_v36, 4  ;;  %v3907_v13 = vshrl.u32 %v8145_v8, 16  ;;  %v5346_v48 = vld [vmem:[%s6168_s7 + $0xc0] sm:$0xf] }
 0x13f   : > { %v1067_v9 = vpop.f32.mrf.mxu1  ;;  %v8189_v29 = vcombine.low %v3858_v30, %v3868_v39  ;;  %v3877_v45 = vrot.slane %v3876_v14, 4  ;;  %v8895_v40 = vcombine.low %v7931_v23, %v7944_v25  ;;  %v8200_v4 = vrot.slane %v3903_v52, 5  ;;  %v8205_v30 = vld [vmem:[%s6168_s7 + $0xc4] sm:$0xf] }
 0x140   : > { %v8182_v27 = vadd.f32 %v5690_v47, %v1076_v63  ;;  %v1068_v50 = vadd.f32 %v1067_v9, %v7845_v56  ;;  %v1495_v51 = vpop.f32.mrf.mxu0  ;;  %v3891_v47 = vrot.slane %v3889_v44, 5  ;;  %v3913_v22 = vshll.u32 %v8179_v17, 16  ;;  %v8897_v25 = vld [vmem:[#allocation21_spill] sm:$0xff] }
 0x141   : > { %v5657_v54 = vpop.f32.mrf.mxu1  ;;  %v3900_v39 = vor.u32 %v3899_v18, %v3896_v62  ;;  %v3909_v14 = vrot.slane %v3907_v13, 4  ;;  %v5413_v44 = vrot.slane %v5397_v24, 9  ;;  %v4411_v9 = vrot.slane %v4409_v33, 4 }
 0x142   : > { %v8193_v32 = vadd.f32 %v1492_v57, %v1068_v50  ;;  %v1079_v56 = vadd.f32 %v5657_v54, %v7884_v41  ;;  %v5694_v36 = vpop.f32.mrf.mxu0  ;;  %5897 = vmatmul.mubr.msk.bf16.gmra.mxu0 %vm656_vm3, %v8895_v40  ;;  %v8896_v57 = vcombine.low %v8030_v43, %v8040_v28  ;;  %v3887_v41 = vrot.slane %v3886_v15, 4  ;;  %v5398_v40 = vld [vmem:[%s6168_s7 + $0xb4] sm:$0xe] }
 0x143   : > { %v1070_v38 = vpop.f32.mrf.mxu1  ;;  %v4412_v50 = vrot.slane %v8136_v7, 5  ;;  %v3918_v43 = vshrl.u32 %v5346_v48, 16  ;;  %v3921_v28 = vshll.u32 %v5346_v48, 16  ;;  %v3927_v15 = vshll.u32 %v8205_v30, 16 }
 0x144   : > { %5900 = vmatprep.mubr.msk.bf16.mxu0 %vm656_vm3, %v8896_v57  ;;  %v8211_v23 = vadd.f32 %v5691_v35, %v1079_v56  ;;  %v1071_v63 = vadd.f32 %v1070_v38, %v8897_v25  ;;  %v1508_v52 = vpop.f32.mrf.mxu0  ;;  %v3931_v62 = vshrl.u32 %v8205_v30, 16  ;;  %v3882_v7 = vsel %vm6212_vm4, %v3877_v45, %v8142_v53  ;;  %v8898_v38 = vld [vmem:[#allocation23_spill] sm:$0xff]  ;;  %v8899_v25 = vld [vmem:[#allocation25_spill] sm:$0xff] }
 0x145   : > { %v5660_v54 = vpop.f32.mrf.mxu1  ;;  %5863 = vmatmul.mubr.msk.bf16.gmra.mxu1 %vm656_vm3, %v7989_v12  ;;  %v8227_v12 = vrot.slane %v3913_v22, 5  ;;  %v3892_v56 = vsel %vm6212_vm4, %v3887_v41, %v3891_v47  ;;  %v4416_v48 = vrot.slane %v8145_v8, 5  ;;  %v8241_v45 = vrot.slane %v3900_v39, 4  ;;  %v8248_v22 = vld [vmem:[%s6168_s7 + $0xc8] sm:$0x1] }
 0x146   : > { %v8219_v18 = vadd.f32 %v1495_v51, %v1071_v63  ;;  %v1092_v35 = vadd.f32 %v5660_v54, %v7951_v46  ;;  %v5695_v13 = vpop.f32.mrf.mxu0  ;;  %5866 = vmatprep.mubr.msk.bf16.mxu1 %vm656_vm3, %v8079_v6  ;;  %v3910_v51 = vor.u32 %v3909_v14, %v8200_v4  ;;  %v8234_v46 = vsel %vm6498_vm7, %v5413_v44, %v4409_v33 }
 0x147   : > { %v1083_v24 = vpop.f32.mrf.mxu1  ;;  %v8245_v47 = vsel %vm6498_vm7, %v4411_v9, %v4412_v50  ;;  %v3920_v33 = vrot.slane %v3918_v43, 4  ;;  %v3923_v14 = vrot.slane %v3921_v28, 5  ;;  %v8250_v44 = vrot.slane %v3927_v15, 5  ;;  %v5349_v43 = vld [vmem:[%s6168_s7 + $0xcc] sm:$0xf] }
 0x148   : > { %v8238_v6 = vadd.f32 %v5694_v36, %v1092_v35  ;;  %v1084_v57 = vadd.f32 %v1083_v24, %v8898_v38  ;;  %v1511_v53 = vpop.f32.mrf.mxu0  ;;  %v3933_v8 = vrot.slane %v3931_v62, 4  ;;  %v8900_v39 = vcombine.low %v8054_v19, %v8061_v5  ;;  %v8271_v5 = vld [vmem:[%s6168_s7 + $0xd0] sm:$0xf] }
 0x149   : > { %v5661_v41 = vpop.f32.mrf.mxu1  ;;  %v8259_v9 = vcombine.low %v3882_v7, %v3892_v56  ;;  %v5414_v50 = vrot.slane %v5398_v40, 9  ;;  %v4418_v15 = vrot.slane %v4416_v48, 4  ;;  %v4419_v62 = vrot.slane %v8179_v17, 5  ;;  %v8901_v7 = vld [vmem:[#allocation27_spill] sm:$0xff] }
 0x14a   : > { %v8252_v36 = vadd.f32 %v1508_v52, %v1084_v57  ;;  %v1095_v63 = vadd.f32 %v5661_v41, %v8899_v25  ;;  %v5698_v54 = vpop.f32.mrf.mxu0  ;;  %5901 = vmatmul.mubr.msk.bf16.gmra.mxu0 %vm656_vm3, %v8900_v39  ;;  %v8266_v52 = vrot.slane %v3910_v51, 4  ;;  %v3937_v19 = vshll.u32 %v8248_v22, 16  ;;  %v8903_v41 = vld [vmem:[#allocation7_spill] sm:$0xff]  ;;  %v8904_v39 = vld [vmem:[#allocation6_spill] sm:$0xff] }
 0x14b   : > { %v1086_v28 = vpop.f32.mrf.mxu1  ;;  %5904 = vmatprep.mubr.msk.bf16.mxu0 %vm656_vm3, %v5428_v37  ;;  %v5430_v40 = vcombine.low %v8234_v46, %v8245_v47  ;;  %v4423_v21 = vrot.slane %v8205_v30, 5  ;;  %v3924_v17 = vor.u32 %v3923_v14, %v3920_v33  ;;  %v3934_v51 = vor.u32 %v3933_v8, %v8250_v44 }
 0x14c   : > { %v8273_v35 = vadd.f32 %v5695_v13, %v1095_v63  ;;  %v1087_v24 = vadd.f32 %v1086_v28, %v8901_v7  ;;  %v1524_v56 = vpop.f32.mrf.mxu0  ;;  %v3942_v38 = vshrl.u32 %v5349_v43, 16  ;;  %v3945_v57 = vshll.u32 %v5349_v43, 16 }
 0x14d   : > { %v5664_v37 = vpop.f32.mrf.mxu1  ;;  %5867 = vmatmul.mubr.msk.bf16.gmra.mxu1 %vm656_vm3, %v8081_v59  ;;  %v3951_v46 = vshll.u32 %v8271_v5, 16  ;;  %v3955_v30 = vshrl.u32 %v8271_v5, 16  ;;  %v4417_v59 = vsel %vm6498_vm7, %v5414_v50, %v4416_v48  ;;  %v4420_v33 = vsel %vm6498_vm7, %v4418_v15, %v4419_v62  ;;  %v8905_v50 = vld [vmem:[#allocation9_spill] sm:$0xff] }
 0x14e   : > { %v8283_v13 = vadd.f32 %v1511_v53, %v1087_v24  ;;  %v1108_v25 = vadd.f32 %v5664_v37, %v8903_v41  ;;  %v5699_v63 = vpop.f32.mrf.mxu0  ;;  %5870 = vmatprep.mubr.msk.bf16.mxu1 %vm656_vm3, %v8115_v49  ;;  %v3939_v14 = vrot.slane %v3937_v19, 5  ;;  %v5415_v53 = vrot.slane %v5399_v55, 9  ;;  %v5351_v19 = vld [vmem:[%s6168_s7 + $0xd4] sm:$0x1] }
 0x14f   : > { %v1099_v47 = vpop.f32.mrf.mxu1  ;;  %v4425_v49 = vrot.slane %v4423_v21, 4  ;;  %v4426_v7 = vrot.slane %v8248_v22, 5  ;;  %v3925_v37 = vrot.slane %v3924_v17, 4  ;;  %v3935_v41 = vrot.slane %v3934_v51, 4  ;;  %v8907_v51 = vld [vmem:[#allocation11_spill] sm:$0xff] }
 0x150   : > { %8902 = vst [vmem:[#allocation8_spill] sm:$0xff] %v8283_v13  ;;  %v8294_v8 = vadd.f32 %v5698_v54, %v1108_v25  ;;  %v1100_v43 = vadd.f32 %v1099_v47, %v8904_v39  ;;  %v1527_v28 = vpop.f32.mrf.mxu0  ;;  %v3944_v58 = vrot.slane %v3942_v38, 4  ;;  %v3947_v13 = vrot.slane %v3945_v57, 5  ;;  %v8908_v47 = vld [vmem:[#allocation15_spill] sm:$0xff] }
 0x151   : > { %v5665_v24 = vpop.f32.mrf.mxu1  ;;  %v8906_v54 = vcombine.low %v8164_v11, %v8174_v20  ;;  %v8306_v55 = vrot.slane %v3951_v46, 5  ;;  %v3957_v22 = vrot.slane %v3955_v30, 4  ;;  %v3916_v17 = vsel %vm6212_vm4, %v8266_v52, %v8227_v12 }
 0x152   : > { %v8298_v48 = vadd.f32 %v1524_v56, %v1100_v43  ;;  %v1111_v15 = vadd.f32 %v5665_v24, %v8905_v50  ;;  %v5702_v62 = vpop.f32.mrf.mxu0  ;;  %v3906_v56 = vsel %vm6212_vm4, %v8241_v45, %v8200_v4  ;;  %v4430_v11 = vrot.slane %v8271_v5, 5  ;;  %v5400_v45 = vld [vmem:[%s6168_s7 + $0xcc] sm:$0xe]  ;;  %s4849_s7 = sshll.u32 %s163_s6, 4  ;;  %s8694_s7 = int_to_ptr.vmem [resolvable:$true] %s4849_s7 }
 0x153   : > { %5905 = vmatmul.mubr.msk.bf16.gmra.mxu0 %vm656_vm3, %v8906_v54  ;;  %v1102_v25 = vpop.f32.mrf.mxu1  ;;  %v4424_v46 = vsel %vm6498_vm7, %v5415_v53, %v4423_v21  ;;  %v4427_v4 = vsel %vm6498_vm7, %v4425_v49, %v4426_v7  ;;  %v5431_v12 = vcombine.low %v4417_v59, %v4420_v33  ;;  %v3930_v52 = vsel %vm6212_vm4, %v3925_v37, %v8250_v44  ;;  %v8910_v54 = vld [vmem:[#allocation17_spill] sm:$0xff]  ;;  %s6018_s19 = scalar_lea.vmem %s8694_s7, 256  ;;  %p6025_p0 = scmp.lt.s32.totalorder %s8694_s7, %s6023_s24 }
 0x154   : > { %5908 = vmatprep.mubr.msk.bf16.mxu0 %vm656_vm3, %v5430_v40  ;;  %v8318_v20 = vadd.f32 %v5699_v63, %v1111_v15  ;;  %v1103_v38 = vadd.f32 %v1102_v25, %v8907_v51  ;;  %v1540_v57 = vpop.f32.mrf.mxu0  ;;  %v3948_v5 = vor.u32 %v3947_v13, %v3944_v58  ;;  %v3961_v40 = vshll.u32 %v5351_v19, 16  ;;  %v8909_v13 = vld [vmem:[#allocation5_spill] sm:$0xff]  ;;  %p6019_p11 = scmp.ne.s32.totalorder %s8694_s7, %s6018_s19  ;;  %p6026_p1 = scmp.lt.s32.totalorder %s6024_s16, %s6018_s19 }
 0x155   : > { %v5668_v30 = vpop.f32.mrf.mxu1  ;;  %5871 = vmatmul.mubr.msk.bf16.gmra.mxu1 %vm656_vm3, %v8189_v29  ;;  %v3940_v53 = vsel %vm6212_vm4, %v3935_v41, %v3939_v14  ;;  %v3958_v29 = vor.u32 %v3957_v22, %v8306_v55  ;;  %v5432_v33 = vcombine.low %v4424_v46, %v4427_v4  ;;  %v5416_v43 = vrot.slane %v5400_v45, 9 }
 0x156   : > { %v8331_v63 = vadd.f32 %v1527_v28, %v1103_v38  ;;  %v1124_v39 = vadd.f32 %v5668_v30, %v8908_v47  ;;  %v5703_v21 = vpop.f32.mrf.mxu0  ;;  %5874 = vmatprep.mubr.msk.bf16.mxu1 %vm656_vm3, %v8259_v9  ;;  %v4432_v49 = vrot.slane %v4430_v11, 4  ;;  %v4433_v44 = vrot.slane %v5351_v19, 5  ;;  %v8912_v30 = vld [vmem:[#allocation14_spill] sm:$0xff]  ;;  %v8913_v47 = vld [vmem:[#allocation19_spill] sm:$0xff]  ;;  %p6020_p12 = pnand %p6019_p11, %p6139_p5  ;;  %p6027_p2 = por %p6026_p1, %p6025_p0 }
 0x157   : > { %v1115_v59 = vpop.f32.mrf.mxu1  ;;  %v5366_v37 = vcombine.low %v3906_v56, %v3916_v17  ;;  %v3949_v50 = vrot.slane %v3948_v5, 4  ;;  %v3963_v15 = vrot.slane %v3961_v40, 5  ;;  %v5367_v22 = vcombine.low %v3930_v52, %v3940_v53  ;;  %v8911_v17 = vld [vmem:[#allocation12_spill] sm:$0xff] }
 0x158   : > { %v8339_v58 = vadd.f32 %v5702_v62, %v1124_v39  ;;  %v1116_v28 = vadd.f32 %v1115_v59, %v8909_v13  ;;  %v1543_v7 = vpop.f32.mrf.mxu0  ;;  %v3959_v25 = vrot.slane %v3958_v29, 4  ;;  %v4431_v62 = vsel %vm6498_vm7, %v5416_v43, %v4430_v11  ;;  %v8914_v59 = vld [vmem:[#allocation20_spill] sm:$0xff]  ;;  %p6021_p13 = pneg %p6020_p12 }
 0x159   : > { %v5669_v24 = vpop.f32.mrf.mxu1  ;;  %v4434_v19 = vsel %vm6498_vm7, %v4432_v49, %v4433_v44  ;;  %v3954_v4 = vsel %vm6212_vm4, %v3949_v50, %v8306_v55 }
 0x15a   : > { %v8342_v9 = vadd.f32 %v1540_v57, %v1116_v28  ;;  %v1127_v14 = vadd.f32 %v5669_v24, %v8910_v54  ;;  %v5706_v41 = vpop.f32.mrf.mxu0  ;;  %v3964_v0 = vsel %vm6212_vm4, %v3959_v25, %v3963_v15  ;;  %v5433_v52 = vcombine.low %v4431_v62, %v4434_v19  ;;  %p6028_p3 = pnand %p6027_p2, %p6021_p13 }
 0x15b   : > { %5909 = vmatmul.mubr.msk.bf16.gmra.mxu0 %vm656_vm3, %v5431_v12  ;;  %v1118_v51 = vpop.f32.mrf.mxu1  ;;  %v5368_v29 = vcombine.low %v3954_v4, %v3964_v0 }
 0x15c   : > { %5912 = vmatprep.mubr.msk.bf16.mxu0 %vm656_vm3, %v5432_v33  ;;  %v8351_v56 = vadd.f32 %v5703_v21, %v1127_v14  ;;  %v1119_v38 = vadd.f32 %v1118_v51, %v8911_v17  ;;  %v1556_v57 = vpop.f32.mrf.mxu0 }
 0x15d   : > { %v5672_v46 = vpop.f32.mrf.mxu1  ;;  %5875 = vmatmul.mubr.msk.bf16.gmra.mxu1 %vm656_vm3, %v5366_v37  ;;  %v8916_v37 = vld [vmem:[#allocation24_spill] sm:$0xff] }
 0x15e   : > { %v8358_v45 = vadd.f32 %v1543_v7, %v1119_v38  ;;  %v1140_v12 = vadd.f32 %v5672_v46, %v8912_v30  ;;  %v5707_v11 = vpop.f32.mrf.mxu0  ;;  %5878 = vmatprep.mubr.msk.bf16.mxu1 %vm656_vm3, %v5367_v22 }
 0x15f   : > { %v1131_v5 = vpop.f32.mrf.mxu1 }
 0x160   : > { %v8364_v40 = vadd.f32 %v5706_v41, %v1140_v12  ;;  %v1132_v39 = vadd.f32 %v1131_v5, %v8913_v47  ;;  %v1559_v21 = vpop.f32.mrf.mxu0  ;;  %v8917_v41 = vld [vmem:[#allocation26_spill] sm:$0xff] }
 0x161   : > { %v5673_v53 = vpop.f32.mrf.mxu1 }
 0x162   : > { %v8367_v55 = vadd.f32 %v1556_v57, %v1132_v39  ;;  %v1143_v33 = vadd.f32 %v5673_v53, %v8914_v59  ;;  %v5710_v43 = vpop.f32.mrf.mxu0 }
 0x163   : > { %5913 = vmatmul.mubr.msk.bf16.gmra.mxu0 %vm656_vm3, %v5433_v52  ;;  %v1134_v49 = vpop.f32.mrf.mxu1 }
 0x164   : > { %v8371_v44 = vadd.f32 %v5707_v11, %v1143_v33  ;;  %v1135_v13 = vadd.f32 %v1134_v49, %v8915_v31  ;;  %v1572_v28 = vpop.f32.mrf.mxu0 }
 0x165   : > { %v5676_v7 = vpop.f32.mrf.mxu1  ;;  %5879 = vmatmul.mubr.msk.bf16.gmra.mxu1 %vm656_vm3, %v5368_v29 }
 0x166   : > { %v8375_v24 = vadd.f32 %v1559_v21, %v1135_v13  ;;  %v1156_v50 = vadd.f32 %v5676_v7, %v8916_v37  ;;  %v5711_v15 = vpop.f32.mrf.mxu0 }
 0x167   : > { %v1147_v54 = vpop.f32.mrf.mxu1 }
 0x168   : > { %v8378_v14 = vadd.f32 %v5710_v43, %v1156_v50  ;;  %v1148_v22 = vadd.f32 %v1147_v54, %v8917_v41  ;;  %v1575_v25 = vpop.f32.mrf.mxu0 }
 0x169   : > { %v5677_v51 = vpop.f32.mrf.mxu1 }
 0x16a   : > { %v8381_v62 = vadd.f32 %v1572_v28, %v1148_v22  ;;  %v1159_v19 = vadd.f32 %v5677_v51, %v8007_v10  ;;  %v5750_v17 = vpop.f32.mrf.mxu0 }
 0x16b   : > { %v1150_v38 = vpop.f32.mrf.mxu1 }
 0x16c   : > { %v8384_v57 = vadd.f32 %v5711_v15, %v1159_v19  ;;  %v1151_v46 = vadd.f32 %v1150_v38, %v8018_v60  ;;  %v2545_v4 = vpop.f32.mrf.mxu0 }
 0x16d   : > { %v5716_v30 = vpop.f32.mrf.mxu1 }
 0x16e   : > { %v8387_v12 = vadd.f32 %v1575_v25, %v1151_v46  ;;  %v1948_v11 = vadd.f32 %v5716_v30, %v8063_v2  ;;  %v5751_v0 = vpop.f32.mrf.mxu0 }
 0x16f   : > { %v1819_v52 = vpop.f32.mrf.mxu1 }
 0x170   : > { %v8390_v5 = vadd.f32 %v5750_v17, %v1948_v11  ;;  %v1946_v47 = vadd.f32 %v1819_v52, %v8072_v42  ;;  %v2548_v39 = vpop.f32.mrf.mxu0 }
 0x171   : > { %v5717_v10 = vpop.f32.mrf.mxu1 }
 0x172   : > { %v8393_v21 = vadd.f32 %v2545_v4, %v1946_v47  ;;  %v1949_v53 = vadd.f32 %v5717_v10, %v8094_v34  ;;  %v5754_v29 = vpop.f32.mrf.mxu0 }
 0x173   : > { %v1822_v60 = vpop.f32.mrf.mxu1 }
 0x174   : > { %v8396_v59 = vadd.f32 %v5751_v0, %v1949_v53  ;;  %v1947_v33 = vadd.f32 %v1822_v60, %v8107_v16  ;;  %v2561_v43 = vpop.f32.mrf.mxu0 }
 0x175   : > { %v5720_v2 = vpop.f32.mrf.mxu1 }
 0x176   : > { %v8399_v49 = vadd.f32 %v2548_v39, %v1947_v33  ;;  %v1952_v31 = vadd.f32 %v5720_v2, %v8123_v26  ;;  %v5755_v13 = vpop.f32.mrf.mxu0 }
 0x177   : > { %v1835_v42 = vpop.f32.mrf.mxu1 }
 0x178   : > { %v8402_v28 = vadd.f32 %v5754_v29, %v1952_v31  ;;  %v1950_v7 = vadd.f32 %v1835_v42, %v8127_v1  ;;  %v2564_v37 = vpop.f32.mrf.mxu0 }
 0x179   : > { %v5721_v34 = vpop.f32.mrf.mxu1 }
 0x17a   : > { %v8405_v50 = vadd.f32 %v2561_v43, %v1950_v7  ;;  %v1953_v15 = vadd.f32 %v5721_v34, %v8147_v3  ;;  %v5758_v54 = vpop.f32.mrf.mxu0  ;;  %v8918_v7 = vld [vmem:[#allocation8_spill] sm:$0xff] }
 0x17b   : > { %v1838_v16 = vpop.f32.mrf.mxu1 }
 0x17c   : > { %v8408_v41 = vadd.f32 %v5755_v13, %v1953_v15  ;;  %v1951_v22 = vadd.f32 %v1838_v16, %v8167_v61  ;;  %v2577_v25 = vpop.f32.mrf.mxu0 }
 0x17d   : > { %v5724_v26 = vpop.f32.mrf.mxu1 }
 0x17e   : > { %v8411_v51 = vadd.f32 %v2564_v37, %v1951_v22  ;;  %v1956_v19 = vadd.f32 %v5724_v26, %v8182_v27  ;;  %v5759_v17 = vpop.f32.mrf.mxu0 }
 0x17f   : > { %v1851_v1 = vpop.f32.mrf.mxu1 }
 0x180   : > { %v8414_v38 = vadd.f32 %v5758_v54, %v1956_v19  ;;  %v1954_v46 = vadd.f32 %v1851_v1, %v8193_v32  ;;  %v2580_v4 = vpop.f32.mrf.mxu0 }
 0x181   : > { %v5725_v3 = vpop.f32.mrf.mxu1 }
 0x182   : > { %v8417_v30 = vadd.f32 %v2577_v25, %v1954_v46  ;;  %v1957_v11 = vadd.f32 %v5725_v3, %v8211_v23  ;;  %v5762_v0 = vpop.f32.mrf.mxu0 }
 0x183   : > { %v1854_v61 = vpop.f32.mrf.mxu1 }
 0x184   : > { %v8420_v52 = vadd.f32 %v5759_v17, %v1957_v11  ;;  %v1955_v47 = vadd.f32 %v1854_v61, %v8219_v18  ;;  %v2593_v39 = vpop.f32.mrf.mxu0 }
 0x185   : > { %v5728_v27 = vpop.f32.mrf.mxu1 }
 0x186   : > { %v8423_v10 = vadd.f32 %v2580_v4, %v1955_v47  ;;  %v1960_v53 = vadd.f32 %v5728_v27, %v8238_v6  ;;  %v5763_v29 = vpop.f32.mrf.mxu0 }
 0x187   : > { %v1867_v32 = vpop.f32.mrf.mxu1 }
 0x188   : > { %v8426_v60 = vadd.f32 %v5762_v0, %v1960_v53  ;;  %v1958_v33 = vadd.f32 %v1867_v32, %v8252_v36  ;;  %v2596_v43 = vpop.f32.mrf.mxu0 }
 0x189   : > { %v5729_v23 = vpop.f32.mrf.mxu1 }
 0x18a   : > { %v8429_v2 = vadd.f32 %v2593_v39, %v1958_v33  ;;  %v1961_v31 = vadd.f32 %v5729_v23, %v8273_v35  ;;  %v5766_v13 = vpop.f32.mrf.mxu0 }
 0x18b   : > { %v1870_v18 = vpop.f32.mrf.mxu1 }
 0x18c   : > { %v8432_v42 = vadd.f32 %v5763_v29, %v1961_v31  ;;  %v1959_v37 = vadd.f32 %v1870_v18, %v8918_v7  ;;  %v2609_v34 = vpop.f32.mrf.mxu0 }
 0x18d   : > { %v5732_v6 = vpop.f32.mrf.mxu1 }
 0x18e   : > { %v8435_v15 = vadd.f32 %v2596_v43, %v1959_v37  ;;  %v1964_v54 = vadd.f32 %v5732_v6, %v8294_v8  ;;  %v5767_v16 = vpop.f32.mrf.mxu0 }
 0x18f   : > { %v1883_v36 = vpop.f32.mrf.mxu1 }
 0x190   : > { %v8438_v22 = vadd.f32 %v5766_v13, %v1964_v54  ;;  %v1962_v25 = vadd.f32 %v1883_v36, %v8298_v48  ;;  %v2612_v26 = vpop.f32.mrf.mxu0 }
 0x191   : > { %v5733_v35 = vpop.f32.mrf.mxu1 }
 0x192   : > { %v8441_v19 = vadd.f32 %v2609_v34, %v1962_v25  ;;  %v1965_v17 = vadd.f32 %v5733_v35, %v8318_v20  ;;  %v5770_v1 = vpop.f32.mrf.mxu0 }
 0x193   : > { %v1886_v46 = vpop.f32.mrf.mxu1 }
 0x194   : > { %v8444_v4 = vadd.f32 %v5767_v16, %v1965_v17  ;;  %v1963_v3 = vadd.f32 %v1886_v46, %v8331_v63  ;;  %v2625_v11 = vpop.f32.mrf.mxu0 }
 0x195   : > { %v5736_v8 = vpop.f32.mrf.mxu1 }
 0x196   : > { %v8447_v0 = vadd.f32 %v2612_v26, %v1963_v3  ;;  %v1968_v61 = vadd.f32 %v5736_v8, %v8339_v58  ;;  %v5771_v47 = vpop.f32.mrf.mxu0 }
 0x197   : > { %v1899_v48 = vpop.f32.mrf.mxu1 }
 0x198   : > { %v8450_v39 = vadd.f32 %v5770_v1, %v1968_v61  ;;  %v1966_v27 = vadd.f32 %v1899_v48, %v8342_v9  ;;  %v2628_v53 = vpop.f32.mrf.mxu0 }
 0x199   : > { %v5737_v20 = vpop.f32.mrf.mxu1 }
 0x19a   : > { %v8453_v29 = vadd.f32 %v2625_v11, %v1966_v27  ;;  %v1969_v32 = vadd.f32 %v5737_v20, %v8351_v56  ;;  %v5774_v33 = vpop.f32.mrf.mxu0 }
 0x19b   : > { %v1902_v63 = vpop.f32.mrf.mxu1 }
 0x19c   : > { %v8456_v43 = vadd.f32 %v5771_v47, %v1969_v32  ;;  %v1967_v23 = vadd.f32 %v1902_v63, %v8358_v45  ;;  %v2641_v31 = vpop.f32.mrf.mxu0 }
 0x19d   : > { %v5740_v58 = vpop.f32.mrf.mxu1 }
 0x19e   : > { %v8459_v13 = vadd.f32 %v2628_v53, %v1967_v23  ;;  %v1972_v18 = vadd.f32 %v5740_v58, %v8364_v40  ;;  %v5775_v7 = vpop.f32.mrf.mxu0 }
 0x19f   : > { %v1915_v9 = vpop.f32.mrf.mxu1 }
 0x1a0   : > { %v8462_v37 = vadd.f32 %v5774_v33, %v1972_v18  ;;  %v1970_v34 = vadd.f32 %v1915_v9, %v8367_v55  ;;  %v2644_v6 = vpop.f32.mrf.mxu0 }
 0x1a1   : > { %v5741_v56 = vpop.f32.mrf.mxu1 }
 0x1a2   : > { %v8465_v54 = vadd.f32 %v2641_v31, %v1970_v34  ;;  %v1973_v16 = vadd.f32 %v5741_v56, %v8371_v44  ;;  %v5778_v36 = vpop.f32.mrf.mxu0 }
 0x1a3   : > { %v1918_v45 = vpop.f32.mrf.mxu1 }
 0x1a4   : > { %v8468_v25 = vadd.f32 %v5775_v7, %v1973_v16  ;;  %v1971_v26 = vadd.f32 %v1918_v45, %v8375_v24  ;;  %v2657_v35 = vpop.f32.mrf.mxu0 }
 0x1a5   : > { %v5744_v40 = vpop.f32.mrf.mxu1 }
 0x1a6   : > { %v8471_v17 = vadd.f32 %v2644_v6, %v1971_v26  ;;  %v1976_v1 = vadd.f32 %v5744_v40, %v8378_v14  ;;  %v5779_v46 = vpop.f32.mrf.mxu0 }
 0x1a7   : > { %v1931_v55 = vpop.f32.mrf.mxu1 }
 0x1a8   : > { %v8474_v3 = vadd.f32 %v5778_v36, %v1976_v1  ;;  %v1974_v11 = vadd.f32 %v1931_v55, %v8381_v62  ;;  %v2660_v8 = vpop.f32.mrf.mxu0 }
 0x1a9   : > { %v5745_v44 = vpop.f32.mrf.mxu1 }
 0x1aa   : > { %v8477_v61 = vadd.f32 %v2657_v35, %v1974_v11  ;;  %v1977_v47 = vadd.f32 %v5745_v44, %v8384_v57  ;;  %v5818_v48 = vpop.f32.mrf.mxu0 }
 0x1ab   : > { %v1934_v24 = vpop.f32.mrf.mxu1 }
 0x1ac   : > { %v8480_v27 = vadd.f32 %v5779_v46, %v1977_v47  ;;  %v1975_v53 = vadd.f32 %v1934_v24, %v8387_v12  ;;  %v8483_v20 = vpop.f32.mrf.mxu0 }
 0x1ad   : > { %v5784_v14 = vpop.f32.mrf.mxu1 }
 0x1ae   : > { %v8485_v32 = vadd.f32 %v2660_v8, %v1975_v53  ;;  %v3144_v33 = vadd.f32 %v5784_v14, %v8390_v5  ;;  %v5819_v62 = vpop.f32.mrf.mxu0 }
 0x1af   : > { %v8488_v63 = vpop.f32.mrf.mxu1 }
 0x1b0   : > { %v8490_v23 = vadd.f32 %v5818_v48, %v3144_v33  ;;  %v8492_v31 = vpop.f32.mrf.mxu0 }
 0x1b1   : > { %v5785_v57 = vpop.f32.mrf.mxu1 }
 0x1b2   : > { %v3145_v58 = vadd.f32 %v5785_v57, %v8396_v59  ;;  %v5822_v18 = vpop.f32.mrf.mxu0 }
 0x1b3   : > { %v8495_v7 = vpop.f32.mrf.mxu1 }
 0x1b4   : > { %v8497_v12 = vadd.f32 %v5819_v62, %v3145_v58  ;;  %v3390_v9 = vpop.f32.mrf.mxu0 }
 0x1b5   : > { %v5788_v34 = vpop.f32.mrf.mxu1 }
 0x1b6   : > { %v3148_v6 = vadd.f32 %v5788_v34, %v8402_v28  ;;  %v5823_v5 = vpop.f32.mrf.mxu0 }
 0x1b7   : > { %v3031_v56 = vpop.f32.mrf.mxu1 }
 0x1b8   : > { %v8500_v16 = vadd.f32 %v5822_v18, %v3148_v6  ;;  %v3146_v36 = vadd.f32 %v3031_v56, %v8405_v50  ;;  %v3393_v45 = vpop.f32.mrf.mxu0 }
 0x1b9   : > { %v5789_v26 = vpop.f32.mrf.mxu1 }
 0x1ba   : > { %v8503_v35 = vadd.f32 %v3390_v9, %v3146_v36  ;;  %v3149_v59 = vadd.f32 %v5789_v26, %v8408_v41  ;;  %v5826_v40 = vpop.f32.mrf.mxu0 }
 0x1bb   : > { %v3034_v1 = vpop.f32.mrf.mxu1 }
 0x1bc   : > { %v8506_v46 = vadd.f32 %v5823_v5, %v3149_v59  ;;  %v3147_v55 = vadd.f32 %v3034_v1, %v8411_v51  ;;  %v3406_v11 = vpop.f32.mrf.mxu0 }
 0x1bd   : > { %v5792_v28 = vpop.f32.mrf.mxu1 }
 0x1be   : > { %v8509_v8 = vadd.f32 %v3393_v45, %v3147_v55  ;;  %v3152_v44 = vadd.f32 %v5792_v28, %v8414_v38  ;;  %v5827_v47 = vpop.f32.mrf.mxu0 }
 0x1bf   : > { %v3047_v50 = vpop.f32.mrf.mxu1 }
 0x1c0   : > { %v8512_v48 = vadd.f32 %v5826_v40, %v3152_v44  ;;  %v3150_v24 = vadd.f32 %v3047_v50, %v8417_v30  ;;  %v3409_v53 = vpop.f32.mrf.mxu0 }
 0x1c1   : > { %v5793_v41 = vpop.f32.mrf.mxu1 }
 0x1c2   : > { %v8515_v14 = vadd.f32 %v3406_v11, %v3150_v24  ;;  %v3153_v33 = vadd.f32 %v5793_v41, %v8420_v52  ;;  %v5830_v62 = vpop.f32.mrf.mxu0 }
 0x1c3   : > { %v3050_v51 = vpop.f32.mrf.mxu1 }
 0x1c4   : > { %v8518_v57 = vadd.f32 %v5827_v47, %v3153_v33  ;;  %v3151_v58 = vadd.f32 %v3050_v51, %v8423_v10  ;;  %v3422_v18 = vpop.f32.mrf.mxu0 }
 0x1c5   : > { %v5796_v38 = vpop.f32.mrf.mxu1 }
 0x1c6   : > { %v8521_v9 = vadd.f32 %v3409_v53, %v3151_v58  ;;  %v3156_v34 = vadd.f32 %v5796_v38, %v8426_v60  ;;  %v5831_v6 = vpop.f32.mrf.mxu0 }
 0x1c7   : > { %v3063_v30 = vpop.f32.mrf.mxu1 }
 0x1c8   : > { %v8524_v5 = vadd.f32 %v5830_v62, %v3156_v34  ;;  %v3154_v56 = vadd.f32 %v3063_v30, %v8429_v2  ;;  %v3425_v36 = vpop.f32.mrf.mxu0 }
 0x1c9   : > { %v5797_v52 = vpop.f32.mrf.mxu1 }
 0x1ca   : > { %v8527_v45 = vadd.f32 %v3422_v18, %v3154_v56  ;;  %v3157_v26 = vadd.f32 %v5797_v52, %v8432_v42  ;;  %v5834_v59 = vpop.f32.mrf.mxu0 }
 0x1cb   : > { %v3066_v10 = vpop.f32.mrf.mxu1 }
 0x1cc   : > { %v8530_v40 = vadd.f32 %v5831_v6, %v3157_v26  ;;  %v3155_v1 = vadd.f32 %v3066_v10, %v8435_v15  ;;  %v8533_v55 = vpop.f32.mrf.mxu0 }
 0x1cd   : > { %v5800_v60 = vpop.f32.mrf.mxu1 }
 0x1ce   : > { %v8535_v11 = vadd.f32 %v3425_v36, %v3155_v1  ;;  %v3160_v28 = vadd.f32 %v5800_v60, %v8438_v22  ;;  %v5835_v2 = vpop.f32.mrf.mxu0 }
 0x1cf   : > { %v8538_v44 = vpop.f32.mrf.mxu1 }
 0x1d0   : > { %v8540_v47 = vadd.f32 %v5834_v59, %v3160_v28  ;;  %v8542_v50 = vpop.f32.mrf.mxu0 }
 0x1d1   : > { %v5801_v42 = vpop.f32.mrf.mxu1 }
 0x1d2   : > { %v3161_v24 = vadd.f32 %v5801_v42, %v8444_v4  ;;  %v5838_v53 = vpop.f32.mrf.mxu0 }
 0x1d3   : > { %v8545_v41 = vpop.f32.mrf.mxu1 }
 0x1d4   : > { %v8547_v15 = vadd.f32 %v5835_v2, %v3161_v24  ;;  %v3454_v33 = vpop.f32.mrf.mxu0 }
 0x1d5   : > { %v5804_v62 = vpop.f32.mrf.mxu1 }
 0x1d6   : > { %v3164_v51 = vadd.f32 %v5804_v62, %v8450_v39  ;;  %v5839_v22 = vpop.f32.mrf.mxu0 }
 0x1d7   : > { %v3095_v58 = vpop.f32.mrf.mxu1 }
 0x1d8   : > { %v8550_v18 = vadd.f32 %v5838_v53, %v3164_v51  ;;  %v3162_v38 = vadd.f32 %v3095_v58, %v8453_v29  ;;  %v3457_v34 = vpop.f32.mrf.mxu0 }
 0x1d9   : > { %v5805_v6 = vpop.f32.mrf.mxu1 }
 0x1da   : > { %v8553_v30 = vadd.f32 %v3454_v33, %v3162_v38  ;;  %v3165_v4 = vadd.f32 %v5805_v6, %v8456_v43  ;;  %v5842_v56 = vpop.f32.mrf.mxu0 }
 0x1db   : > { %v3098_v36 = vpop.f32.mrf.mxu1 }
 0x1dc   : > { %v8556_v52 = vadd.f32 %v5839_v22, %v3165_v4  ;;  %v3163_v26 = vadd.f32 %v3098_v36, %v8459_v13  ;;  %v3470_v59 = vpop.f32.mrf.mxu0  ;;  %v3142_v36 = vadd.f32 %v8488_v63, %v8393_v21 }
 0x1dd   : > { %v5808_v39 = vpop.f32.mrf.mxu1 }
 0x1de   : > { %v8559_v10 = vadd.f32 %v3457_v34, %v3163_v26  ;;  %v3168_v1 = vadd.f32 %v5808_v39, %v8462_v37  ;;  %v5843_v60 = vpop.f32.mrf.mxu0 }
 0x1df   : > { %v3111_v29 = vpop.f32.mrf.mxu1 }
 0x1e0   : > { %v8562_v28 = vadd.f32 %v5842_v56, %v3168_v1  ;;  %v3166_v2 = vadd.f32 %v3111_v29, %v8465_v54  ;;  %v3473_v42 = vpop.f32.mrf.mxu0 }
 0x1e1   : > { %v5809_v43 = vpop.f32.mrf.mxu1 }
 0x1e2   : > { %v8565_v24 = vadd.f32 %v3470_v59, %v3166_v2  ;;  %v3169_v53 = vadd.f32 %v5809_v43, %v8468_v25  ;;  %v5846_v33 = vpop.f32.mrf.mxu0  ;;  %v3501_v2 = vadd.f32 %v8483_v20, %v3142_v36 }
 0x1e3   : > { %v3114_v13 = vpop.f32.mrf.mxu1 }
 0x1e4   : > { %v8568_v62 = vadd.f32 %v5843_v60, %v3169_v53  ;;  %v3167_v51 = vadd.f32 %v3114_v13, %v8471_v17  ;;  %v3486_v22 = vpop.f32.mrf.mxu0 }
 0x1e5   : > { %v5812_v37 = vpop.f32.mrf.mxu1 }
 0x1e6   : > { %v8571_v58 = vadd.f32 %v3473_v42, %v3167_v51  ;;  %v3172_v38 = vadd.f32 %v5812_v37, %v8474_v3  ;;  %v5847_v34 = vpop.f32.mrf.mxu0 }
 0x1e7   : > { %v3127_v54 = vpop.f32.mrf.mxu1 }
 0x1e8   : > { %v8574_v6 = vadd.f32 %v5846_v33, %v3172_v38  ;;  %v3170_v4 = vadd.f32 %v3127_v54, %v8477_v61  ;;  %v3489_v56 = vpop.f32.mrf.mxu0  ;;  %v3143_v61 = vadd.f32 %v8495_v7, %v8399_v49 }
 0x1e9   : > { %v5813_v25 = vpop.f32.mrf.mxu1 }
 0x1ea   : > { %v8579_v26 = vadd.f32 %v3486_v22, %v3170_v4  ;;  %v3173_v17 = vadd.f32 %v5813_v25, %v8480_v27  ;;  %v5886_v59 = vpop.f32.mrf.mxu0  ;;  %v3502_v33 = vadd.f32 %v8492_v31, %v3143_v61 }
 0x1eb   : > { %v3130_v39 = vpop.f32.mrf.mxu1 }
 0x1ec   : > { %v8582_v1 = vadd.f32 %v5847_v34, %v3173_v17  ;;  %v3171_v3 = vadd.f32 %v3130_v39, %v8485_v32  ;;  %v4570_v60 = vpop.f32.mrf.mxu0  ;;  %v8594_v32 = vld [vmem:[%s8734_s2] ss:$0 sm:$0xff] }
 0x1ed   : > { %v5852_v29 = vpop.f32.mrf.mxu1 }
 0x1ee   : > { %v8588_v42 = vadd.f32 %v3489_v56, %v3171_v3  ;;  %v5887_v21 = vpop.f32.mrf.mxu0  ;;  %v4229_v20 = vadd.f32 %v5852_v29, %v8490_v23 }
 0x1ef   : > { %v4100_v63 = vpop.f32.mrf.mxu1 }
 0x1f0   : > { %v4227_v43 = vadd.f32 %v4100_v63, %v3501_v2  ;;  %v4573_v53 = vpop.f32.mrf.mxu0  ;;  %v4699_v31 = vadd.f32 %v5886_v59, %v4229_v20 }
 0x1f1   : > { %v5853_v27 = vpop.f32.mrf.mxu1 }
 0x1f2   : > { %v4697_v13 = vadd.f32 %v4570_v60, %v4227_v43  ;;  %v5890_v51 = vpop.f32.mrf.mxu0  ;;  %v4230_v56 = vadd.f32 %v5853_v27, %v8497_v12  ;;  %v4738_v29 = vadd.f32 %v8594_v32, %v4699_v31 }
 0x1f3   : > { %v4103_v22 = vpop.f32.mrf.mxu1 }
 0x1f4   : > { %v4228_v49 = vadd.f32 %v4103_v22, %v3502_v33  ;;  %v4736_v7 = vadd.f32 %v8594_v32, %v4697_v13  ;;  %v4586_v37 = vpop.f32.mrf.mxu0  ;;  %v4700_v3 = vadd.f32 %v5887_v21, %v4230_v56 }
 0x1f5   : > { %v5856_v38 = vpop.f32.mrf.mxu1 }
 0x1f6   : > { %v4698_v34 = vadd.f32 %v4573_v53, %v4228_v49  ;;  %4768 = vxpose.xlu0.b32.start [1/16] (narrow) %v4736_v7, 8  ;;  %v5891_v54 = vpop.f32.mrf.mxu0  ;;  %v4739_v53 = vadd.f32 %v8594_v32, %v4700_v3 }
 0x1f7   : > { %v4116_v4 = vpop.f32.mrf.mxu1 }
 0x1f8   : > { %v4737_v25 = vadd.f32 %v8594_v32, %v4698_v34  ;;  %v4589_v36 = vpop.f32.mrf.mxu0  ;;  %v4231_v60 = vadd.f32 %v4116_v4, %v8503_v35  ;;  %v4233_v35 = vadd.f32 %v5856_v38, %v8500_v16  ;;  %v3158_v16 = vadd.f32 %v8538_v44, %v8441_v19 }
 0x1f9   : > { %v5857_v17 = vpop.f32.mrf.mxu1 }
 0x1fa   : > { %4769 = vxpose.xlu0.b32.cont [2/16] (narrow) %v4737_v25, 8  ;;  %v8600_v39 = vpop.f32.mrf.mxu0  ;;  %v4701_v12 = vadd.f32 %v4586_v37, %v4231_v60  ;;  %v4703_v34 = vadd.f32 %v5890_v51, %v4233_v35  ;;  %v4234_v4 = vadd.f32 %v5857_v17, %v8506_v46  ;;  %v3517_v46 = vadd.f32 %v8533_v55, %v3158_v16 }
 0x1fb   : > { %v4119_v23 = vpop.f32.mrf.mxu1  ;;  %v3159_v17 = vadd.f32 %v8545_v41, %v8447_v0 }
 0x1fc   : > { %v4602_v2 = vpop.f32.mrf.mxu0  ;;  %v4232_v43 = vadd.f32 %v4119_v23, %v8509_v8  ;;  %v4740_v20 = vadd.f32 %v8594_v32, %v4701_v12  ;;  %v4704_v3 = vadd.f32 %v5891_v54, %v4234_v4  ;;  %v4742_v60 = vadd.f32 %v8594_v32, %v4703_v34 }
 0x1fd   : > { %v5860_v61 = vpop.f32.mrf.mxu1  ;;  %v3518_v35 = vadd.f32 %v8542_v50, %v3159_v17 }
 0x1fe   : > { %4770 = vxpose.xlu0.b32.cont [3/16] (narrow) %v4738_v29, 8  ;;  %v8604_v63 = vpop.f32.mrf.mxu0  ;;  %v4702_v22 = vadd.f32 %v4589_v36, %v4232_v43  ;;  %v4237_v55 = vadd.f32 %v5860_v61, %v8512_v48 }
 0x1ff   : > { %v4132_v59 = vpop.f32.mrf.mxu1 }
 0x200   : > { %v4605_v27 = vpop.f32.mrf.mxu0  ;;  %v4741_v31 = vadd.f32 %v8594_v32, %v4702_v22  ;;  %v4235_v36 = vadd.f32 %v4132_v59, %v8515_v14  ;;  %v4743_v14 = vadd.f32 %v8594_v32, %v4704_v3 }
 0x201   : > { %v5861_v33 = vpop.f32.mrf.mxu1 }
 0x202   : > { %4771 = vxpose.xlu0.b32.cont [4/16] (narrow) %v4739_v53, 8  ;;  %v8608_v13 = vpop.f32.mrf.mxu0  ;;  %v4705_v43 = vadd.f32 %v4602_v2, %v4235_v36  ;;  %v4707_v36 = vadd.f32 %v8600_v39, %v4237_v55  ;;  %v4238_v48 = vadd.f32 %v5861_v33, %v8518_v57 }
 0x203   : > { %v4135_v21 = vpop.f32.mrf.mxu1 }
 0x204   : > { %v8612_v49 = vpop.f32.mrf.mxu0  ;;  %v4236_v19 = vadd.f32 %v4135_v21, %v8521_v9  ;;  %v4744_v41 = vadd.f32 %v8594_v32, %v4705_v43  ;;  %v4708_v17 = vadd.f32 %v8604_v63, %v4238_v48 }
 0x205   : > { %v8614_v7 = vpop.f32.mrf.mxu1 }
 0x206   : > { %4772 = vxpose.xlu0.b32.cont [5/16] (narrow) %v4740_v20, 8  ;;  %v8616_v37 = vpop.f32.mrf.mxu0  ;;  %v4706_v2 = vadd.f32 %v4605_v27, %v4236_v19 }
 0x207   : > { %v4148_v8 = vpop.f32.mrf.mxu1 }
 0x208   : > { %v8620_v56 = vpop.f32.mrf.mxu0  ;;  %v4239_v43 = vadd.f32 %v4148_v8, %v8527_v45 }
 0x209   : > { %v8622_v25 = vpop.f32.mrf.mxu1 }
 0x20a   : > { %4773 = vxpose.xlu0.b32.cont [6/16] (narrow) %v4741_v31, 8  ;;  %v5902_v38 = vpop.f32.mrf.mxu0 }
 0x20b   : > { %v4151_v23 = vpop.f32.mrf.mxu1 }
 0x20c   : > { %v4634_v51 = vpop.f32.mrf.mxu0  ;;  %v4240_v63 = vadd.f32 %v4151_v23, %v8535_v11 }
 0x20d   : > { %v5868_v29 = vpop.f32.mrf.mxu1 }
 0x20e   : > { %4774 = vxpose.xlu0.b32.cont [7/16] (narrow) %v4742_v60, 8  ;;  %v5903_v12 = vpop.f32.mrf.mxu0  ;;  %v4245_v34 = vadd.f32 %v5868_v29, %v8540_v47  ;;  %v4745_v47 = vadd.f32 %v8594_v32, %v4706_v2 }
 0x20f   : > { %v4164_v53 = vpop.f32.mrf.mxu1 }
 0x210   : > { %v4243_v44 = vadd.f32 %v4164_v53, %v3517_v46  ;;  %v4637_v59 = vpop.f32.mrf.mxu0  ;;  %v4715_v3 = vadd.f32 %v5902_v38, %v4245_v34  ;;  %v4746_v38 = vadd.f32 %v8594_v32, %v4707_v36 }
 0x211   : > { %v5869_v54 = vpop.f32.mrf.mxu1 }
 0x212   : > { %v4713_v22 = vadd.f32 %v4634_v51, %v4243_v44  ;;  %4775 = vxpose.xlu0.b32.cont [8/16] (narrow) %v4743_v14, 8  ;;  %v4246_v27 = vadd.f32 %v5869_v54, %v8547_v15  ;;  %v4754_v15 = vadd.f32 %v8594_v32, %v4715_v3 }
 0x213   : > { %v8634_v20 = vpop.f32.mrf.mxu0  ;;  %v4167_v0 = vpop.f32.mrf.mxu1 }
 0x214   : > { %v4244_v9 = vadd.f32 %v4167_v0, %v3518_v35  ;;  %v4752_v21 = vadd.f32 %v8594_v32, %v4713_v22  ;;  %v4716_v33 = vadd.f32 %v5903_v12, %v4246_v27 }
 0x215   : > { %v4650_v4 = vpop.f32.mrf.mxu0  ;;  %v5872_v31 = vpop.f32.mrf.mxu1 }
 0x216   : > { %v4714_v16 = vadd.f32 %v4637_v59, %v4244_v9  ;;  %4776 = vxpose.xlu0.b32.cont [9/16] (narrow) %v4744_v41, 8  ;;  %4800 = vxpose.xlu1.b32.start [1/16] (narrow) %v4752_v21, 8  ;;  %v4709_v59 = vadd.f32 %v8612_v49, %v4239_v43  ;;  %v4755_v22 = vadd.f32 %v8594_v32, %v4716_v33 }
 0x217   : > { %v8640_v50 = vpop.f32.mrf.mxu0  ;;  %v4180_v61 = vpop.f32.mrf.mxu1 }
 0x218   : > { %v4753_v60 = vadd.f32 %v8594_v32, %v4714_v16  ;;  %v4247_v39 = vadd.f32 %v4180_v61, %v8553_v30  ;;  %v4747_v30 = vadd.f32 %v8594_v32, %v4708_v17  ;;  %v4748_v34 = vadd.f32 %v8594_v32, %v4709_v59 }
 0x219   : > { %v4653_v51 = vpop.f32.mrf.mxu0  ;;  %v5873_v29 = vpop.f32.mrf.mxu1 }
 0x21a   : > { %4777 = vxpose.xlu0.b32.cont [10/16] (narrow) %v4745_v47, 8  ;;  %4801 = vxpose.xlu1.b32.cont [2/16] (narrow) %v4753_v60, 8  ;;  %v4717_v45 = vadd.f32 %v4650_v4, %v4247_v39 }
 0x21b   : > { %v5910_v46 = vpop.f32.mrf.mxu0  ;;  %v4183_v57 = vpop.f32.mrf.mxu1 }
 0x21c   : > { %v4248_v12 = vadd.f32 %v4183_v57, %v8559_v10  ;;  %v4710_v10 = vadd.f32 %v8620_v56, %v4240_v63  ;;  %v4756_v9 = vadd.f32 %v8594_v32, %v4717_v45 }
 0x21d   : > { %v4666_v53 = vpop.f32.mrf.mxu0  ;;  %v5876_v19 = vpop.f32.mrf.mxu1 }
 0x21e   : > { %v4253_v44 = vadd.f32 %v5876_v19, %v8562_v28  ;;  %4778 = vxpose.xlu0.b32.cont [11/16] (narrow) %v4746_v38, 8  ;;  %4802 = vxpose.xlu1.b32.cont [3/16] (narrow) %v4754_v15, 8  ;;  %v4241_v28 = vadd.f32 %v8614_v7, %v8524_v5  ;;  %v4718_v21 = vadd.f32 %v4653_v51, %v4248_v12 }
 0x21f   : > { %v5911_v14 = vpop.f32.mrf.mxu0  ;;  %v4196_v8 = vpop.f32.mrf.mxu1  ;;  %v4749_v27 = vadd.f32 %v8594_v32, %v4710_v10 }
 0x220   : > { %v4251_v54 = vadd.f32 %v4196_v8, %v8565_v24  ;;  %v4723_v35 = vadd.f32 %v5910_v46, %v4253_v44  ;;  %v4249_v24 = vadd.f32 %v5872_v31, %v8550_v18  ;;  %v4711_v16 = vadd.f32 %v8608_v13, %v4241_v28 }
 0x221   : > { %v4669_v55 = vpop.f32.mrf.mxu0  ;;  %v5877_v0 = vpop.f32.mrf.mxu1  ;;  %v4242_v31 = vadd.f32 %v8622_v25, %v8530_v40 }
 0x222   : > { %v4254_v49 = vadd.f32 %v5877_v0, %v8568_v62  ;;  %v4721_v41 = vadd.f32 %v4666_v53, %v4251_v54  ;;  %4779 = vxpose.xlu0.b32.cont [12/16] (narrow) %v4747_v30, 8  ;;  %4803 = vxpose.xlu1.b32.cont [4/16] (narrow) %v4755_v22, 8  ;;  %v4762_v23 = vadd.f32 %v8594_v32, %v4723_v35 }
 0x223   : > { %v5914_v11 = vpop.f32.mrf.mxu0  ;;  %v4199_v2 = vpop.f32.mrf.mxu1  ;;  %v4719_v61 = vadd.f32 %v8634_v20, %v4249_v24 }
 0x224   : > { %v4252_v5 = vadd.f32 %v4199_v2, %v8571_v58  ;;  %v4724_v7 = vadd.f32 %v5911_v14, %v4254_v49  ;;  %v4760_v4 = vadd.f32 %v8594_v32, %v4721_v41  ;;  %v4250_v58 = vadd.f32 %v5873_v29, %v8556_v52 }
 0x225   : > { %v4682_v62 = vpop.f32.mrf.mxu0  ;;  %v5880_v36 = vpop.f32.mrf.mxu1  ;;  %v4712_v52 = vadd.f32 %v8616_v37, %v4242_v31  ;;  %v4758_v29 = vadd.f32 %v8594_v32, %v4719_v61 }
 0x226   : > { %v4257_v48 = vadd.f32 %v5880_v36, %v8574_v6  ;;  %v4722_v56 = vadd.f32 %v4669_v55, %v4252_v5  ;;  %4780 = vxpose.xlu0.b32.cont [13/16] (narrow) %v4748_v34, 8  ;;  %4804 = vxpose.xlu1.b32.cont [5/16] (narrow) %v4756_v9, 8  ;;  %v4763_v18 = vadd.f32 %v8594_v32, %v4724_v7 }
 0x227   : > { %v4212_v3 = vpop.f32.mrf.mxu1  ;;  %v5915_v47 = vpop.f32.mrf.mxu0  ;;  %v4757_v6 = vadd.f32 %v8594_v32, %v4718_v21  ;;  %v4720_v39 = vadd.f32 %v8640_v50, %v4250_v58  ;;  %v4751_v53 = vadd.f32 %v8594_v32, %v4712_v52 }
 0x228   : > { %v4255_v13 = vadd.f32 %v4212_v3, %v8579_v26  ;;  %v4727_v60 = vadd.f32 %v5914_v11, %v4257_v48  ;;  %v4761_v51 = vadd.f32 %v8594_v32, %v4722_v56  ;;  %v4750_v26 = vadd.f32 %v8594_v32, %v4711_v16 }
 0x229   : > { %v5881_v46 = vpop.f32.mrf.mxu1  ;;  %v4685_v20 = vpop.f32.mrf.mxu0  ;;  %v4759_v37 = vadd.f32 %v8594_v32, %v4720_v39 }
 0x22a   : > { %v4258_v17 = vadd.f32 %v5881_v46, %v8582_v1  ;;  %v4725_v43 = vadd.f32 %v4682_v62, %v4255_v13  ;;  %4805 = vxpose.xlu1.b32.cont [6/16] (narrow) %v4757_v6, 8  ;;  %4781 = vxpose.xlu0.b32.cont [14/16] (narrow) %v4749_v27, 8  ;;  %v4766_v40 = vadd.f32 %v8594_v32, %v4727_v60 }
 0x22b   : > { %v4215_v25 = vpop.f32.mrf.mxu1 }
 0x22c   : > { %v4256_v57 = vadd.f32 %v4215_v25, %v8588_v42  ;;  %v4728_v33 = vadd.f32 %v5915_v47, %v4258_v17  ;;  %v4764_v1 = vadd.f32 %v8594_v32, %v4725_v43 }
 0x22e   : > { %v4726_v38 = vadd.f32 %v4685_v20, %v4256_v57  ;;  %4806 = vxpose.xlu1.b32.cont [7/16] (narrow) %v4758_v29, 8  ;;  %4782 = vxpose.xlu0.b32.cont [15/16] (narrow) %v4750_v26, 8  ;;  %v4767_v15 = vadd.f32 %v8594_v32, %v4728_v33 }
 0x230   : > { %v4765_v19 = vadd.f32 %v8594_v32, %v4726_v38 }
 0x232   : > { %4807 = vxpose.xlu1.b32.cont [8/16] (narrow) %v4759_v37, 8  ;;  %4783 = vxpose.xlu0.b32.end [16/16] (narrow) %v4751_v53, 8 }
 0x236   : > { %4808 = vxpose.xlu1.b32.cont [9/16] (narrow) %v4760_v4, 8 }
 0x23a   : > { %4809 = vxpose.xlu1.b32.cont [10/16] (narrow) %v4761_v51, 8 }
 0x23e   : > { %4810 = vxpose.xlu1.b32.cont [11/16] (narrow) %v4762_v23, 8 }
 0x242   : > { %4811 = vxpose.xlu1.b32.cont [12/16] (narrow) %v4763_v18, 8 }
 0x246   : > { %4812 = vxpose.xlu1.b32.cont [13/16] (narrow) %v4764_v1, 8 }
 0x24a   : > { %4813 = vxpose.xlu1.b32.cont [14/16] (narrow) %v4765_v19, 8 }
 0x24e   : > { %4814 = vxpose.xlu1.b32.cont [15/16] (narrow) %v4766_v40, 8 }
 0x252   : > { %4815 = vxpose.xlu1.b32.end [16/16] (narrow) %v4767_v15, 8 }
 0x272   : > { %v4784_v42 = vpop.trf.xlu0 }
 0x273   : > { %4832 = vst [vmem:[%s163_s6] sm:$0xff] %v4784_v42 }
 0x292   : > { %v4816_v32 = vpop.trf.xlu1 }
 0x293   : > { %4833 = vst [vmem:[%s163_s6 + $0x8] sm:$0xff] %v4816_v32 }
 0x294   : > { %6031 = shalt.err (!%p6028_p3)
}
 0x295   : > { %s6032_s25 = scalar_lea.hbm %s4847_s11, 256  ;;  %s6036_s28 = scalar_lea.hbm %s8735_s3, 512 }
 0x296   : > { %p6033_p4 = scmp.ne.s32.totalorder %s4847_s11, %s6032_s25  ;;  %p6037_p9 = scmp.lt.s32.totalorder %s4847_s11, %s8735_s3 }
 0x297   : > { %p6038_p10 = scmp.lt.s32.totalorder %s6036_s28, %s6032_s25 }
 0x298   : > { %p6034_p7 = pnand %p6033_p4, %p6139_p5 }
 0x299   : > { %p6039_p11 = por %p6038_p10, %p6037_p9 }
 0x29a   : > { %p6035_p8 = pneg %p6034_p7 }
 0x29c   : > { %p6040_p12 = pnand %p6039_p11, %p6035_p8 }
 0x29e   : > { %6043 = shalt.err (!%p6040_p12)
}
 0x29f   : > { %5929 = dma.vmem_to_hbm [thread:$0]  (%p6139_p5), %s8694_s7, 256, %s4847_s11, %s4835_s17  }
 0x2a0 PF: > { %p5935_p13 = scmp.ge.s32.totalorder %s6078_s15, 2  ;;  %s4861_s4 = sand.u32 1, %s6066_s12  }
 0x2a1   : > { %s4862_s5 = scalar_lea.sflag [#allocation3], %s4861_s4 }
 0x2a2   : > { %p5932_p0 = pnand %p5935_p13, %p6143_p6 }
 0x2a4   : > { %p5933_p1 = pneg %p5932_p0 }
 0x2a6   : > { %6061 = dma.done.wait (%p5933_p1), %s4862_s5, 256  }
 0x2a7   : > { %6063 = vsyncadd (%p5933_p1), %s4862_s5, 4294967040  ;;  %p13_p2 = scmp.ge.s32.totalorder %s6126_s18, 4   ;;  %s8919_s12 = smov %s6070_s13 }
 0x2a8   : > { %s8920_s13 = smov %s6074_s14  ;;  %s8921_s14 = smov %s6137_s21 }
 0x2a9   : > { %s8922_s15 = smov %s6126_s18  ;;  %15 = sbr.rel (!%p13_p2) target bundleno = 3 (0x3), region = 77 }
 0x2ae   :  { %4867 = vsyncpa [#allocation3], 1 }
 0x2af   :  { %4869 = vsyncpa [#allocation3 + $0x1], 1 }

</bundles_post_ra>
